<compile_context>
chip_gen: v5e
topology: v5e:2x2
jax: 0.10.0
libtpu: 0.0.40
codegen_flags: <defaults>
</compile_context>

<pallas_src>
import numpy as np

import jax
import jax.numpy as jnp
from jax import lax
from jax.experimental import pallas as pl
from jax.experimental.pallas import tpu as pltpu

_BN_EPS = 1e-5
_ROW_PAD = 8          # sublane-aligned leading pad for the dy-halo scratch


# ---------------------------------------------------------------------------
# Fused feature_base_block kernel
# ---------------------------------------------------------------------------
def _make_block_kernel(H, W, Cin, Cout):
    Ho, Wo = H // 2, W // 2
    WCin = W * Cin
    WCout = W * Cout

    def kernel(x_ref, b01_ref, t01_ref, band2_ref, t2_ref, o_ref,
               xp_ref, hp_ref):
        # x_ref    : (1, H, W*Cin)          block input (channels-fastest rows)
        # b01_ref  : (3, W*Cin, 2*W*Cout)   banded [skip | BN-folded conv1] weights
        # t01_ref  : (1, 2*W*Cout)          tiled biases for skip / conv1
        # band2_ref: (3, W*Cout, W*Cout)    banded BN-folded conv2 weights
        # t2_ref   : (1, W*Cout)            tiled bias for conv2
        # o_ref    : (1, Ho, Wo, Cout)      pooled block output
        # xp_ref   : (H+16, W*Cin)  VMEM    row-padded input (dy halo)
        # hp_ref   : (H+16, W*Cout) VMEM    row-padded hidden activation

        # ---- stage 0: row-padded input in VMEM (dx halo lives in the weights)
        xp_ref[...] = jnp.zeros_like(xp_ref)
        xp_ref[_ROW_PAD:_ROW_PAD + H, :] = x_ref[0]

        # ---- stage 1: skip conv + conv1(+BN+ReLU) fused: 3 banded matmuls
        acc1 = jnp.zeros((H, 2 * WCout), jnp.float32)
        for dy in range(3):
            acc1 = acc1 + jnp.dot(
                xp_ref[_ROW_PAD - 1 + dy:_ROW_PAD - 1 + dy + H, :],
                b01_ref[dy], preferred_element_type=jnp.float32)
        acc1 = acc1 + t01_ref[0]
        res = acc1[:, :WCout]                     # skip branch (no activation)
        h = jnp.maximum(acc1[:, WCout:], 0.0)     # relu(bn(conv1(x)))

        # ---- stage 2: conv2(+BN) + ReLU + residual
        hp_ref[...] = jnp.zeros_like(hp_ref)
        hp_ref[_ROW_PAD:_ROW_PAD + H, :] = h
        acc2 = jnp.zeros((H, WCout), jnp.float32)
        for dy in range(3):
            acc2 = acc2 + jnp.dot(
                hp_ref[_ROW_PAD - 1 + dy:_ROW_PAD - 1 + dy + H, :],
                band2_ref[dy], preferred_element_type=jnp.float32)
        y = jnp.maximum(acc2 + t2_ref[0], 0.0) + res        # (H, W*Cout)

        # ---- stage 3: maxpool 3x3 / stride 2 / pad 1 (in VMEM / registers)
        for p in range(Ho):
            r0 = max(2 * p - 1, 0)
            rowmax = y[r0:r0 + 1, :]
            for r in range(r0 + 1, 2 * p + 2):
                rowmax = jnp.maximum(rowmax, y[r:r + 1, :])
            for q in range(Wo):
                c0 = max(2 * q - 1, 0)
                cmax = rowmax[:, c0 * Cout:(c0 + 1) * Cout]
                for c in range(c0 + 1, 2 * q + 2):
                    cmax = jnp.maximum(cmax, rowmax[:, c * Cout:(c + 1) * Cout])
                o_ref[0, p:p + 1, q, :] = cmax

    return kernel


# ---------------------------------------------------------------------------
# Wrapper glue
# ---------------------------------------------------------------------------
def _band_weights(w, W):
    """(3,3,Cin,Cout) HWIO 3x3 kernel -> (3, W*Cin, W*Cout) banded matrices.

    B[dy][p*Cin+c, q*Cout+o] = w[dy, p-q+1, c, o] when 0 <= p-q+1 <= 2 else 0,
    i.e. each matrix applies the three dx taps (with zero padding along W) of
    one dy tap as a single matmul over a channels-fastest row vector.
    """
    _, _, Cin, Cout = w.shape
    p = np.arange(W)[:, None]
    q = np.arange(W)[None, :]
    sel = np.stack([(p == q + kx - 1) for kx in range(3)]).astype(np.float32)
    B = jnp.einsum("xpq,yxco->ypcqo", jnp.asarray(sel), w.astype(jnp.float32))
    return B.reshape(3, W * Cin, W * Cout)


def feature_base_block(x2, p, H, W):
    """x2: (N, H, W*Cin) channels-fastest rows.  Returns (N, H//2, W//2, Cout)."""
    assert H % 2 == 0 and W % 2 == 0, "maxpool path requires even H, W"
    N = x2.shape[0]
    Cin, Cout = p["w_skip"].shape[2], p["w_skip"].shape[3]
    assert x2.shape == (N, H, W * Cin)
    Ho, Wo = H // 2, W // 2
    WCin, WCout = W * Cin, W * Cout

    # Fold the (inference-mode) BatchNorm into the conv weights / biases.
    # TODO(synk): BatchNorm uses inference-mode running stats (mean=0, var=1);
    # training-mode batch statistics would need an extra cross-(N,H,W) pass.
    s1 = p["g1"] / jnp.sqrt(1.0 + _BN_EPS)
    s2 = p["g2"] / jnp.sqrt(1.0 + _BN_EPS)
    t1 = s1 * p["b1"] + p["be1"]
    t2 = s2 * p["b2"] + p["be2"]

    band_skip = _band_weights(p["w_skip"], W)                       # (3,WCin,WCout)
    band_c1 = _band_weights(p["w1"] * s1[None, None, None, :], W)
    band01 = jnp.concatenate([band_skip, band_c1], axis=-1)         # (3,WCin,2*WCout)
    band2 = _band_weights(p["w2"] * s2[None, None, None, :], W)     # (3,WCout,WCout)

    bias01 = jnp.concatenate([jnp.tile(p["b_skip"], W),
                              jnp.tile(t1, W)]).reshape(1, 2 * WCout)
    bias2 = jnp.tile(t2, W).reshape(1, WCout)

    kernel = _make_block_kernel(H, W, Cin, Cout)
    return pl.pallas_call(
        kernel,
        out_shape=jax.ShapeDtypeStruct((N, Ho, Wo, Cout), jnp.float32),
        grid=(N,),
        in_specs=[
            pl.BlockSpec((1, H, WCin), lambda n: (n, 0, 0)),
            pl.BlockSpec((3, WCin, 2 * WCout), lambda n: (0, 0, 0)),
            pl.BlockSpec((1, 2 * WCout), lambda n: (0, 0)),
            pl.BlockSpec((3, WCout, WCout), lambda n: (0, 0, 0)),
            pl.BlockSpec((1, WCout), lambda n: (0, 0)),
        ],
        out_specs=pl.BlockSpec((1, Ho, Wo, Cout), lambda n: (n, 0, 0, 0)),
        scratch_shapes=[
            pltpu.VMEM((H + 2 * _ROW_PAD, WCin), jnp.float32),
            pltpu.VMEM((H + 2 * _ROW_PAD, WCout), jnp.float32),
        ],
        compiler_params=pltpu.CompilerParams(
            dimension_semantics=("parallel",)),
    )(x2, band01, bias01, band2, bias2)


@jax.jit
def pyramid_feature(x_nchw, params):
    x = jnp.transpose(x_nchw, (0, 2, 3, 1))               # NCHW -> NHWC
    N, H, W, C = x.shape
    x2 = x.reshape(N, H, W * C)                           # channels-fastest rows
    pyramid = []
    for p in params:
        cout = p["w_skip"].shape[3]
        out = feature_base_block(x2, p, H, W)             # (N, H//2, W//2, cout)
        pyramid.append(jnp.transpose(out, (0, 3, 1, 2)))  # back to NCHW
        H, W = H // 2, W // 2
        x2 = out.reshape(N, H, W * cout)
    return pyramid


# ---------------------------------------------------------------------------
# Parameters
# ---------------------------------------------------------------------------
def init_block_params(key, cin, cout):
    k = jax.random.split(key, 10)
    return {
        "w_skip": 0.1 * jax.random.normal(k[0], (3, 3, cin, cout), jnp.float32),
        "b_skip": 0.1 * jax.random.normal(k[1], (cout,), jnp.float32),
        "w1": 0.1 * jax.random.normal(k[2], (3, 3, cin, cout), jnp.float32),
        "b1": 0.1 * jax.random.normal(k[3], (cout,), jnp.float32),
        "g1": 1.0 + 0.1 * jax.random.normal(k[4], (cout,), jnp.float32),
        "be1": 0.1 * jax.random.normal(k[5], (cout,), jnp.float32),
        "w2": 0.1 * jax.random.normal(k[6], (3, 3, cout, cout), jnp.float32),
        "b2": 0.1 * jax.random.normal(k[7], (cout,), jnp.float32),
        "g2": 1.0 + 0.1 * jax.random.normal(k[8], (cout,), jnp.float32),
        "be2": 0.1 * jax.random.normal(k[9], (cout,), jnp.float32),
    }


# ---------------------------------------------------------------------------
# Pure-JAX/XLA reference (correctness check)
# ---------------------------------------------------------------------------
def _conv3x3_ref(x, w, b):
    y = lax.conv_general_dilated(
        x, w, (1, 1), ((1, 1), (1, 1)),
        dimension_numbers=("NHWC", "HWIO", "NHWC"),
        precision=lax.Precision.HIGHEST)
    return y + b


def _block_ref(x, p):
    scale = lambda g: g / jnp.sqrt(1.0 + _BN_EPS)
    residual = _conv3x3_ref(x, p["w_skip"], p["b_skip"])
    h = jnp.maximum(scale(p["g1"]) * _conv3x3_ref(x, p["w1"], p["b1"]) + p["be1"], 0.0)
    y = jnp.maximum(scale(p["g2"]) * _conv3x3_ref(h, p["w2"], p["b2"]) + p["be2"], 0.0)
    y = y + residual
    return lax.reduce_window(y, -jnp.inf, lax.max,
                             (1, 3, 3, 1), (1, 2, 2, 1),
                             ((0, 0), (1, 1), (1, 1), (0, 0)))


def pyramid_feature_ref(x_nchw, params):
    x = jnp.transpose(x_nchw, (0, 2, 3, 1))
    pyramid = []
    for p in params:
        x = _block_ref(x, p)
        pyramid.append(jnp.transpose(x, (0, 3, 1, 2)))
    return pyramid


# ---------------------------------------------------------------------------
if __name__ == "__main__":
    key = jax.random.PRNGKey(0)
    kx, kp = jax.random.split(key)

    # PyTorch-style NCHW input: batch=2, channels=3 (fixed by the module), 16x16
    x = jax.random.normal(kx, (2, 3, 16, 16), jnp.float32)

    chans = [(3, 8), (8, 16), (16, 32), (32, 64)]
    pkeys = jax.random.split(kp, len(chans))
    params = [init_block_params(k, ci, co) for k, (ci, co) in zip(pkeys, chans)]

    pyramid = pyramid_feature(x, params)
    pyramid = [jax.block_until_ready(p) for p in pyramid]

    expected_shapes = [(2, 8, 8, 8), (2, 16, 4, 4), (2, 32, 2, 2), (2, 64, 1, 1)]
    ref = pyramid_feature_ref(x, params)
    for out, r, es in zip(pyramid, ref, expected_shapes):
        assert out.shape == es, (out.shape, es)
        err = float(jnp.max(jnp.abs(out - r)))
        assert jnp.allclose(out, r, atol=2e-3, rtol=2e-3), err

    print("KERNEL_OK")
</pallas_src>

<mosaic_0001>
module attributes {stable_mosaic.version = 11 : i64} {
  func.func @kernel(%arg0: i32, %arg1: memref<1x16x48xf32, #tpu.memory_space<vmem>>, %arg2: memref<3x48x256xf32, #tpu.memory_space<vmem>>, %arg3: memref<1x256xf32, #tpu.memory_space<vmem>>, %arg4: memref<3x128x128xf32, #tpu.memory_space<vmem>>, %arg5: memref<1x128xf32, #tpu.memory_space<vmem>>, %arg6: memref<1x8x8x8xf32, #tpu.memory_space<vmem>>, %arg7: memref<32x48xf32, #tpu.memory_space<vmem>>, %arg8: memref<32x128xf32, #tpu.memory_space<vmem>>) attributes {dimension_semantics = [#tpu.dimension_semantics<parallel>], iteration_bounds = array<i64: 2>, scalar_prefetch = 0 : i64, scratch_operands = 2 : i64, tpu.core_type = #tpu.core_type<tc>, window_params = [{transform_indices = @transform_0, window_bounds = array<i64: 1, 16, 48>}, {pipeline_mode = #tpu.pipeline_mode<synchronous>, transform_indices = @transform_1, window_bounds = array<i64: 3, 48, 256>}, {pipeline_mode = #tpu.pipeline_mode<synchronous>, transform_indices = @transform_2, window_bounds = array<i64: 1, 256>}, {pipeline_mode = #tpu.pipeline_mode<synchronous>, transform_indices = @transform_3, window_bounds = array<i64: 3, 128, 128>}, {pipeline_mode = #tpu.pipeline_mode<synchronous>, transform_indices = @transform_4, window_bounds = array<i64: 1, 128>}, {transform_indices = @transform_5, window_bounds = array<i64: 1, 8, 8, 8>}]} {
    %cst = arith.constant 0.000000e+00 : f32
    %0 = vector.broadcast %cst : f32 to vector<32x48xf32>
    %c0 = arith.constant 0 : index
    %c0_0 = arith.constant 0 : index
    %1 = vector.load %arg7[%c0, %c0_0] : memref<32x48xf32, #tpu.memory_space<vmem>>, vector<32x48xf32>
    tpu.vector_store %arg7[%c0, %c0_0], %0 {strides = array<i32>} : memref<32x48xf32, #tpu.memory_space<vmem>>, vector<32x48xf32>,
    %c0_1 = arith.constant 0 : index
    %c0_2 = arith.constant 0 : index
    %c0_3 = arith.constant 0 : index
    %2 = vector.load %arg1[%c0_1, %c0_2, %c0_3] : memref<1x16x48xf32, #tpu.memory_space<vmem>>, vector<1x16x48xf32>
    %3 = vector.shape_cast %2 : vector<1x16x48xf32> to vector<16x48xf32>
    %c8 = arith.constant 8 : index
    %c0_4 = arith.constant 0 : index
    %4 = vector.load %arg7[%c8, %c0_4] : memref<32x48xf32, #tpu.memory_space<vmem>>, vector<16x48xf32>
    tpu.vector_store %arg7[%c8, %c0_4], %3 {strides = array<i32>} : memref<32x48xf32, #tpu.memory_space<vmem>>, vector<16x48xf32>,
    %cst_5 = arith.constant 0.000000e+00 : f32
    %5 = vector.broadcast %cst_5 : f32 to vector<16x256xf32>
    %c7 = arith.constant 7 : index
    %c0_6 = arith.constant 0 : index
    %6 = vector.load %arg7[%c7, %c0_6] : memref<32x48xf32, #tpu.memory_space<vmem>>, vector<16x48xf32>
    %c0_7 = arith.constant 0 : index
    %c0_8 = arith.constant 0 : index
    %c0_9 = arith.constant 0 : index
    %7 = vector.load %arg2[%c0_7, %c0_8, %c0_9] : memref<3x48x256xf32, #tpu.memory_space<vmem>>, vector<1x48x256xf32>
    %8 = vector.shape_cast %7 : vector<1x48x256xf32> to vector<48x256xf32>
    %cst_10 = arith.constant dense<0.000000e+00> : vector<16x256xf32>
    %9 = tpu.matmul %6, %8, %cst_10 {dimension_numbers = #tpu.dot_dimension_numbers<[1], [0], [0], [1], [0, 0, 1, 1], [], []>} : vector<16x48xf32>, vector<48x256xf32>, vector<16x256xf32> -> vector<16x256xf32>
    %10 = arith.addf %5, %9 : vector<16x256xf32>
    %c8_11 = arith.constant 8 : index
    %c0_12 = arith.constant 0 : index
    %11 = vector.load %arg7[%c8_11, %c0_12] : memref<32x48xf32, #tpu.memory_space<vmem>>, vector<16x48xf32>
    %c1 = arith.constant 1 : index
    %c0_13 = arith.constant 0 : index
    %c0_14 = arith.constant 0 : index
    %12 = vector.load %arg2[%c1, %c0_13, %c0_14] : memref<3x48x256xf32, #tpu.memory_space<vmem>>, vector<1x48x256xf32>
    %13 = vector.shape_cast %12 : vector<1x48x256xf32> to vector<48x256xf32>
    %cst_15 = arith.constant dense<0.000000e+00> : vector<16x256xf32>
    %14 = tpu.matmul %11, %13, %cst_15 {dimension_numbers = #tpu.dot_dimension_numbers<[1], [0], [0], [1], [0, 0, 1, 1], [], []>} : vector<16x48xf32>, vector<48x256xf32>, vector<16x256xf32> -> vector<16x256xf32>
    %15 = arith.addf %10, %14 : vector<16x256xf32>
    %c9 = arith.constant 9 : index
    %c0_16 = arith.constant 0 : index
    %16 = vector.load %arg7[%c9, %c0_16] : memref<32x48xf32, #tpu.memory_space<vmem>>, vector<16x48xf32>
    %c2 = arith.constant 2 : index
    %c0_17 = arith.constant 0 : index
    %c0_18 = arith.constant 0 : index
    %17 = vector.load %arg2[%c2, %c0_17, %c0_18] : memref<3x48x256xf32, #tpu.memory_space<vmem>>, vector<1x48x256xf32>
    %18 = vector.shape_cast %17 : vector<1x48x256xf32> to vector<48x256xf32>
    %cst_19 = arith.constant dense<0.000000e+00> : vector<16x256xf32>
    %19 = tpu.matmul %16, %18, %cst_19 {dimension_numbers = #tpu.dot_dimension_numbers<[1], [0], [0], [1], [0, 0, 1, 1], [], []>} : vector<16x48xf32>, vector<48x256xf32>, vector<16x256xf32> -> vector<16x256xf32>
    %20 = arith.addf %15, %19 : vector<16x256xf32>
    %c0_20 = arith.constant 0 : index
    %c0_21 = arith.constant 0 : index
    %21 = vector.load %arg3[%c0_20, %c0_21] : memref<1x256xf32, #tpu.memory_space<vmem>>, vector<1x256xf32>
    %22 = vector.shape_cast %21 : vector<1x256xf32> to vector<256xf32>
    %23 = vector.shape_cast %22 : vector<256xf32> to vector<1x256xf32>
    %24 = vector.broadcast %23 : vector<1x256xf32> to vector<16x256xf32>
    %25 = arith.addf %20, %24 : vector<16x256xf32>
    %26 = vector.extract_strided_slice %25 {offsets = [0, 0], sizes = [16, 128], strides = [1, 1]} : vector<16x256xf32> to vector<16x128xf32>
    %27 = vector.extract_strided_slice %25 {offsets = [0, 128], sizes = [16, 128], strides = [1, 1]} : vector<16x256xf32> to vector<16x128xf32>
    %cst_22 = arith.constant 0.000000e+00 : f32
    %28 = vector.broadcast %cst_22 : f32 to vector<16x128xf32>
    %29 = arith.maximumf %27, %28 : vector<16x128xf32>
    %cst_23 = arith.constant 0.000000e+00 : f32
    %30 = vector.broadcast %cst_23 : f32 to vector<32x128xf32>
    %c0_24 = arith.constant 0 : index
    %c0_25 = arith.constant 0 : index
    %31 = vector.load %arg8[%c0_24, %c0_25] : memref<32x128xf32, #tpu.memory_space<vmem>>, vector<32x128xf32>
    tpu.vector_store %arg8[%c0_24, %c0_25], %30 {strides = array<i32>} : memref<32x128xf32, #tpu.memory_space<vmem>>, vector<32x128xf32>,
    %c8_26 = arith.constant 8 : index
    %c0_27 = arith.constant 0 : index
    %32 = vector.load %arg8[%c8_26, %c0_27] : memref<32x128xf32, #tpu.memory_space<vmem>>, vector<16x128xf32>
    tpu.vector_store %arg8[%c8_26, %c0_27], %29 {strides = array<i32>} : memref<32x128xf32, #tpu.memory_space<vmem>>, vector<16x128xf32>,
    %cst_28 = arith.constant 0.000000e+00 : f32
    %33 = vector.broadcast %cst_28 : f32 to vector<16x128xf32>
    %c7_29 = arith.constant 7 : index
    %c0_30 = arith.constant 0 : index
    %34 = vector.load %arg8[%c7_29, %c0_30] : memref<32x128xf32, #tpu.memory_space<vmem>>, vector<16x128xf32>
    %c0_31 = arith.constant 0 : index
    %c0_32 = arith.constant 0 : index
    %c0_33 = arith.constant 0 : index
    %35 = vector.load %arg4[%c0_31, %c0_32, %c0_33] : memref<3x128x128xf32, #tpu.memory_space<vmem>>, vector<1x128x128xf32>
    %36 = vector.shape_cast %35 : vector<1x128x128xf32> to vector<128x128xf32>
    %cst_34 = arith.constant dense<0.000000e+00> : vector<16x128xf32>
    %37 = tpu.matmul %34, %36, %cst_34 {dimension_numbers = #tpu.dot_dimension_numbers<[1], [0], [0], [1], [0, 0, 1, 1], [], []>} : vector<16x128xf32>, vector<128x128xf32>, vector<16x128xf32> -> vector<16x128xf32>
    %38 = arith.addf %33, %37 : vector<16x128xf32>
    %c8_35 = arith.constant 8 : index
    %c0_36 = arith.constant 0 : index
    %39 = vector.load %arg8[%c8_35, %c0_36] : memref<32x128xf32, #tpu.memory_space<vmem>>, vector<16x128xf32>
    %c1_37 = arith.constant 1 : index
    %c0_38 = arith.constant 0 : index
    %c0_39 = arith.constant 0 : index
    %40 = vector.load %arg4[%c1_37, %c0_38, %c0_39] : memref<3x128x128xf32, #tpu.memory_space<vmem>>, vector<1x128x128xf32>
    %41 = vector.shape_cast %40 : vector<1x128x128xf32> to vector<128x128xf32>
    %cst_40 = arith.constant dense<0.000000e+00> : vector<16x128xf32>
    %42 = tpu.matmul %39, %41, %cst_40 {dimension_numbers = #tpu.dot_dimension_numbers<[1], [0], [0], [1], [0, 0, 1, 1], [], []>} : vector<16x128xf32>, vector<128x128xf32>, vector<16x128xf32> -> vector<16x128xf32>
    %43 = arith.addf %38, %42 : vector<16x128xf32>
    %c9_41 = arith.constant 9 : index
    %c0_42 = arith.constant 0 : index
    %44 = vector.load %arg8[%c9_41, %c0_42] : memref<32x128xf32, #tpu.memory_space<vmem>>, vector<16x128xf32>
    %c2_43 = arith.constant 2 : index
    %c0_44 = arith.constant 0 : index
    %c0_45 = arith.constant 0 : index
    %45 = vector.load %arg4[%c2_43, %c0_44, %c0_45] : memref<3x128x128xf32, #tpu.memory_space<vmem>>, vector<1x128x128xf32>
    %46 = vector.shape_cast %45 : vector<1x128x128xf32> to vector<128x128xf32>
    %cst_46 = arith.constant dense<0.000000e+00> : vector<16x128xf32>
    %47 = tpu.matmul %44, %46, %cst_46 {dimension_numbers = #tpu.dot_dimension_numbers<[1], [0], [0], [1], [0, 0, 1, 1], [], []>} : vector<16x128xf32>, vector<128x128xf32>, vector<16x128xf32> -> vector<16x128xf32>
    %48 = arith.addf %43, %47 : vector<16x128xf32>
    %c0_47 = arith.constant 0 : index
    %c0_48 = arith.constant 0 : index
    %49 = vector.load %arg5[%c0_47, %c0_48] : memref<1x128xf32, #tpu.memory_space<vmem>>, vector<1x128xf32>
    %50 = vector.shape_cast %49 : vector<1x128xf32> to vector<128xf32>
    %51 = vector.shape_cast %50 : vector<128xf32> to vector<1x128xf32>
    %52 = vector.broadcast %51 : vector<1x128xf32> to vector<16x128xf32>
    %53 = arith.addf %48, %52 : vector<16x128xf32>
    %cst_49 = arith.constant 0.000000e+00 : f32
    %54 = vector.broadcast %cst_49 : f32 to vector<16x128xf32>
    %55 = arith.maximumf %53, %54 : vector<16x128xf32>
    %56 = arith.addf %55, %26 : vector<16x128xf32>
    %57 = vector.extract_strided_slice %56 {offsets = [0, 0], sizes = [1, 128], strides = [1, 1]} : vector<16x128xf32> to vector<1x128xf32>
    %58 = vector.extract_strided_slice %56 {offsets = [1, 0], sizes = [1, 128], strides = [1, 1]} : vector<16x128xf32> to vector<1x128xf32>
    %59 = arith.maximumf %57, %58 : vector<1x128xf32>
    %60 = vector.extract_strided_slice %59 {offsets = [0, 0], sizes = [1, 8], strides = [1, 1]} : vector<1x128xf32> to vector<1x8xf32>
    %61 = vector.extract_strided_slice %59 {offsets = [0, 8], sizes = [1, 8], strides = [1, 1]} : vector<1x128xf32> to vector<1x8xf32>
    %62 = arith.maximumf %60, %61 : vector<1x8xf32>
    %c0_50 = arith.constant 0 : index
    %c0_51 = arith.constant 0 : index
    %c0_52 = arith.constant 0 : index
    %c0_53 = arith.constant 0 : index
    %63 = vector.load %arg6[%c0_50, %c0_51, %c0_52, %c0_53] : memref<1x8x8x8xf32, #tpu.memory_space<vmem>>, vector<1x1x1x8xf32>
    %64 = vector.shape_cast %63 : vector<1x1x1x8xf32> to vector<1x8xf32>
    %65 = vector.shape_cast %62 : vector<1x8xf32> to vector<1x1x1x8xf32>
    tpu.vector_store %arg6[%c0_50, %c0_51, %c0_52, %c0_53], %65 {strides = array<i32>} : memref<1x8x8x8xf32, #tpu.memory_space<vmem>>, vector<1x1x1x8xf32>,
    %66 = vector.extract_strided_slice %59 {offsets = [0, 8], sizes = [1, 8], strides = [1, 1]} : vector<1x128xf32> to vector<1x8xf32>
    %67 = vector.extract_strided_slice %59 {offsets = [0, 16], sizes = [1, 8], strides = [1, 1]} : vector<1x128xf32> to vector<1x8xf32>
    %68 = arith.maximumf %66, %67 : vector<1x8xf32>
    %69 = vector.extract_strided_slice %59 {offsets = [0, 24], sizes = [1, 8], strides = [1, 1]} : vector<1x128xf32> to vector<1x8xf32>
    %70 = arith.maximumf %68, %69 : vector<1x8xf32>
    %c0_54 = arith.constant 0 : index
    %c0_55 = arith.constant 0 : index
    %c1_56 = arith.constant 1 : index
    %c0_57 = arith.constant 0 : index
    %71 = vector.load %arg6[%c0_54, %c0_55, %c1_56, %c0_57] : memref<1x8x8x8xf32, #tpu.memory_space<vmem>>, vector<1x1x1x8xf32>
    %72 = vector.shape_cast %71 : vector<1x1x1x8xf32> to vector<1x8xf32>
    %73 = vector.shape_cast %70 : vector<1x8xf32> to vector<1x1x1x8xf32>
    tpu.vector_store %arg6[%c0_54, %c0_55, %c1_56, %c0_57], %73 {strides = array<i32>} : memref<1x8x8x8xf32, #tpu.memory_space<vmem>>, vector<1x1x1x8xf32>,
    %74 = vector.extract_strided_slice %59 {offsets = [0, 24], sizes = [1, 8], strides = [1, 1]} : vector<1x128xf32> to vector<1x8xf32>
    %75 = vector.extract_strided_slice %59 {offsets = [0, 32], sizes = [1, 8], strides = [1, 1]} : vector<1x128xf32> to vector<1x8xf32>
    %76 = arith.maximumf %74, %75 : vector<1x8xf32>
    %77 = vector.extract_strided_slice %59 {offsets = [0, 40], sizes = [1, 8], strides = [1, 1]} : vector<1x128xf32> to vector<1x8xf32>
    %78 = arith.maximumf %76, %77 : vector<1x8xf32>
    %c0_58 = arith.constant 0 : index
    %c0_59 = arith.constant 0 : index
    %c2_60 = arith.constant 2 : index
    %c0_61 = arith.constant 0 : index
    %79 = vector.load %arg6[%c0_58, %c0_59, %c2_60, %c0_61] : memref<1x8x8x8xf32, #tpu.memory_space<vmem>>, vector<1x1x1x8xf32>
    %80 = vector.shape_cast %79 : vector<1x1x1x8xf32> to vector<1x8xf32>
    %81 = vector.shape_cast %78 : vector<1x8xf32> to vector<1x1x1x8xf32>
    tpu.vector_store %arg6[%c0_58, %c0_59, %c2_60, %c0_61], %81 {strides = array<i32>} : memref<1x8x8x8xf32, #tpu.memory_space<vmem>>, vector<1x1x1x8xf32>,
    %82 = vector.extract_strided_slice %59 {offsets = [0, 40], sizes = [1, 8], strides = [1, 1]} : vector<1x128xf32> to vector<1x8xf32>
    %83 = vector.extract_strided_slice %59 {offsets = [0, 48], sizes = [1, 8], strides = [1, 1]} : vector<1x128xf32> to vector<1x8xf32>
    %84 = arith.maximumf %82, %83 : vector<1x8xf32>
    %85 = vector.extract_strided_slice %59 {offsets = [0, 56], sizes = [1, 8], strides = [1, 1]} : vector<1x128xf32> to vector<1x8xf32>
    %86 = arith.maximumf %84, %85 : vector<1x8xf32>
    %c0_62 = arith.constant 0 : index
    %c0_63 = arith.constant 0 : index
    %c3 = arith.constant 3 : index
    %c0_64 = arith.constant 0 : index
    %87 = vector.load %arg6[%c0_62, %c0_63, %c3, %c0_64] : memref<1x8x8x8xf32, #tpu.memory_space<vmem>>, vector<1x1x1x8xf32>
    %88 = vector.shape_cast %87 : vector<1x1x1x8xf32> to vector<1x8xf32>
    %89 = vector.shape_cast %86 : vector<1x8xf32> to vector<1x1x1x8xf32>
    tpu.vector_store %arg6[%c0_62, %c0_63, %c3, %c0_64], %89 {strides = array<i32>} : memref<1x8x8x8xf32, #tpu.memory_space<vmem>>, vector<1x1x1x8xf32>,
    %90 = vector.extract_strided_slice %59 {offsets = [0, 56], sizes = [1, 8], strides = [1, 1]} : vector<1x128xf32> to vector<1x8xf32>
    %91 = vector.extract_strided_slice %59 {offsets = [0, 64], sizes = [1, 8], strides = [1, 1]} : vector<1x128xf32> to vector<1x8xf32>
    %92 = arith.maximumf %90, %91 : vector<1x8xf32>
    %93 = vector.extract_strided_slice %59 {offsets = [0, 72], sizes = [1, 8], strides = [1, 1]} : vector<1x128xf32> to vector<1x8xf32>
    %94 = arith.maximumf %92, %93 : vector<1x8xf32>
    %c0_65 = arith.constant 0 : index
    %c0_66 = arith.constant 0 : index
    %c4 = arith.constant 4 : index
    %c0_67 = arith.constant 0 : index
    %95 = vector.load %arg6[%c0_65, %c0_66, %c4, %c0_67] : memref<1x8x8x8xf32, #tpu.memory_space<vmem>>, vector<1x1x1x8xf32>
    %96 = vector.shape_cast %95 : vector<1x1x1x8xf32> to vector<1x8xf32>
    %97 = vector.shape_cast %94 : vector<1x8xf32> to vector<1x1x1x8xf32>
    tpu.vector_store %arg6[%c0_65, %c0_66, %c4, %c0_67], %97 {strides = array<i32>} : memref<1x8x8x8xf32, #tpu.memory_space<vmem>>, vector<1x1x1x8xf32>,
    %98 = vector.extract_strided_slice %59 {offsets = [0, 72], sizes = [1, 8], strides = [1, 1]} : vector<1x128xf32> to vector<1x8xf32>
    %99 = vector.extract_strided_slice %59 {offsets = [0, 80], sizes = [1, 8], strides = [1, 1]} : vector<1x128xf32> to vector<1x8xf32>
    %100 = arith.maximumf %98, %99 : vector<1x8xf32>
    %101 = vector.extract_strided_slice %59 {offsets = [0, 88], sizes = [1, 8], strides = [1, 1]} : vector<1x128xf32> to vector<1x8xf32>
    %102 = arith.maximumf %100, %101 : vector<1x8xf32>
    %c0_68 = arith.constant 0 : index
    %c0_69 = arith.constant 0 : index
    %c5 = arith.constant 5 : index
    %c0_70 = arith.constant 0 : index
    %103 = vector.load %arg6[%c0_68, %c0_69, %c5, %c0_70] : memref<1x8x8x8xf32, #tpu.memory_space<vmem>>, vector<1x1x1x8xf32>
    %104 = vector.shape_cast %103 : vector<1x1x1x8xf32> to vector<1x8xf32>
    %105 = vector.shape_cast %102 : vector<1x8xf32> to vector<1x1x1x8xf32>
    tpu.vector_store %arg6[%c0_68, %c0_69, %c5, %c0_70], %105 {strides = array<i32>} : memref<1x8x8x8xf32, #tpu.memory_space<vmem>>, vector<1x1x1x8xf32>,
    %106 = vector.extract_strided_slice %59 {offsets = [0, 88], sizes = [1, 8], strides = [1, 1]} : vector<1x128xf32> to vector<1x8xf32>
    %107 = vector.extract_strided_slice %59 {offsets = [0, 96], sizes = [1, 8], strides = [1, 1]} : vector<1x128xf32> to vector<1x8xf32>
    %108 = arith.maximumf %106, %107 : vector<1x8xf32>
    %109 = vector.extract_strided_slice %59 {offsets = [0, 104], sizes = [1, 8], strides = [1, 1]} : vector<1x128xf32> to vector<1x8xf32>
    %110 = arith.maximumf %108, %109 : vector<1x8xf32>
    %c0_71 = arith.constant 0 : index
    %c0_72 = arith.constant 0 : index
    %c6 = arith.constant 6 : index
    %c0_73 = arith.constant 0 : index
    %111 = vector.load %arg6[%c0_71, %c0_72, %c6, %c0_73] : memref<1x8x8x8xf32, #tpu.memory_space<vmem>>, vector<1x1x1x8xf32>
    %112 = vector.shape_cast %111 : vector<1x1x1x8xf32> to vector<1x8xf32>
    %113 = vector.shape_cast %110 : vector<1x8xf32> to vector<1x1x1x8xf32>
    tpu.vector_store %arg6[%c0_71, %c0_72, %c6, %c0_73], %113 {strides = array<i32>} : memref<1x8x8x8xf32, #tpu.memory_space<vmem>>, vector<1x1x1x8xf32>,
    %114 = vector.extract_strided_slice %59 {offsets = [0, 104], sizes = [1, 8], strides = [1, 1]} : vector<1x128xf32> to vector<1x8xf32>
    %115 = vector.extract_strided_slice %59 {offsets = [0, 112], sizes = [1, 8], strides = [1, 1]} : vector<1x128xf32> to vector<1x8xf32>
    %116 = arith.maximumf %114, %115 : vector<1x8xf32>
    %117 = vector.extract_strided_slice %59 {offsets = [0, 120], sizes = [1, 8], strides = [1, 1]} : vector<1x128xf32> to vector<1x8xf32>
    %118 = arith.maximumf %116, %117 : vector<1x8xf32>
    %c0_74 = arith.constant 0 : index
    %c0_75 = arith.constant 0 : index
    %c7_76 = arith.constant 7 : index
    %c0_77 = arith.constant 0 : index
    %119 = vector.load %arg6[%c0_74, %c0_75, %c7_76, %c0_77] : memref<1x8x8x8xf32, #tpu.memory_space<vmem>>, vector<1x1x1x8xf32>
    %120 = vector.shape_cast %119 : vector<1x1x1x8xf32> to vector<1x8xf32>
    %121 = vector.shape_cast %118 : vector<1x8xf32> to vector<1x1x1x8xf32>
    tpu.vector_store %arg6[%c0_74, %c0_75, %c7_76, %c0_77], %121 {strides = array<i32>} : memref<1x8x8x8xf32, #tpu.memory_space<vmem>>, vector<1x1x1x8xf32>,
    %122 = vector.extract_strided_slice %56 {offsets = [1, 0], sizes = [1, 128], strides = [1, 1]} : vector<16x128xf32> to vector<1x128xf32>
    %123 = vector.extract_strided_slice %56 {offsets = [2, 0], sizes = [1, 128], strides = [1, 1]} : vector<16x128xf32> to vector<1x128xf32>
    %124 = arith.maximumf %122, %123 : vector<1x128xf32>
    %125 = vector.extract_strided_slice %56 {offsets = [3, 0], sizes = [1, 128], strides = [1, 1]} : vector<16x128xf32> to vector<1x128xf32>
    %126 = arith.maximumf %124, %125 : vector<1x128xf32>
    %127 = vector.extract_strided_slice %126 {offsets = [0, 0], sizes = [1, 8], strides = [1, 1]} : vector<1x128xf32> to vector<1x8xf32>
    %128 = vector.extract_strided_slice %126 {offsets = [0, 8], sizes = [1, 8], strides = [1, 1]} : vector<1x128xf32> to vector<1x8xf32>
    %129 = arith.maximumf %127, %128 : vector<1x8xf32>
    %c0_78 = arith.constant 0 : index
    %c1_79 = arith.constant 1 : index
    %c0_80 = arith.constant 0 : index
    %c0_81 = arith.constant 0 : index
    %130 = vector.load %arg6[%c0_78, %c1_79, %c0_80, %c0_81] : memref<1x8x8x8xf32, #tpu.memory_space<vmem>>, vector<1x1x1x8xf32>
    %131 = vector.shape_cast %130 : vector<1x1x1x8xf32> to vector<1x8xf32>
    %132 = vector.shape_cast %129 : vector<1x8xf32> to vector<1x1x1x8xf32>
    tpu.vector_store %arg6[%c0_78, %c1_79, %c0_80, %c0_81], %132 {strides = array<i32>} : memref<1x8x8x8xf32, #tpu.memory_space<vmem>>, vector<1x1x1x8xf32>,
    %133 = vector.extract_strided_slice %126 {offsets = [0, 8], sizes = [1, 8], strides = [1, 1]} : vector<1x128xf32> to vector<1x8xf32>
    %134 = vector.extract_strided_slice %126 {offsets = [0, 16], sizes = [1, 8], strides = [1, 1]} : vector<1x128xf32> to vector<1x8xf32>
    %135 = arith.maximumf %133, %134 : vector<1x8xf32>
    %136 = vector.extract_strided_slice %126 {offsets = [0, 24], sizes = [1, 8], strides = [1, 1]} : vector<1x128xf32> to vector<1x8xf32>
    %137 = arith.maximumf %135, %136 : vector<1x8xf32>
    %c0_82 = arith.constant 0 : index
    %c1_83 = arith.constant 1 : index
    %c1_84 = arith.constant 1 : index
    %c0_85 = arith.constant 0 : index
    %138 = vector.load %arg6[%c0_82, %c1_83, %c1_84, %c0_85] : memref<1x8x8x8xf32, #tpu.memory_space<vmem>>, vector<1x1x1x8xf32>
    %139 = vector.shape_cast %138 : vector<1x1x1x8xf32> to vector<1x8xf32>
    %140 = vector.shape_cast %137 : vector<1x8xf32> to vector<1x1x1x8xf32>
    tpu.vector_store %arg6[%c0_82, %c1_83, %c1_84, %c0_85], %140 {strides = array<i32>} : memref<1x8x8x8xf32, #tpu.memory_space<vmem>>, vector<1x1x1x8xf32>,
    %141 = vector.extract_strided_slice %126 {offsets = [0, 24], sizes = [1, 8], strides = [1, 1]} : vector<1x128xf32> to vector<1x8xf32>
    %142 = vector.extract_strided_slice %126 {offsets = [0, 32], sizes = [1, 8], strides = [1, 1]} : vector<1x128xf32> to vector<1x8xf32>
    %143 = arith.maximumf %141, %142 : vector<1x8xf32>
    %144 = vector.extract_strided_slice %126 {offsets = [0, 40], sizes = [1, 8], strides = [1, 1]} : vector<1x128xf32> to vector<1x8xf32>
    %145 = arith.maximumf %143, %144 : vector<1x8xf32>
    %c0_86 = arith.constant 0 : index
    %c1_87 = arith.constant 1 : index
    %c2_88 = arith.constant 2 : index
    %c0_89 = arith.constant 0 : index
    %146 = vector.load %arg6[%c0_86, %c1_87, %c2_88, %c0_89] : memref<1x8x8x8xf32, #tpu.memory_space<vmem>>, vector<1x1x1x8xf32>
    %147 = vector.shape_cast %146 : vector<1x1x1x8xf32> to vector<1x8xf32>
    %148 = vector.shape_cast %145 : vector<1x8xf32> to vector<1x1x1x8xf32>
    tpu.vector_store %arg6[%c0_86, %c1_87, %c2_88, %c0_89], %148 {strides = array<i32>} : memref<1x8x8x8xf32, #tpu.memory_space<vmem>>, vector<1x1x1x8xf32>,
    %149 = vector.extract_strided_slice %126 {offsets = [0, 40], sizes = [1, 8], strides = [1, 1]} : vector<1x128xf32> to vector<1x8xf32>
    %150 = vector.extract_strided_slice %126 {offsets = [0, 48], sizes = [1, 8], strides = [1, 1]} : vector<1x128xf32> to vector<1x8xf32>
    %151 = arith.maximumf %149, %150 : vector<1x8xf32>
    %152 = vector.extract_strided_slice %126 {offsets = [0, 56], sizes = [1, 8], strides = [1, 1]} : vector<1x128xf32> to vector<1x8xf32>
    %153 = arith.maximumf %151, %152 : vector<1x8xf32>
    %c0_90 = arith.constant 0 : index
    %c1_91 = arith.constant 1 : index
    %c3_92 = arith.constant 3 : index
    %c0_93 = arith.constant 0 : index
    %154 = vector.load %arg6[%c0_90, %c1_91, %c3_92, %c0_93] : memref<1x8x8x8xf32, #tpu.memory_space<vmem>>, vector<1x1x1x8xf32>
    %155 = vector.shape_cast %154 : vector<1x1x1x8xf32> to vector<1x8xf32>
    %156 = vector.shape_cast %153 : vector<1x8xf32> to vector<1x1x1x8xf32>
    tpu.vector_store %arg6[%c0_90, %c1_91, %c3_92, %c0_93], %156 {strides = array<i32>} : memref<1x8x8x8xf32, #tpu.memory_space<vmem>>, vector<1x1x1x8xf32>,
    %157 = vector.extract_strided_slice %126 {offsets = [0, 56], sizes = [1, 8], strides = [1, 1]} : vector<1x128xf32> to vector<1x8xf32>
    %158 = vector.extract_strided_slice %126 {offsets = [0, 64], sizes = [1, 8], strides = [1, 1]} : vector<1x128xf32> to vector<1x8xf32>
    %159 = arith.maximumf %157, %158 : vector<1x8xf32>
    %160 = vector.extract_strided_slice %126 {offsets = [0, 72], sizes = [1, 8], strides = [1, 1]} : vector<1x128xf32> to vector<1x8xf32>
    %161 = arith.maximumf %159, %160 : vector<1x8xf32>
    %c0_94 = arith.constant 0 : index
    %c1_95 = arith.constant 1 : index
    %c4_96 = arith.constant 4 : index
    %c0_97 = arith.constant 0 : index
    %162 = vector.load %arg6[%c0_94, %c1_95, %c4_96, %c0_97] : memref<1x8x8x8xf32, #tpu.memory_space<vmem>>, vector<1x1x1x8xf32>
    %163 = vector.shape_cast %162 : vector<1x1x1x8xf32> to vector<1x8xf32>
    %164 = vector.shape_cast %161 : vector<1x8xf32> to vector<1x1x1x8xf32>
    tpu.vector_store %arg6[%c0_94, %c1_95, %c4_96, %c0_97], %164 {strides = array<i32>} : memref<1x8x8x8xf32, #tpu.memory_space<vmem>>, vector<1x1x1x8xf32>,
    %165 = vector.extract_strided_slice %126 {offsets = [0, 72], sizes = [1, 8], strides = [1, 1]} : vector<1x128xf32> to vector<1x8xf32>
    %166 = vector.extract_strided_slice %126 {offsets = [0, 80], sizes = [1, 8], strides = [1, 1]} : vector<1x128xf32> to vector<1x8xf32>
    %167 = arith.maximumf %165, %166 : vector<1x8xf32>
    %168 = vector.extract_strided_slice %126 {offsets = [0, 88], sizes = [1, 8], strides = [1, 1]} : vector<1x128xf32> to vector<1x8xf32>
    %169 = arith.maximumf %167, %168 : vector<1x8xf32>
    %c0_98 = arith.constant 0 : index
    %c1_99 = arith.constant 1 : index
    %c5_100 = arith.constant 5 : index
    %c0_101 = arith.constant 0 : index
    %170 = vector.load %arg6[%c0_98, %c1_99, %c5_100, %c0_101] : memref<1x8x8x8xf32, #tpu.memory_space<vmem>>, vector<1x1x1x8xf32>
    %171 = vector.shape_cast %170 : vector<1x1x1x8xf32> to vector<1x8xf32>
    %172 = vector.shape_cast %169 : vector<1x8xf32> to vector<1x1x1x8xf32>
    tpu.vector_store %arg6[%c0_98, %c1_99, %c5_100, %c0_101], %172 {strides = array<i32>} : memref<1x8x8x8xf32, #tpu.memory_space<vmem>>, vector<1x1x1x8xf32>,
    %173 = vector.extract_strided_slice %126 {offsets = [0, 88], sizes = [1, 8], strides = [1, 1]} : vector<1x128xf32> to vector<1x8xf32>
    %174 = vector.extract_strided_slice %126 {offsets = [0, 96], sizes = [1, 8], strides = [1, 1]} : vector<1x128xf32> to vector<1x8xf32>
    %175 = arith.maximumf %173, %174 : vector<1x8xf32>
    %176 = vector.extract_strided_slice %126 {offsets = [0, 104], sizes = [1, 8], strides = [1, 1]} : vector<1x128xf32> to vector<1x8xf32>
    %177 = arith.maximumf %175, %176 : vector<1x8xf32>
    %c0_102 = arith.constant 0 : index
    %c1_103 = arith.constant 1 : index
    %c6_104 = arith.constant 6 : index
    %c0_105 = arith.constant 0 : index
    %178 = vector.load %arg6[%c0_102, %c1_103, %c6_104, %c0_105] : memref<1x8x8x8xf32, #tpu.memory_space<vmem>>, vector<1x1x1x8xf32>
    %179 = vector.shape_cast %178 : vector<1x1x1x8xf32> to vector<1x8xf32>
    %180 = vector.shape_cast %177 : vector<1x8xf32> to vector<1x1x1x8xf32>
    tpu.vector_store %arg6[%c0_102, %c1_103, %c6_104, %c0_105], %180 {strides = array<i32>} : memref<1x8x8x8xf32, #tpu.memory_space<vmem>>, vector<1x1x1x8xf32>,
    %181 = vector.extract_strided_slice %126 {offsets = [0, 104], sizes = [1, 8], strides = [1, 1]} : vector<1x128xf32> to vector<1x8xf32>
    %182 = vector.extract_strided_slice %126 {offsets = [0, 112], sizes = [1, 8], strides = [1, 1]} : vector<1x128xf32> to vector<1x8xf32>
    %183 = arith.maximumf %181, %182 : vector<1x8xf32>
    %184 = vector.extract_strided_slice %126 {offsets = [0, 120], sizes = [1, 8], strides = [1, 1]} : vector<1x128xf32> to vector<1x8xf32>
    %185 = arith.maximumf %183, %184 : vector<1x8xf32>
    %c0_106 = arith.constant 0 : index
    %c1_107 = arith.constant 1 : index
    %c7_108 = arith.constant 7 : index
    %c0_109 = arith.constant 0 : index
    %186 = vector.load %arg6[%c0_106, %c1_107, %c7_108, %c0_109] : memref<1x8x8x8xf32, #tpu.memory_space<vmem>>, vector<1x1x1x8xf32>
    %187 = vector.shape_cast %186 : vector<1x1x1x8xf32> to vector<1x8xf32>
    %188 = vector.shape_cast %185 : vector<1x8xf32> to vector<1x1x1x8xf32>
    tpu.vector_store %arg6[%c0_106, %c1_107, %c7_108, %c0_109], %188 {strides = array<i32>} : memref<1x8x8x8xf32, #tpu.memory_space<vmem>>, vector<1x1x1x8xf32>,
    %189 = vector.extract_strided_slice %56 {offsets = [3, 0], sizes = [1, 128], strides = [1, 1]} : vector<16x128xf32> to vector<1x128xf32>
    %190 = vector.extract_strided_slice %56 {offsets = [4, 0], sizes = [1, 128], strides = [1, 1]} : vector<16x128xf32> to vector<1x128xf32>
    %191 = arith.maximumf %189, %190 : vector<1x128xf32>
    %192 = vector.extract_strided_slice %56 {offsets = [5, 0], sizes = [1, 128], strides = [1, 1]} : vector<16x128xf32> to vector<1x128xf32>
    %193 = arith.maximumf %191, %192 : vector<1x128xf32>
    %194 = vector.extract_strided_slice %193 {offsets = [0, 0], sizes = [1, 8], strides = [1, 1]} : vector<1x128xf32> to vector<1x8xf32>
    %195 = vector.extract_strided_slice %193 {offsets = [0, 8], sizes = [1, 8], strides = [1, 1]} : vector<1x128xf32> to vector<1x8xf32>
    %196 = arith.maximumf %194, %195 : vector<1x8xf32>
    %c0_110 = arith.constant 0 : index
    %c2_111 = arith.constant 2 : index
    %c0_112 = arith.constant 0 : index
    %c0_113 = arith.constant 0 : index
    %197 = vector.load %arg6[%c0_110, %c2_111, %c0_112, %c0_113] : memref<1x8x8x8xf32, #tpu.memory_space<vmem>>, vector<1x1x1x8xf32>
    %198 = vector.shape_cast %197 : vector<1x1x1x8xf32> to vector<1x8xf32>
    %199 = vector.shape_cast %196 : vector<1x8xf32> to vector<1x1x1x8xf32>
    tpu.vector_store %arg6[%c0_110, %c2_111, %c0_112, %c0_113], %199 {strides = array<i32>} : memref<1x8x8x8xf32, #tpu.memory_space<vmem>>, vector<1x1x1x8xf32>,
    %200 = vector.extract_strided_slice %193 {offsets = [0, 8], sizes = [1, 8], strides = [1, 1]} : vector<1x128xf32> to vector<1x8xf32>
    %201 = vector.extract_strided_slice %193 {offsets = [0, 16], sizes = [1, 8], strides = [1, 1]} : vector<1x128xf32> to vector<1x8xf32>
    %202 = arith.maximumf %200, %201 : vector<1x8xf32>
    %203 = vector.extract_strided_slice %193 {offsets = [0, 24], sizes = [1, 8], strides = [1, 1]} : vector<1x128xf32> to vector<1x8xf32>
    %204 = arith.maximumf %202, %203 : vector<1x8xf32>
    %c0_114 = arith.constant 0 : index
    %c2_115 = arith.constant 2 : index
    %c1_116 = arith.constant 1 : index
    %c0_117 = arith.constant 0 : index
    %205 = vector.load %arg6[%c0_114, %c2_115, %c1_116, %c0_117] : memref<1x8x8x8xf32, #tpu.memory_space<vmem>>, vector<1x1x1x8xf32>
    %206 = vector.shape_cast %205 : vector<1x1x1x8xf32> to vector<1x8xf32>
    %207 = vector.shape_cast %204 : vector<1x8xf32> to vector<1x1x1x8xf32>
    tpu.vector_store %arg6[%c0_114, %c2_115, %c1_116, %c0_117], %207 {strides = array<i32>} : memref<1x8x8x8xf32, #tpu.memory_space<vmem>>, vector<1x1x1x8xf32>,
    %208 = vector.extract_strided_slice %193 {offsets = [0, 24], sizes = [1, 8], strides = [1, 1]} : vector<1x128xf32> to vector<1x8xf32>
    %209 = vector.extract_strided_slice %193 {offsets = [0, 32], sizes = [1, 8], strides = [1, 1]} : vector<1x128xf32> to vector<1x8xf32>
    %210 = arith.maximumf %208, %209 : vector<1x8xf32>
    %211 = vector.extract_strided_slice %193 {offsets = [0, 40], sizes = [1, 8], strides = [1, 1]} : vector<1x128xf32> to vector<1x8xf32>
    %212 = arith.maximumf %210, %211 : vector<1x8xf32>
    %c0_118 = arith.constant 0 : index
    %c2_119 = arith.constant 2 : index
    %c2_120 = arith.constant 2 : index
    %c0_121 = arith.constant 0 : index
    %213 = vector.load %arg6[%c0_118, %c2_119, %c2_120, %c0_121] : memref<1x8x8x8xf32, #tpu.memory_space<vmem>>, vector<1x1x1x8xf32>
    %214 = vector.shape_cast %213 : vector<1x1x1x8xf32> to vector<1x8xf32>
    %215 = vector.shape_cast %212 : vector<1x8xf32> to vector<1x1x1x8xf32>
    tpu.vector_store %arg6[%c0_118, %c2_119, %c2_120, %c0_121], %215 {strides = array<i32>} : memref<1x8x8x8xf32, #tpu.memory_space<vmem>>, vector<1x1x1x8xf32>,
    %216 = vector.extract_strided_slice %193 {offsets = [0, 40], sizes = [1, 8], strides = [1, 1]} : vector<1x128xf32> to vector<1x8xf32>
    %217 = vector.extract_strided_slice %193 {offsets = [0, 48], sizes = [1, 8], strides = [1, 1]} : vector<1x128xf32> to vector<1x8xf32>
    %218 = arith.maximumf %216, %217 : vector<1x8xf32>
    %219 = vector.extract_strided_slice %193 {offsets = [0, 56], sizes = [1, 8], strides = [1, 1]} : vector<1x128xf32> to vector<1x8xf32>
    %220 = arith.maximumf %218, %219 : vector<1x8xf32>
    %c0_122 = arith.constant 0 : index
    %c2_123 = arith.constant 2 : index
    %c3_124 = arith.constant 3 : index
    %c0_125 = arith.constant 0 : index
    %221 = vector.load %arg6[%c0_122, %c2_123, %c3_124, %c0_125] : memref<1x8x8x8xf32, #tpu.memory_space<vmem>>, vector<1x1x1x8xf32>
    %222 = vector.shape_cast %221 : vector<1x1x1x8xf32> to vector<1x8xf32>
    %223 = vector.shape_cast %220 : vector<1x8xf32> to vector<1x1x1x8xf32>
    tpu.vector_store %arg6[%c0_122, %c2_123, %c3_124, %c0_125], %223 {strides = array<i32>} : memref<1x8x8x8xf32, #tpu.memory_space<vmem>>, vector<1x1x1x8xf32>,
    %224 = vector.extract_strided_slice %193 {offsets = [0, 56], sizes = [1, 8], strides = [1, 1]} : vector<1x128xf32> to vector<1x8xf32>
    %225 = vector.extract_strided_slice %193 {offsets = [0, 64], sizes = [1, 8], strides = [1, 1]} : vector<1x128xf32> to vector<1x8xf32>
    %226 = arith.maximumf %224, %225 : vector<1x8xf32>
    %227 = vector.extract_strided_slice %193 {offsets = [0, 72], sizes = [1, 8], strides = [1, 1]} : vector<1x128xf32> to vector<1x8xf32>
    %228 = arith.maximumf %226, %227 : vector<1x8xf32>
    %c0_126 = arith.constant 0 : index
    %c2_127 = arith.constant 2 : index
    %c4_128 = arith.constant 4 : index
    %c0_129 = arith.constant 0 : index
    %229 = vector.load %arg6[%c0_126, %c2_127, %c4_128, %c0_129] : memref<1x8x8x8xf32, #tpu.memory_space<vmem>>, vector<1x1x1x8xf32>
    %230 = vector.shape_cast %229 : vector<1x1x1x8xf32> to vector<1x8xf32>
    %231 = vector.shape_cast %228 : vector<1x8xf32> to vector<1x1x1x8xf32>
    tpu.vector_store %arg6[%c0_126, %c2_127, %c4_128, %c0_129], %231 {strides = array<i32>} : memref<1x8x8x8xf32, #tpu.memory_space<vmem>>, vector<1x1x1x8xf32>,
    %232 = vector.extract_strided_slice %193 {offsets = [0, 72], sizes = [1, 8], strides = [1, 1]} : vector<1x128xf32> to vector<1x8xf32>
    %233 = vector.extract_strided_slice %193 {offsets = [0, 80], sizes = [1, 8], strides = [1, 1]} : vector<1x128xf32> to vector<1x8xf32>
    %234 = arith.maximumf %232, %233 : vector<1x8xf32>
    %235 = vector.extract_strided_slice %193 {offsets = [0, 88], sizes = [1, 8], strides = [1, 1]} : vector<1x128xf32> to vector<1x8xf32>
    %236 = arith.maximumf %234, %235 : vector<1x8xf32>
    %c0_130 = arith.constant 0 : index
    %c2_131 = arith.constant 2 : index
    %c5_132 = arith.constant 5 : index
    %c0_133 = arith.constant 0 : index
    %237 = vector.load %arg6[%c0_130, %c2_131, %c5_132, %c0_133] : memref<1x8x8x8xf32, #tpu.memory_space<vmem>>, vector<1x1x1x8xf32>
    %238 = vector.shape_cast %237 : vector<1x1x1x8xf32> to vector<1x8xf32>
    %239 = vector.shape_cast %236 : vector<1x8xf32> to vector<1x1x1x8xf32>
    tpu.vector_store %arg6[%c0_130, %c2_131, %c5_132, %c0_133], %239 {strides = array<i32>} : memref<1x8x8x8xf32, #tpu.memory_space<vmem>>, vector<1x1x1x8xf32>,
    %240 = vector.extract_strided_slice %193 {offsets = [0, 88], sizes = [1, 8], strides = [1, 1]} : vector<1x128xf32> to vector<1x8xf32>
    %241 = vector.extract_strided_slice %193 {offsets = [0, 96], sizes = [1, 8], strides = [1, 1]} : vector<1x128xf32> to vector<1x8xf32>
    %242 = arith.maximumf %240, %241 : vector<1x8xf32>
    %243 = vector.extract_strided_slice %193 {offsets = [0, 104], sizes = [1, 8], strides = [1, 1]} : vector<1x128xf32> to vector<1x8xf32>
    %244 = arith.maximumf %242, %243 : vector<1x8xf32>
    %c0_134 = arith.constant 0 : index
    %c2_135 = arith.constant 2 : index
    %c6_136 = arith.constant 6 : index
    %c0_137 = arith.constant 0 : index
    %245 = vector.load %arg6[%c0_134, %c2_135, %c6_136, %c0_137] : memref<1x8x8x8xf32, #tpu.memory_space<vmem>>, vector<1x1x1x8xf32>
    %246 = vector.shape_cast %245 : vector<1x1x1x8xf32> to vector<1x8xf32>
    %247 = vector.shape_cast %244 : vector<1x8xf32> to vector<1x1x1x8xf32>
    tpu.vector_store %arg6[%c0_134, %c2_135, %c6_136, %c0_137], %247 {strides = array<i32>} : memref<1x8x8x8xf32, #tpu.memory_space<vmem>>, vector<1x1x1x8xf32>,
    %248 = vector.extract_strided_slice %193 {offsets = [0, 104], sizes = [1, 8], strides = [1, 1]} : vector<1x128xf32> to vector<1x8xf32>
    %249 = vector.extract_strided_slice %193 {offsets = [0, 112], sizes = [1, 8], strides = [1, 1]} : vector<1x128xf32> to vector<1x8xf32>
    %250 = arith.maximumf %248, %249 : vector<1x8xf32>
    %251 = vector.extract_strided_slice %193 {offsets = [0, 120], sizes = [1, 8], strides = [1, 1]} : vector<1x128xf32> to vector<1x8xf32>
    %252 = arith.maximumf %250, %251 : vector<1x8xf32>
    %c0_138 = arith.constant 0 : index
    %c2_139 = arith.constant 2 : index
    %c7_140 = arith.constant 7 : index
    %c0_141 = arith.constant 0 : index
    %253 = vector.load %arg6[%c0_138, %c2_139, %c7_140, %c0_141] : memref<1x8x8x8xf32, #tpu.memory_space<vmem>>, vector<1x1x1x8xf32>
    %254 = vector.shape_cast %253 : vector<1x1x1x8xf32> to vector<1x8xf32>
    %255 = vector.shape_cast %252 : vector<1x8xf32> to vector<1x1x1x8xf32>
    tpu.vector_store %arg6[%c0_138, %c2_139, %c7_140, %c0_141], %255 {strides = array<i32>} : memref<1x8x8x8xf32, #tpu.memory_space<vmem>>, vector<1x1x1x8xf32>,
    %256 = vector.extract_strided_slice %56 {offsets = [5, 0], sizes = [1, 128], strides = [1, 1]} : vector<16x128xf32> to vector<1x128xf32>
    %257 = vector.extract_strided_slice %56 {offsets = [6, 0], sizes = [1, 128], strides = [1, 1]} : vector<16x128xf32> to vector<1x128xf32>
    %258 = arith.maximumf %256, %257 : vector<1x128xf32>
    %259 = vector.extract_strided_slice %56 {offsets = [7, 0], sizes = [1, 128], strides = [1, 1]} : vector<16x128xf32> to vector<1x128xf32>
    %260 = arith.maximumf %258, %259 : vector<1x128xf32>
    %261 = vector.extract_strided_slice %260 {offsets = [0, 0], sizes = [1, 8], strides = [1, 1]} : vector<1x128xf32> to vector<1x8xf32>
    %262 = vector.extract_strided_slice %260 {offsets = [0, 8], sizes = [1, 8], strides = [1, 1]} : vector<1x128xf32> to vector<1x8xf32>
    %263 = arith.maximumf %261, %262 : vector<1x8xf32>
    %c0_142 = arith.constant 0 : index
    %c3_143 = arith.constant 3 : index
    %c0_144 = arith.constant 0 : index
    %c0_145 = arith.constant 0 : index
    %264 = vector.load %arg6[%c0_142, %c3_143, %c0_144, %c0_145] : memref<1x8x8x8xf32, #tpu.memory_space<vmem>>, vector<1x1x1x8xf32>
    %265 = vector.shape_cast %264 : vector<1x1x1x8xf32> to vector<1x8xf32>
    %266 = vector.shape_cast %263 : vector<1x8xf32> to vector<1x1x1x8xf32>
    tpu.vector_store %arg6[%c0_142, %c3_143, %c0_144, %c0_145], %266 {strides = array<i32>} : memref<1x8x8x8xf32, #tpu.memory_space<vmem>>, vector<1x1x1x8xf32>,
    %267 = vector.extract_strided_slice %260 {offsets = [0, 8], sizes = [1, 8], strides = [1, 1]} : vector<1x128xf32> to vector<1x8xf32>
    %268 = vector.extract_strided_slice %260 {offsets = [0, 16], sizes = [1, 8], strides = [1, 1]} : vector<1x128xf32> to vector<1x8xf32>
    %269 = arith.maximumf %267, %268 : vector<1x8xf32>
    %270 = vector.extract_strided_slice %260 {offsets = [0, 24], sizes = [1, 8], strides = [1, 1]} : vector<1x128xf32> to vector<1x8xf32>
    %271 = arith.maximumf %269, %270 : vector<1x8xf32>
    %c0_146 = arith.constant 0 : index
    %c3_147 = arith.constant 3 : index
    %c1_148 = arith.constant 1 : index
    %c0_149 = arith.constant 0 : index
    %272 = vector.load %arg6[%c0_146, %c3_147, %c1_148, %c0_149] : memref<1x8x8x8xf32, #tpu.memory_space<vmem>>, vector<1x1x1x8xf32>
    %273 = vector.shape_cast %272 : vector<1x1x1x8xf32> to vector<1x8xf32>
    %274 = vector.shape_cast %271 : vector<1x8xf32> to vector<1x1x1x8xf32>
    tpu.vector_store %arg6[%c0_146, %c3_147, %c1_148, %c0_149], %274 {strides = array<i32>} : memref<1x8x8x8xf32, #tpu.memory_space<vmem>>, vector<1x1x1x8xf32>,
    %275 = vector.extract_strided_slice %260 {offsets = [0, 24], sizes = [1, 8], strides = [1, 1]} : vector<1x128xf32> to vector<1x8xf32>
    %276 = vector.extract_strided_slice %260 {offsets = [0, 32], sizes = [1, 8], strides = [1, 1]} : vector<1x128xf32> to vector<1x8xf32>
    %277 = arith.maximumf %275, %276 : vector<1x8xf32>
    %278 = vector.extract_strided_slice %260 {offsets = [0, 40], sizes = [1, 8], strides = [1, 1]} : vector<1x128xf32> to vector<1x8xf32>
    %279 = arith.maximumf %277, %278 : vector<1x8xf32>
    %c0_150 = arith.constant 0 : index
    %c3_151 = arith.constant 3 : index
    %c2_152 = arith.constant 2 : index
    %c0_153 = arith.constant 0 : index
    %280 = vector.load %arg6[%c0_150, %c3_151, %c2_152, %c0_153] : memref<1x8x8x8xf32, #tpu.memory_space<vmem>>, vector<1x1x1x8xf32>
    %281 = vector.shape_cast %280 : vector<1x1x1x8xf32> to vector<1x8xf32>
    %282 = vector.shape_cast %279 : vector<1x8xf32> to vector<1x1x1x8xf32>
    tpu.vector_store %arg6[%c0_150, %c3_151, %c2_152, %c0_153], %282 {strides = array<i32>} : memref<1x8x8x8xf32, #tpu.memory_space<vmem>>, vector<1x1x1x8xf32>,
    %283 = vector.extract_strided_slice %260 {offsets = [0, 40], sizes = [1, 8], strides = [1, 1]} : vector<1x128xf32> to vector<1x8xf32>
    %284 = vector.extract_strided_slice %260 {offsets = [0, 48], sizes = [1, 8], strides = [1, 1]} : vector<1x128xf32> to vector<1x8xf32>
    %285 = arith.maximumf %283, %284 : vector<1x8xf32>
    %286 = vector.extract_strided_slice %260 {offsets = [0, 56], sizes = [1, 8], strides = [1, 1]} : vector<1x128xf32> to vector<1x8xf32>
    %287 = arith.maximumf %285, %286 : vector<1x8xf32>
    %c0_154 = arith.constant 0 : index
    %c3_155 = arith.constant 3 : index
    %c3_156 = arith.constant 3 : index
    %c0_157 = arith.constant 0 : index
    %288 = vector.load %arg6[%c0_154, %c3_155, %c3_156, %c0_157] : memref<1x8x8x8xf32, #tpu.memory_space<vmem>>, vector<1x1x1x8xf32>
    %289 = vector.shape_cast %288 : vector<1x1x1x8xf32> to vector<1x8xf32>
    %290 = vector.shape_cast %287 : vector<1x8xf32> to vector<1x1x1x8xf32>
    tpu.vector_store %arg6[%c0_154, %c3_155, %c3_156, %c0_157], %290 {strides = array<i32>} : memref<1x8x8x8xf32, #tpu.memory_space<vmem>>, vector<1x1x1x8xf32>,
    %291 = vector.extract_strided_slice %260 {offsets = [0, 56], sizes = [1, 8], strides = [1, 1]} : vector<1x128xf32> to vector<1x8xf32>
    %292 = vector.extract_strided_slice %260 {offsets = [0, 64], sizes = [1, 8], strides = [1, 1]} : vector<1x128xf32> to vector<1x8xf32>
    %293 = arith.maximumf %291, %292 : vector<1x8xf32>
    %294 = vector.extract_strided_slice %260 {offsets = [0, 72], sizes = [1, 8], strides = [1, 1]} : vector<1x128xf32> to vector<1x8xf32>
    %295 = arith.maximumf %293, %294 : vector<1x8xf32>
    %c0_158 = arith.constant 0 : index
    %c3_159 = arith.constant 3 : index
    %c4_160 = arith.constant 4 : index
    %c0_161 = arith.constant 0 : index
    %296 = vector.load %arg6[%c0_158, %c3_159, %c4_160, %c0_161] : memref<1x8x8x8xf32, #tpu.memory_space<vmem>>, vector<1x1x1x8xf32>
    %297 = vector.shape_cast %296 : vector<1x1x1x8xf32> to vector<1x8xf32>
    %298 = vector.shape_cast %295 : vector<1x8xf32> to vector<1x1x1x8xf32>
    tpu.vector_store %arg6[%c0_158, %c3_159, %c4_160, %c0_161], %298 {strides = array<i32>} : memref<1x8x8x8xf32, #tpu.memory_space<vmem>>, vector<1x1x1x8xf32>,
    %299 = vector.extract_strided_slice %260 {offsets = [0, 72], sizes = [1, 8], strides = [1, 1]} : vector<1x128xf32> to vector<1x8xf32>
    %300 = vector.extract_strided_slice %260 {offsets = [0, 80], sizes = [1, 8], strides = [1, 1]} : vector<1x128xf32> to vector<1x8xf32>
    %301 = arith.maximumf %299, %300 : vector<1x8xf32>
    %302 = vector.extract_strided_slice %260 {offsets = [0, 88], sizes = [1, 8], strides = [1, 1]} : vector<1x128xf32> to vector<1x8xf32>
    %303 = arith.maximumf %301, %302 : vector<1x8xf32>
    %c0_162 = arith.constant 0 : index
    %c3_163 = arith.constant 3 : index
    %c5_164 = arith.constant 5 : index
    %c0_165 = arith.constant 0 : index
    %304 = vector.load %arg6[%c0_162, %c3_163, %c5_164, %c0_165] : memref<1x8x8x8xf32, #tpu.memory_space<vmem>>, vector<1x1x1x8xf32>
    %305 = vector.shape_cast %304 : vector<1x1x1x8xf32> to vector<1x8xf32>
    %306 = vector.shape_cast %303 : vector<1x8xf32> to vector<1x1x1x8xf32>
    tpu.vector_store %arg6[%c0_162, %c3_163, %c5_164, %c0_165], %306 {strides = array<i32>} : memref<1x8x8x8xf32, #tpu.memory_space<vmem>>, vector<1x1x1x8xf32>,
    %307 = vector.extract_strided_slice %260 {offsets = [0, 88], sizes = [1, 8], strides = [1, 1]} : vector<1x128xf32> to vector<1x8xf32>
    %308 = vector.extract_strided_slice %260 {offsets = [0, 96], sizes = [1, 8], strides = [1, 1]} : vector<1x128xf32> to vector<1x8xf32>
    %309 = arith.maximumf %307, %308 : vector<1x8xf32>
    %310 = vector.extract_strided_slice %260 {offsets = [0, 104], sizes = [1, 8], strides = [1, 1]} : vector<1x128xf32> to vector<1x8xf32>
    %311 = arith.maximumf %309, %310 : vector<1x8xf32>
    %c0_166 = arith.constant 0 : index
    %c3_167 = arith.constant 3 : index
    %c6_168 = arith.constant 6 : index
    %c0_169 = arith.constant 0 : index
    %312 = vector.load %arg6[%c0_166, %c3_167, %c6_168, %c0_169] : memref<1x8x8x8xf32, #tpu.memory_space<vmem>>, vector<1x1x1x8xf32>
    %313 = vector.shape_cast %312 : vector<1x1x1x8xf32> to vector<1x8xf32>
    %314 = vector.shape_cast %311 : vector<1x8xf32> to vector<1x1x1x8xf32>
    tpu.vector_store %arg6[%c0_166, %c3_167, %c6_168, %c0_169], %314 {strides = array<i32>} : memref<1x8x8x8xf32, #tpu.memory_space<vmem>>, vector<1x1x1x8xf32>,
    %315 = vector.extract_strided_slice %260 {offsets = [0, 104], sizes = [1, 8], strides = [1, 1]} : vector<1x128xf32> to vector<1x8xf32>
    %316 = vector.extract_strided_slice %260 {offsets = [0, 112], sizes = [1, 8], strides = [1, 1]} : vector<1x128xf32> to vector<1x8xf32>
    %317 = arith.maximumf %315, %316 : vector<1x8xf32>
    %318 = vector.extract_strided_slice %260 {offsets = [0, 120], sizes = [1, 8], strides = [1, 1]} : vector<1x128xf32> to vector<1x8xf32>
    %319 = arith.maximumf %317, %318 : vector<1x8xf32>
    %c0_170 = arith.constant 0 : index
    %c3_171 = arith.constant 3 : index
    %c7_172 = arith.constant 7 : index
    %c0_173 = arith.constant 0 : index
    %320 = vector.load %arg6[%c0_170, %c3_171, %c7_172, %c0_173] : memref<1x8x8x8xf32, #tpu.memory_space<vmem>>, vector<1x1x1x8xf32>
    %321 = vector.shape_cast %320 : vector<1x1x1x8xf32> to vector<1x8xf32>
    %322 = vector.shape_cast %319 : vector<1x8xf32> to vector<1x1x1x8xf32>
    tpu.vector_store %arg6[%c0_170, %c3_171, %c7_172, %c0_173], %322 {strides = array<i32>} : memref<1x8x8x8xf32, #tpu.memory_space<vmem>>, vector<1x1x1x8xf32>,
    %323 = vector.extract_strided_slice %56 {offsets = [7, 0], sizes = [1, 128], strides = [1, 1]} : vector<16x128xf32> to vector<1x128xf32>
    %324 = vector.extract_strided_slice %56 {offsets = [8, 0], sizes = [1, 128], strides = [1, 1]} : vector<16x128xf32> to vector<1x128xf32>
    %325 = arith.maximumf %323, %324 : vector<1x128xf32>
    %326 = vector.extract_strided_slice %56 {offsets = [9, 0], sizes = [1, 128], strides = [1, 1]} : vector<16x128xf32> to vector<1x128xf32>
    %327 = arith.maximumf %325, %326 : vector<1x128xf32>
    %328 = vector.extract_strided_slice %327 {offsets = [0, 0], sizes = [1, 8], strides = [1, 1]} : vector<1x128xf32> to vector<1x8xf32>
    %329 = vector.extract_strided_slice %327 {offsets = [0, 8], sizes = [1, 8], strides = [1, 1]} : vector<1x128xf32> to vector<1x8xf32>
    %330 = arith.maximumf %328, %329 : vector<1x8xf32>
    %c0_174 = arith.constant 0 : index
    %c4_175 = arith.constant 4 : index
    %c0_176 = arith.constant 0 : index
    %c0_177 = arith.constant 0 : index
    %331 = vector.load %arg6[%c0_174, %c4_175, %c0_176, %c0_177] : memref<1x8x8x8xf32, #tpu.memory_space<vmem>>, vector<1x1x1x8xf32>
    %332 = vector.shape_cast %331 : vector<1x1x1x8xf32> to vector<1x8xf32>
    %333 = vector.shape_cast %330 : vector<1x8xf32> to vector<1x1x1x8xf32>
    tpu.vector_store %arg6[%c0_174, %c4_175, %c0_176, %c0_177], %333 {strides = array<i32>} : memref<1x8x8x8xf32, #tpu.memory_space<vmem>>, vector<1x1x1x8xf32>,
    %334 = vector.extract_strided_slice %327 {offsets = [0, 8], sizes = [1, 8], strides = [1, 1]} : vector<1x128xf32> to vector<1x8xf32>
    %335 = vector.extract_strided_slice %327 {offsets = [0, 16], sizes = [1, 8], strides = [1, 1]} : vector<1x128xf32> to vector<1x8xf32>
    %336 = arith.maximumf %334, %335 : vector<1x8xf32>
    %337 = vector.extract_strided_slice %327 {offsets = [0, 24], sizes = [1, 8], strides = [1, 1]} : vector<1x128xf32> to vector<1x8xf32>
    %338 = arith.maximumf %336, %337 : vector<1x8xf32>
    %c0_178 = arith.constant 0 : index
    %c4_179 = arith.constant 4 : index
    %c1_180 = arith.constant 1 : index
    %c0_181 = arith.constant 0 : index
    %339 = vector.load %arg6[%c0_178, %c4_179, %c1_180, %c0_181] : memref<1x8x8x8xf32, #tpu.memory_space<vmem>>, vector<1x1x1x8xf32>
    %340 = vector.shape_cast %339 : vector<1x1x1x8xf32> to vector<1x8xf32>
    %341 = vector.shape_cast %338 : vector<1x8xf32> to vector<1x1x1x8xf32>
    tpu.vector_store %arg6[%c0_178, %c4_179, %c1_180, %c0_181], %341 {strides = array<i32>} : memref<1x8x8x8xf32, #tpu.memory_space<vmem>>, vector<1x1x1x8xf32>,
    %342 = vector.extract_strided_slice %327 {offsets = [0, 24], sizes = [1, 8], strides = [1, 1]} : vector<1x128xf32> to vector<1x8xf32>
    %343 = vector.extract_strided_slice %327 {offsets = [0, 32], sizes = [1, 8], strides = [1, 1]} : vector<1x128xf32> to vector<1x8xf32>
    %344 = arith.maximumf %342, %343 : vector<1x8xf32>
    %345 = vector.extract_strided_slice %327 {offsets = [0, 40], sizes = [1, 8], strides = [1, 1]} : vector<1x128xf32> to vector<1x8xf32>
    %346 = arith.maximumf %344, %345 : vector<1x8xf32>
    %c0_182 = arith.constant 0 : index
    %c4_183 = arith.constant 4 : index
    %c2_184 = arith.constant 2 : index
    %c0_185 = arith.constant 0 : index
    %347 = vector.load %arg6[%c0_182, %c4_183, %c2_184, %c0_185] : memref<1x8x8x8xf32, #tpu.memory_space<vmem>>, vector<1x1x1x8xf32>
    %348 = vector.shape_cast %347 : vector<1x1x1x8xf32> to vector<1x8xf32>
    %349 = vector.shape_cast %346 : vector<1x8xf32> to vector<1x1x1x8xf32>
    tpu.vector_store %arg6[%c0_182, %c4_183, %c2_184, %c0_185], %349 {strides = array<i32>} : memref<1x8x8x8xf32, #tpu.memory_space<vmem>>, vector<1x1x1x8xf32>,
    %350 = vector.extract_strided_slice %327 {offsets = [0, 40], sizes = [1, 8], strides = [1, 1]} : vector<1x128xf32> to vector<1x8xf32>
    %351 = vector.extract_strided_slice %327 {offsets = [0, 48], sizes = [1, 8], strides = [1, 1]} : vector<1x128xf32> to vector<1x8xf32>
    %352 = arith.maximumf %350, %351 : vector<1x8xf32>
    %353 = vector.extract_strided_slice %327 {offsets = [0, 56], sizes = [1, 8], strides = [1, 1]} : vector<1x128xf32> to vector<1x8xf32>
    %354 = arith.maximumf %352, %353 : vector<1x8xf32>
    %c0_186 = arith.constant 0 : index
    %c4_187 = arith.constant 4 : index
    %c3_188 = arith.constant 3 : index
    %c0_189 = arith.constant 0 : index
    %355 = vector.load %arg6[%c0_186, %c4_187, %c3_188, %c0_189] : memref<1x8x8x8xf32, #tpu.memory_space<vmem>>, vector<1x1x1x8xf32>
    %356 = vector.shape_cast %355 : vector<1x1x1x8xf32> to vector<1x8xf32>
    %357 = vector.shape_cast %354 : vector<1x8xf32> to vector<1x1x1x8xf32>
    tpu.vector_store %arg6[%c0_186, %c4_187, %c3_188, %c0_189], %357 {strides = array<i32>} : memref<1x8x8x8xf32, #tpu.memory_space<vmem>>, vector<1x1x1x8xf32>,
    %358 = vector.extract_strided_slice %327 {offsets = [0, 56], sizes = [1, 8], strides = [1, 1]} : vector<1x128xf32> to vector<1x8xf32>
    %359 = vector.extract_strided_slice %327 {offsets = [0, 64], sizes = [1, 8], strides = [1, 1]} : vector<1x128xf32> to vector<1x8xf32>
    %360 = arith.maximumf %358, %359 : vector<1x8xf32>
    %361 = vector.extract_strided_slice %327 {offsets = [0, 72], sizes = [1, 8], strides = [1, 1]} : vector<1x128xf32> to vector<1x8xf32>
    %362 = arith.maximumf %360, %361 : vector<1x8xf32>
    %c0_190 = arith.constant 0 : index
    %c4_191 = arith.constant 4 : index
    %c4_192 = arith.constant 4 : index
    %c0_193 = arith.constant 0 : index
    %363 = vector.load %arg6[%c0_190, %c4_191, %c4_192, %c0_193] : memref<1x8x8x8xf32, #tpu.memory_space<vmem>>, vector<1x1x1x8xf32>
    %364 = vector.shape_cast %363 : vector<1x1x1x8xf32> to vector<1x8xf32>
    %365 = vector.shape_cast %362 : vector<1x8xf32> to vector<1x1x1x8xf32>
    tpu.vector_store %arg6[%c0_190, %c4_191, %c4_192, %c0_193], %365 {strides = array<i32>} : memref<1x8x8x8xf32, #tpu.memory_space<vmem>>, vector<1x1x1x8xf32>,
    %366 = vector.extract_strided_slice %327 {offsets = [0, 72], sizes = [1, 8], strides = [1, 1]} : vector<1x128xf32> to vector<1x8xf32>
    %367 = vector.extract_strided_slice %327 {offsets = [0, 80], sizes = [1, 8], strides = [1, 1]} : vector<1x128xf32> to vector<1x8xf32>
    %368 = arith.maximumf %366, %367 : vector<1x8xf32>
    %369 = vector.extract_strided_slice %327 {offsets = [0, 88], sizes = [1, 8], strides = [1, 1]} : vector<1x128xf32> to vector<1x8xf32>
    %370 = arith.maximumf %368, %369 : vector<1x8xf32>
    %c0_194 = arith.constant 0 : index
    %c4_195 = arith.constant 4 : index
    %c5_196 = arith.constant 5 : index
    %c0_197 = arith.constant 0 : index
    %371 = vector.load %arg6[%c0_194, %c4_195, %c5_196, %c0_197] : memref<1x8x8x8xf32, #tpu.memory_space<vmem>>, vector<1x1x1x8xf32>
    %372 = vector.shape_cast %371 : vector<1x1x1x8xf32> to vector<1x8xf32>
    %373 = vector.shape_cast %370 : vector<1x8xf32> to vector<1x1x1x8xf32>
    tpu.vector_store %arg6[%c0_194, %c4_195, %c5_196, %c0_197], %373 {strides = array<i32>} : memref<1x8x8x8xf32, #tpu.memory_space<vmem>>, vector<1x1x1x8xf32>,
    %374 = vector.extract_strided_slice %327 {offsets = [0, 88], sizes = [1, 8], strides = [1, 1]} : vector<1x128xf32> to vector<1x8xf32>
    %375 = vector.extract_strided_slice %327 {offsets = [0, 96], sizes = [1, 8], strides = [1, 1]} : vector<1x128xf32> to vector<1x8xf32>
    %376 = arith.maximumf %374, %375 : vector<1x8xf32>
    %377 = vector.extract_strided_slice %327 {offsets = [0, 104], sizes = [1, 8], strides = [1, 1]} : vector<1x128xf32> to vector<1x8xf32>
    %378 = arith.maximumf %376, %377 : vector<1x8xf32>
    %c0_198 = arith.constant 0 : index
    %c4_199 = arith.constant 4 : index
    %c6_200 = arith.constant 6 : index
    %c0_201 = arith.constant 0 : index
    %379 = vector.load %arg6[%c0_198, %c4_199, %c6_200, %c0_201] : memref<1x8x8x8xf32, #tpu.memory_space<vmem>>, vector<1x1x1x8xf32>
    %380 = vector.shape_cast %379 : vector<1x1x1x8xf32> to vector<1x8xf32>
    %381 = vector.shape_cast %378 : vector<1x8xf32> to vector<1x1x1x8xf32>
    tpu.vector_store %arg6[%c0_198, %c4_199, %c6_200, %c0_201], %381 {strides = array<i32>} : memref<1x8x8x8xf32, #tpu.memory_space<vmem>>, vector<1x1x1x8xf32>,
    %382 = vector.extract_strided_slice %327 {offsets = [0, 104], sizes = [1, 8], strides = [1, 1]} : vector<1x128xf32> to vector<1x8xf32>
    %383 = vector.extract_strided_slice %327 {offsets = [0, 112], sizes = [1, 8], strides = [1, 1]} : vector<1x128xf32> to vector<1x8xf32>
    %384 = arith.maximumf %382, %383 : vector<1x8xf32>
    %385 = vector.extract_strided_slice %327 {offsets = [0, 120], sizes = [1, 8], strides = [1, 1]} : vector<1x128xf32> to vector<1x8xf32>
    %386 = arith.maximumf %384, %385 : vector<1x8xf32>
    %c0_202 = arith.constant 0 : index
    %c4_203 = arith.constant 4 : index
    %c7_204 = arith.constant 7 : index
    %c0_205 = arith.constant 0 : index
    %387 = vector.load %arg6[%c0_202, %c4_203, %c7_204, %c0_205] : memref<1x8x8x8xf32, #tpu.memory_space<vmem>>, vector<1x1x1x8xf32>
    %388 = vector.shape_cast %387 : vector<1x1x1x8xf32> to vector<1x8xf32>
    %389 = vector.shape_cast %386 : vector<1x8xf32> to vector<1x1x1x8xf32>
    tpu.vector_store %arg6[%c0_202, %c4_203, %c7_204, %c0_205], %389 {strides = array<i32>} : memref<1x8x8x8xf32, #tpu.memory_space<vmem>>, vector<1x1x1x8xf32>,
    %390 = vector.extract_strided_slice %56 {offsets = [9, 0], sizes = [1, 128], strides = [1, 1]} : vector<16x128xf32> to vector<1x128xf32>
    %391 = vector.extract_strided_slice %56 {offsets = [10, 0], sizes = [1, 128], strides = [1, 1]} : vector<16x128xf32> to vector<1x128xf32>
    %392 = arith.maximumf %390, %391 : vector<1x128xf32>
    %393 = vector.extract_strided_slice %56 {offsets = [11, 0], sizes = [1, 128], strides = [1, 1]} : vector<16x128xf32> to vector<1x128xf32>
    %394 = arith.maximumf %392, %393 : vector<1x128xf32>
    %395 = vector.extract_strided_slice %394 {offsets = [0, 0], sizes = [1, 8], strides = [1, 1]} : vector<1x128xf32> to vector<1x8xf32>
    %396 = vector.extract_strided_slice %394 {offsets = [0, 8], sizes = [1, 8], strides = [1, 1]} : vector<1x128xf32> to vector<1x8xf32>
    %397 = arith.maximumf %395, %396 : vector<1x8xf32>
    %c0_206 = arith.constant 0 : index
    %c5_207 = arith.constant 5 : index
    %c0_208 = arith.constant 0 : index
    %c0_209 = arith.constant 0 : index
    %398 = vector.load %arg6[%c0_206, %c5_207, %c0_208, %c0_209] : memref<1x8x8x8xf32, #tpu.memory_space<vmem>>, vector<1x1x1x8xf32>
    %399 = vector.shape_cast %398 : vector<1x1x1x8xf32> to vector<1x8xf32>
    %400 = vector.shape_cast %397 : vector<1x8xf32> to vector<1x1x1x8xf32>
    tpu.vector_store %arg6[%c0_206, %c5_207, %c0_208, %c0_209], %400 {strides = array<i32>} : memref<1x8x8x8xf32, #tpu.memory_space<vmem>>, vector<1x1x1x8xf32>,
    %401 = vector.extract_strided_slice %394 {offsets = [0, 8], sizes = [1, 8], strides = [1, 1]} : vector<1x128xf32> to vector<1x8xf32>
    %402 = vector.extract_strided_slice %394 {offsets = [0, 16], sizes = [1, 8], strides = [1, 1]} : vector<1x128xf32> to vector<1x8xf32>
    %403 = arith.maximumf %401, %402 : vector<1x8xf32>
    %404 = vector.extract_strided_slice %394 {offsets = [0, 24], sizes = [1, 8], strides = [1, 1]} : vector<1x128xf32> to vector<1x8xf32>
    %405 = arith.maximumf %403, %404 : vector<1x8xf32>
    %c0_210 = arith.constant 0 : index
    %c5_211 = arith.constant 5 : index
    %c1_212 = arith.constant 1 : index
    %c0_213 = arith.constant 0 : index
    %406 = vector.load %arg6[%c0_210, %c5_211, %c1_212, %c0_213] : memref<1x8x8x8xf32, #tpu.memory_space<vmem>>, vector<1x1x1x8xf32>
    %407 = vector.shape_cast %406 : vector<1x1x1x8xf32> to vector<1x8xf32>
    %408 = vector.shape_cast %405 : vector<1x8xf32> to vector<1x1x1x8xf32>
    tpu.vector_store %arg6[%c0_210, %c5_211, %c1_212, %c0_213], %408 {strides = array<i32>} : memref<1x8x8x8xf32, #tpu.memory_space<vmem>>, vector<1x1x1x8xf32>,
    %409 = vector.extract_strided_slice %394 {offsets = [0, 24], sizes = [1, 8], strides = [1, 1]} : vector<1x128xf32> to vector<1x8xf32>
    %410 = vector.extract_strided_slice %394 {offsets = [0, 32], sizes = [1, 8], strides = [1, 1]} : vector<1x128xf32> to vector<1x8xf32>
    %411 = arith.maximumf %409, %410 : vector<1x8xf32>
    %412 = vector.extract_strided_slice %394 {offsets = [0, 40], sizes = [1, 8], strides = [1, 1]} : vector<1x128xf32> to vector<1x8xf32>
    %413 = arith.maximumf %411, %412 : vector<1x8xf32>
    %c0_214 = arith.constant 0 : index
    %c5_215 = arith.constant 5 : index
    %c2_216 = arith.constant 2 : index
    %c0_217 = arith.constant 0 : index
    %414 = vector.load %arg6[%c0_214, %c5_215, %c2_216, %c0_217] : memref<1x8x8x8xf32, #tpu.memory_space<vmem>>, vector<1x1x1x8xf32>
    %415 = vector.shape_cast %414 : vector<1x1x1x8xf32> to vector<1x8xf32>
    %416 = vector.shape_cast %413 : vector<1x8xf32> to vector<1x1x1x8xf32>
    tpu.vector_store %arg6[%c0_214, %c5_215, %c2_216, %c0_217], %416 {strides = array<i32>} : memref<1x8x8x8xf32, #tpu.memory_space<vmem>>, vector<1x1x1x8xf32>,
    %417 = vector.extract_strided_slice %394 {offsets = [0, 40], sizes = [1, 8], strides = [1, 1]} : vector<1x128xf32> to vector<1x8xf32>
    %418 = vector.extract_strided_slice %394 {offsets = [0, 48], sizes = [1, 8], strides = [1, 1]} : vector<1x128xf32> to vector<1x8xf32>
    %419 = arith.maximumf %417, %418 : vector<1x8xf32>
    %420 = vector.extract_strided_slice %394 {offsets = [0, 56], sizes = [1, 8], strides = [1, 1]} : vector<1x128xf32> to vector<1x8xf32>
    %421 = arith.maximumf %419, %420 : vector<1x8xf32>
    %c0_218 = arith.constant 0 : index
    %c5_219 = arith.constant 5 : index
    %c3_220 = arith.constant 3 : index
    %c0_221 = arith.constant 0 : index
    %422 = vector.load %arg6[%c0_218, %c5_219, %c3_220, %c0_221] : memref<1x8x8x8xf32, #tpu.memory_space<vmem>>, vector<1x1x1x8xf32>
    %423 = vector.shape_cast %422 : vector<1x1x1x8xf32> to vector<1x8xf32>
    %424 = vector.shape_cast %421 : vector<1x8xf32> to vector<1x1x1x8xf32>
    tpu.vector_store %arg6[%c0_218, %c5_219, %c3_220, %c0_221], %424 {strides = array<i32>} : memref<1x8x8x8xf32, #tpu.memory_space<vmem>>, vector<1x1x1x8xf32>,
    %425 = vector.extract_strided_slice %394 {offsets = [0, 56], sizes = [1, 8], strides = [1, 1]} : vector<1x128xf32> to vector<1x8xf32>
    %426 = vector.extract_strided_slice %394 {offsets = [0, 64], sizes = [1, 8], strides = [1, 1]} : vector<1x128xf32> to vector<1x8xf32>
    %427 = arith.maximumf %425, %426 : vector<1x8xf32>
    %428 = vector.extract_strided_slice %394 {offsets = [0, 72], sizes = [1, 8], strides = [1, 1]} : vector<1x128xf32> to vector<1x8xf32>
    %429 = arith.maximumf %427, %428 : vector<1x8xf32>
    %c0_222 = arith.constant 0 : index
    %c5_223 = arith.constant 5 : index
    %c4_224 = arith.constant 4 : index
    %c0_225 = arith.constant 0 : index
    %430 = vector.load %arg6[%c0_222, %c5_223, %c4_224, %c0_225] : memref<1x8x8x8xf32, #tpu.memory_space<vmem>>, vector<1x1x1x8xf32>
    %431 = vector.shape_cast %430 : vector<1x1x1x8xf32> to vector<1x8xf32>
    %432 = vector.shape_cast %429 : vector<1x8xf32> to vector<1x1x1x8xf32>
    tpu.vector_store %arg6[%c0_222, %c5_223, %c4_224, %c0_225], %432 {strides = array<i32>} : memref<1x8x8x8xf32, #tpu.memory_space<vmem>>, vector<1x1x1x8xf32>,
    %433 = vector.extract_strided_slice %394 {offsets = [0, 72], sizes = [1, 8], strides = [1, 1]} : vector<1x128xf32> to vector<1x8xf32>
    %434 = vector.extract_strided_slice %394 {offsets = [0, 80], sizes = [1, 8], strides = [1, 1]} : vector<1x128xf32> to vector<1x8xf32>
    %435 = arith.maximumf %433, %434 : vector<1x8xf32>
    %436 = vector.extract_strided_slice %394 {offsets = [0, 88], sizes = [1, 8], strides = [1, 1]} : vector<1x128xf32> to vector<1x8xf32>
    %437 = arith.maximumf %435, %436 : vector<1x8xf32>
    %c0_226 = arith.constant 0 : index
    %c5_227 = arith.constant 5 : index
    %c5_228 = arith.constant 5 : index
    %c0_229 = arith.constant 0 : index
    %438 = vector.load %arg6[%c0_226, %c5_227, %c5_228, %c0_229] : memref<1x8x8x8xf32, #tpu.memory_space<vmem>>, vector<1x1x1x8xf32>
    %439 = vector.shape_cast %438 : vector<1x1x1x8xf32> to vector<1x8xf32>
    %440 = vector.shape_cast %437 : vector<1x8xf32> to vector<1x1x1x8xf32>
    tpu.vector_store %arg6[%c0_226, %c5_227, %c5_228, %c0_229], %440 {strides = array<i32>} : memref<1x8x8x8xf32, #tpu.memory_space<vmem>>, vector<1x1x1x8xf32>,
    %441 = vector.extract_strided_slice %394 {offsets = [0, 88], sizes = [1, 8], strides = [1, 1]} : vector<1x128xf32> to vector<1x8xf32>
    %442 = vector.extract_strided_slice %394 {offsets = [0, 96], sizes = [1, 8], strides = [1, 1]} : vector<1x128xf32> to vector<1x8xf32>
    %443 = arith.maximumf %441, %442 : vector<1x8xf32>
    %444 = vector.extract_strided_slice %394 {offsets = [0, 104], sizes = [1, 8], strides = [1, 1]} : vector<1x128xf32> to vector<1x8xf32>
    %445 = arith.maximumf %443, %444 : vector<1x8xf32>
    %c0_230 = arith.constant 0 : index
    %c5_231 = arith.constant 5 : index
    %c6_232 = arith.constant 6 : index
    %c0_233 = arith.constant 0 : index
    %446 = vector.load %arg6[%c0_230, %c5_231, %c6_232, %c0_233] : memref<1x8x8x8xf32, #tpu.memory_space<vmem>>, vector<1x1x1x8xf32>
    %447 = vector.shape_cast %446 : vector<1x1x1x8xf32> to vector<1x8xf32>
    %448 = vector.shape_cast %445 : vector<1x8xf32> to vector<1x1x1x8xf32>
    tpu.vector_store %arg6[%c0_230, %c5_231, %c6_232, %c0_233], %448 {strides = array<i32>} : memref<1x8x8x8xf32, #tpu.memory_space<vmem>>, vector<1x1x1x8xf32>,
    %449 = vector.extract_strided_slice %394 {offsets = [0, 104], sizes = [1, 8], strides = [1, 1]} : vector<1x128xf32> to vector<1x8xf32>
    %450 = vector.extract_strided_slice %394 {offsets = [0, 112], sizes = [1, 8], strides = [1, 1]} : vector<1x128xf32> to vector<1x8xf32>
    %451 = arith.maximumf %449, %450 : vector<1x8xf32>
    %452 = vector.extract_strided_slice %394 {offsets = [0, 120], sizes = [1, 8], strides = [1, 1]} : vector<1x128xf32> to vector<1x8xf32>
    %453 = arith.maximumf %451, %452 : vector<1x8xf32>
    %c0_234 = arith.constant 0 : index
    %c5_235 = arith.constant 5 : index
    %c7_236 = arith.constant 7 : index
    %c0_237 = arith.constant 0 : index
    %454 = vector.load %arg6[%c0_234, %c5_235, %c7_236, %c0_237] : memref<1x8x8x8xf32, #tpu.memory_space<vmem>>, vector<1x1x1x8xf32>
    %455 = vector.shape_cast %454 : vector<1x1x1x8xf32> to vector<1x8xf32>
    %456 = vector.shape_cast %453 : vector<1x8xf32> to vector<1x1x1x8xf32>
    tpu.vector_store %arg6[%c0_234, %c5_235, %c7_236, %c0_237], %456 {strides = array<i32>} : memref<1x8x8x8xf32, #tpu.memory_space<vmem>>, vector<1x1x1x8xf32>,
    %457 = vector.extract_strided_slice %56 {offsets = [11, 0], sizes = [1, 128], strides = [1, 1]} : vector<16x128xf32> to vector<1x128xf32>
    %458 = vector.extract_strided_slice %56 {offsets = [12, 0], sizes = [1, 128], strides = [1, 1]} : vector<16x128xf32> to vector<1x128xf32>
    %459 = arith.maximumf %457, %458 : vector<1x128xf32>
    %460 = vector.extract_strided_slice %56 {offsets = [13, 0], sizes = [1, 128], strides = [1, 1]} : vector<16x128xf32> to vector<1x128xf32>
    %461 = arith.maximumf %459, %460 : vector<1x128xf32>
    %462 = vector.extract_strided_slice %461 {offsets = [0, 0], sizes = [1, 8], strides = [1, 1]} : vector<1x128xf32> to vector<1x8xf32>
    %463 = vector.extract_strided_slice %461 {offsets = [0, 8], sizes = [1, 8], strides = [1, 1]} : vector<1x128xf32> to vector<1x8xf32>
    %464 = arith.maximumf %462, %463 : vector<1x8xf32>
    %c0_238 = arith.constant 0 : index
    %c6_239 = arith.constant 6 : index
    %c0_240 = arith.constant 0 : index
    %c0_241 = arith.constant 0 : index
    %465 = vector.load %arg6[%c0_238, %c6_239, %c0_240, %c0_241] : memref<1x8x8x8xf32, #tpu.memory_space<vmem>>, vector<1x1x1x8xf32>
    %466 = vector.shape_cast %465 : vector<1x1x1x8xf32> to vector<1x8xf32>
    %467 = vector.shape_cast %464 : vector<1x8xf32> to vector<1x1x1x8xf32>
    tpu.vector_store %arg6[%c0_238, %c6_239, %c0_240, %c0_241], %467 {strides = array<i32>} : memref<1x8x8x8xf32, #tpu.memory_space<vmem>>, vector<1x1x1x8xf32>,
    %468 = vector.extract_strided_slice %461 {offsets = [0, 8], sizes = [1, 8], strides = [1, 1]} : vector<1x128xf32> to vector<1x8xf32>
    %469 = vector.extract_strided_slice %461 {offsets = [0, 16], sizes = [1, 8], strides = [1, 1]} : vector<1x128xf32> to vector<1x8xf32>
    %470 = arith.maximumf %468, %469 : vector<1x8xf32>
    %471 = vector.extract_strided_slice %461 {offsets = [0, 24], sizes = [1, 8], strides = [1, 1]} : vector<1x128xf32> to vector<1x8xf32>
    %472 = arith.maximumf %470, %471 : vector<1x8xf32>
    %c0_242 = arith.constant 0 : index
    %c6_243 = arith.constant 6 : index
    %c1_244 = arith.constant 1 : index
    %c0_245 = arith.constant 0 : index
    %473 = vector.load %arg6[%c0_242, %c6_243, %c1_244, %c0_245] : memref<1x8x8x8xf32, #tpu.memory_space<vmem>>, vector<1x1x1x8xf32>
    %474 = vector.shape_cast %473 : vector<1x1x1x8xf32> to vector<1x8xf32>
    %475 = vector.shape_cast %472 : vector<1x8xf32> to vector<1x1x1x8xf32>
    tpu.vector_store %arg6[%c0_242, %c6_243, %c1_244, %c0_245], %475 {strides = array<i32>} : memref<1x8x8x8xf32, #tpu.memory_space<vmem>>, vector<1x1x1x8xf32>,
    %476 = vector.extract_strided_slice %461 {offsets = [0, 24], sizes = [1, 8], strides = [1, 1]} : vector<1x128xf32> to vector<1x8xf32>
    %477 = vector.extract_strided_slice %461 {offsets = [0, 32], sizes = [1, 8], strides = [1, 1]} : vector<1x128xf32> to vector<1x8xf32>
    %478 = arith.maximumf %476, %477 : vector<1x8xf32>
    %479 = vector.extract_strided_slice %461 {offsets = [0, 40], sizes = [1, 8], strides = [1, 1]} : vector<1x128xf32> to vector<1x8xf32>
    %480 = arith.maximumf %478, %479 : vector<1x8xf32>
    %c0_246 = arith.constant 0 : index
    %c6_247 = arith.constant 6 : index
    %c2_248 = arith.constant 2 : index
    %c0_249 = arith.constant 0 : index
    %481 = vector.load %arg6[%c0_246, %c6_247, %c2_248, %c0_249] : memref<1x8x8x8xf32, #tpu.memory_space<vmem>>, vector<1x1x1x8xf32>
    %482 = vector.shape_cast %481 : vector<1x1x1x8xf32> to vector<1x8xf32>
    %483 = vector.shape_cast %480 : vector<1x8xf32> to vector<1x1x1x8xf32>
    tpu.vector_store %arg6[%c0_246, %c6_247, %c2_248, %c0_249], %483 {strides = array<i32>} : memref<1x8x8x8xf32, #tpu.memory_space<vmem>>, vector<1x1x1x8xf32>,
    %484 = vector.extract_strided_slice %461 {offsets = [0, 40], sizes = [1, 8], strides = [1, 1]} : vector<1x128xf32> to vector<1x8xf32>
    %485 = vector.extract_strided_slice %461 {offsets = [0, 48], sizes = [1, 8], strides = [1, 1]} : vector<1x128xf32> to vector<1x8xf32>
    %486 = arith.maximumf %484, %485 : vector<1x8xf32>
    %487 = vector.extract_strided_slice %461 {offsets = [0, 56], sizes = [1, 8], strides = [1, 1]} : vector<1x128xf32> to vector<1x8xf32>
    %488 = arith.maximumf %486, %487 : vector<1x8xf32>
    %c0_250 = arith.constant 0 : index
    %c6_251 = arith.constant 6 : index
    %c3_252 = arith.constant 3 : index
    %c0_253 = arith.constant 0 : index
    %489 = vector.load %arg6[%c0_250, %c6_251, %c3_252, %c0_253] : memref<1x8x8x8xf32, #tpu.memory_space<vmem>>, vector<1x1x1x8xf32>
    %490 = vector.shape_cast %489 : vector<1x1x1x8xf32> to vector<1x8xf32>
    %491 = vector.shape_cast %488 : vector<1x8xf32> to vector<1x1x1x8xf32>
    tpu.vector_store %arg6[%c0_250, %c6_251, %c3_252, %c0_253], %491 {strides = array<i32>} : memref<1x8x8x8xf32, #tpu.memory_space<vmem>>, vector<1x1x1x8xf32>,
    %492 = vector.extract_strided_slice %461 {offsets = [0, 56], sizes = [1, 8], strides = [1, 1]} : vector<1x128xf32> to vector<1x8xf32>
    %493 = vector.extract_strided_slice %461 {offsets = [0, 64], sizes = [1, 8], strides = [1, 1]} : vector<1x128xf32> to vector<1x8xf32>
    %494 = arith.maximumf %492, %493 : vector<1x8xf32>
    %495 = vector.extract_strided_slice %461 {offsets = [0, 72], sizes = [1, 8], strides = [1, 1]} : vector<1x128xf32> to vector<1x8xf32>
    %496 = arith.maximumf %494, %495 : vector<1x8xf32>
    %c0_254 = arith.constant 0 : index
    %c6_255 = arith.constant 6 : index
    %c4_256 = arith.constant 4 : index
    %c0_257 = arith.constant 0 : index
    %497 = vector.load %arg6[%c0_254, %c6_255, %c4_256, %c0_257] : memref<1x8x8x8xf32, #tpu.memory_space<vmem>>, vector<1x1x1x8xf32>
    %498 = vector.shape_cast %497 : vector<1x1x1x8xf32> to vector<1x8xf32>
    %499 = vector.shape_cast %496 : vector<1x8xf32> to vector<1x1x1x8xf32>
    tpu.vector_store %arg6[%c0_254, %c6_255, %c4_256, %c0_257], %499 {strides = array<i32>} : memref<1x8x8x8xf32, #tpu.memory_space<vmem>>, vector<1x1x1x8xf32>,
    %500 = vector.extract_strided_slice %461 {offsets = [0, 72], sizes = [1, 8], strides = [1, 1]} : vector<1x128xf32> to vector<1x8xf32>
    %501 = vector.extract_strided_slice %461 {offsets = [0, 80], sizes = [1, 8], strides = [1, 1]} : vector<1x128xf32> to vector<1x8xf32>
    %502 = arith.maximumf %500, %501 : vector<1x8xf32>
    %503 = vector.extract_strided_slice %461 {offsets = [0, 88], sizes = [1, 8], strides = [1, 1]} : vector<1x128xf32> to vector<1x8xf32>
    %504 = arith.maximumf %502, %503 : vector<1x8xf32>
    %c0_258 = arith.constant 0 : index
    %c6_259 = arith.constant 6 : index
    %c5_260 = arith.constant 5 : index
    %c0_261 = arith.constant 0 : index
    %505 = vector.load %arg6[%c0_258, %c6_259, %c5_260, %c0_261] : memref<1x8x8x8xf32, #tpu.memory_space<vmem>>, vector<1x1x1x8xf32>
    %506 = vector.shape_cast %505 : vector<1x1x1x8xf32> to vector<1x8xf32>
    %507 = vector.shape_cast %504 : vector<1x8xf32> to vector<1x1x1x8xf32>
    tpu.vector_store %arg6[%c0_258, %c6_259, %c5_260, %c0_261], %507 {strides = array<i32>} : memref<1x8x8x8xf32, #tpu.memory_space<vmem>>, vector<1x1x1x8xf32>,
    %508 = vector.extract_strided_slice %461 {offsets = [0, 88], sizes = [1, 8], strides = [1, 1]} : vector<1x128xf32> to vector<1x8xf32>
    %509 = vector.extract_strided_slice %461 {offsets = [0, 96], sizes = [1, 8], strides = [1, 1]} : vector<1x128xf32> to vector<1x8xf32>
    %510 = arith.maximumf %508, %509 : vector<1x8xf32>
    %511 = vector.extract_strided_slice %461 {offsets = [0, 104], sizes = [1, 8], strides = [1, 1]} : vector<1x128xf32> to vector<1x8xf32>
    %512 = arith.maximumf %510, %511 : vector<1x8xf32>
    %c0_262 = arith.constant 0 : index
    %c6_263 = arith.constant 6 : index
    %c6_264 = arith.constant 6 : index
    %c0_265 = arith.constant 0 : index
    %513 = vector.load %arg6[%c0_262, %c6_263, %c6_264, %c0_265] : memref<1x8x8x8xf32, #tpu.memory_space<vmem>>, vector<1x1x1x8xf32>
    %514 = vector.shape_cast %513 : vector<1x1x1x8xf32> to vector<1x8xf32>
    %515 = vector.shape_cast %512 : vector<1x8xf32> to vector<1x1x1x8xf32>
    tpu.vector_store %arg6[%c0_262, %c6_263, %c6_264, %c0_265], %515 {strides = array<i32>} : memref<1x8x8x8xf32, #tpu.memory_space<vmem>>, vector<1x1x1x8xf32>,
    %516 = vector.extract_strided_slice %461 {offsets = [0, 104], sizes = [1, 8], strides = [1, 1]} : vector<1x128xf32> to vector<1x8xf32>
    %517 = vector.extract_strided_slice %461 {offsets = [0, 112], sizes = [1, 8], strides = [1, 1]} : vector<1x128xf32> to vector<1x8xf32>
    %518 = arith.maximumf %516, %517 : vector<1x8xf32>
    %519 = vector.extract_strided_slice %461 {offsets = [0, 120], sizes = [1, 8], strides = [1, 1]} : vector<1x128xf32> to vector<1x8xf32>
    %520 = arith.maximumf %518, %519 : vector<1x8xf32>
    %c0_266 = arith.constant 0 : index
    %c6_267 = arith.constant 6 : index
    %c7_268 = arith.constant 7 : index
    %c0_269 = arith.constant 0 : index
    %521 = vector.load %arg6[%c0_266, %c6_267, %c7_268, %c0_269] : memref<1x8x8x8xf32, #tpu.memory_space<vmem>>, vector<1x1x1x8xf32>
    %522 = vector.shape_cast %521 : vector<1x1x1x8xf32> to vector<1x8xf32>
    %523 = vector.shape_cast %520 : vector<1x8xf32> to vector<1x1x1x8xf32>
    tpu.vector_store %arg6[%c0_266, %c6_267, %c7_268, %c0_269], %523 {strides = array<i32>} : memref<1x8x8x8xf32, #tpu.memory_space<vmem>>, vector<1x1x1x8xf32>,
    %524 = vector.extract_strided_slice %56 {offsets = [13, 0], sizes = [1, 128], strides = [1, 1]} : vector<16x128xf32> to vector<1x128xf32>
    %525 = vector.extract_strided_slice %56 {offsets = [14, 0], sizes = [1, 128], strides = [1, 1]} : vector<16x128xf32> to vector<1x128xf32>
    %526 = arith.maximumf %524, %525 : vector<1x128xf32>
    %527 = vector.extract_strided_slice %56 {offsets = [15, 0], sizes = [1, 128], strides = [1, 1]} : vector<16x128xf32> to vector<1x128xf32>
    %528 = arith.maximumf %526, %527 : vector<1x128xf32>
    %529 = vector.extract_strided_slice %528 {offsets = [0, 0], sizes = [1, 8], strides = [1, 1]} : vector<1x128xf32> to vector<1x8xf32>
    %530 = vector.extract_strided_slice %528 {offsets = [0, 8], sizes = [1, 8], strides = [1, 1]} : vector<1x128xf32> to vector<1x8xf32>
    %531 = arith.maximumf %529, %530 : vector<1x8xf32>
    %c0_270 = arith.constant 0 : index
    %c7_271 = arith.constant 7 : index
    %c0_272 = arith.constant 0 : index
    %c0_273 = arith.constant 0 : index
    %532 = vector.load %arg6[%c0_270, %c7_271, %c0_272, %c0_273] : memref<1x8x8x8xf32, #tpu.memory_space<vmem>>, vector<1x1x1x8xf32>
    %533 = vector.shape_cast %532 : vector<1x1x1x8xf32> to vector<1x8xf32>
    %534 = vector.shape_cast %531 : vector<1x8xf32> to vector<1x1x1x8xf32>
    tpu.vector_store %arg6[%c0_270, %c7_271, %c0_272, %c0_273], %534 {strides = array<i32>} : memref<1x8x8x8xf32, #tpu.memory_space<vmem>>, vector<1x1x1x8xf32>,
    %535 = vector.extract_strided_slice %528 {offsets = [0, 8], sizes = [1, 8], strides = [1, 1]} : vector<1x128xf32> to vector<1x8xf32>
    %536 = vector.extract_strided_slice %528 {offsets = [0, 16], sizes = [1, 8], strides = [1, 1]} : vector<1x128xf32> to vector<1x8xf32>
    %537 = arith.maximumf %535, %536 : vector<1x8xf32>
    %538 = vector.extract_strided_slice %528 {offsets = [0, 24], sizes = [1, 8], strides = [1, 1]} : vector<1x128xf32> to vector<1x8xf32>
    %539 = arith.maximumf %537, %538 : vector<1x8xf32>
    %c0_274 = arith.constant 0 : index
    %c7_275 = arith.constant 7 : index
    %c1_276 = arith.constant 1 : index
    %c0_277 = arith.constant 0 : index
    %540 = vector.load %arg6[%c0_274, %c7_275, %c1_276, %c0_277] : memref<1x8x8x8xf32, #tpu.memory_space<vmem>>, vector<1x1x1x8xf32>
    %541 = vector.shape_cast %540 : vector<1x1x1x8xf32> to vector<1x8xf32>
    %542 = vector.shape_cast %539 : vector<1x8xf32> to vector<1x1x1x8xf32>
    tpu.vector_store %arg6[%c0_274, %c7_275, %c1_276, %c0_277], %542 {strides = array<i32>} : memref<1x8x8x8xf32, #tpu.memory_space<vmem>>, vector<1x1x1x8xf32>,
    %543 = vector.extract_strided_slice %528 {offsets = [0, 24], sizes = [1, 8], strides = [1, 1]} : vector<1x128xf32> to vector<1x8xf32>
    %544 = vector.extract_strided_slice %528 {offsets = [0, 32], sizes = [1, 8], strides = [1, 1]} : vector<1x128xf32> to vector<1x8xf32>
    %545 = arith.maximumf %543, %544 : vector<1x8xf32>
    %546 = vector.extract_strided_slice %528 {offsets = [0, 40], sizes = [1, 8], strides = [1, 1]} : vector<1x128xf32> to vector<1x8xf32>
    %547 = arith.maximumf %545, %546 : vector<1x8xf32>
    %c0_278 = arith.constant 0 : index
    %c7_279 = arith.constant 7 : index
    %c2_280 = arith.constant 2 : index
    %c0_281 = arith.constant 0 : index
    %548 = vector.load %arg6[%c0_278, %c7_279, %c2_280, %c0_281] : memref<1x8x8x8xf32, #tpu.memory_space<vmem>>, vector<1x1x1x8xf32>
    %549 = vector.shape_cast %548 : vector<1x1x1x8xf32> to vector<1x8xf32>
    %550 = vector.shape_cast %547 : vector<1x8xf32> to vector<1x1x1x8xf32>
    tpu.vector_store %arg6[%c0_278, %c7_279, %c2_280, %c0_281], %550 {strides = array<i32>} : memref<1x8x8x8xf32, #tpu.memory_space<vmem>>, vector<1x1x1x8xf32>,
    %551 = vector.extract_strided_slice %528 {offsets = [0, 40], sizes = [1, 8], strides = [1, 1]} : vector<1x128xf32> to vector<1x8xf32>
    %552 = vector.extract_strided_slice %528 {offsets = [0, 48], sizes = [1, 8], strides = [1, 1]} : vector<1x128xf32> to vector<1x8xf32>
    %553 = arith.maximumf %551, %552 : vector<1x8xf32>
    %554 = vector.extract_strided_slice %528 {offsets = [0, 56], sizes = [1, 8], strides = [1, 1]} : vector<1x128xf32> to vector<1x8xf32>
    %555 = arith.maximumf %553, %554 : vector<1x8xf32>
    %c0_282 = arith.constant 0 : index
    %c7_283 = arith.constant 7 : index
    %c3_284 = arith.constant 3 : index
    %c0_285 = arith.constant 0 : index
    %556 = vector.load %arg6[%c0_282, %c7_283, %c3_284, %c0_285] : memref<1x8x8x8xf32, #tpu.memory_space<vmem>>, vector<1x1x1x8xf32>
    %557 = vector.shape_cast %556 : vector<1x1x1x8xf32> to vector<1x8xf32>
    %558 = vector.shape_cast %555 : vector<1x8xf32> to vector<1x1x1x8xf32>
    tpu.vector_store %arg6[%c0_282, %c7_283, %c3_284, %c0_285], %558 {strides = array<i32>} : memref<1x8x8x8xf32, #tpu.memory_space<vmem>>, vector<1x1x1x8xf32>,
    %559 = vector.extract_strided_slice %528 {offsets = [0, 56], sizes = [1, 8], strides = [1, 1]} : vector<1x128xf32> to vector<1x8xf32>
    %560 = vector.extract_strided_slice %528 {offsets = [0, 64], sizes = [1, 8], strides = [1, 1]} : vector<1x128xf32> to vector<1x8xf32>
    %561 = arith.maximumf %559, %560 : vector<1x8xf32>
    %562 = vector.extract_strided_slice %528 {offsets = [0, 72], sizes = [1, 8], strides = [1, 1]} : vector<1x128xf32> to vector<1x8xf32>
    %563 = arith.maximumf %561, %562 : vector<1x8xf32>
    %c0_286 = arith.constant 0 : index
    %c7_287 = arith.constant 7 : index
    %c4_288 = arith.constant 4 : index
    %c0_289 = arith.constant 0 : index
    %564 = vector.load %arg6[%c0_286, %c7_287, %c4_288, %c0_289] : memref<1x8x8x8xf32, #tpu.memory_space<vmem>>, vector<1x1x1x8xf32>
    %565 = vector.shape_cast %564 : vector<1x1x1x8xf32> to vector<1x8xf32>
    %566 = vector.shape_cast %563 : vector<1x8xf32> to vector<1x1x1x8xf32>
    tpu.vector_store %arg6[%c0_286, %c7_287, %c4_288, %c0_289], %566 {strides = array<i32>} : memref<1x8x8x8xf32, #tpu.memory_space<vmem>>, vector<1x1x1x8xf32>,
    %567 = vector.extract_strided_slice %528 {offsets = [0, 72], sizes = [1, 8], strides = [1, 1]} : vector<1x128xf32> to vector<1x8xf32>
    %568 = vector.extract_strided_slice %528 {offsets = [0, 80], sizes = [1, 8], strides = [1, 1]} : vector<1x128xf32> to vector<1x8xf32>
    %569 = arith.maximumf %567, %568 : vector<1x8xf32>
    %570 = vector.extract_strided_slice %528 {offsets = [0, 88], sizes = [1, 8], strides = [1, 1]} : vector<1x128xf32> to vector<1x8xf32>
    %571 = arith.maximumf %569, %570 : vector<1x8xf32>
    %c0_290 = arith.constant 0 : index
    %c7_291 = arith.constant 7 : index
    %c5_292 = arith.constant 5 : index
    %c0_293 = arith.constant 0 : index
    %572 = vector.load %arg6[%c0_290, %c7_291, %c5_292, %c0_293] : memref<1x8x8x8xf32, #tpu.memory_space<vmem>>, vector<1x1x1x8xf32>
    %573 = vector.shape_cast %572 : vector<1x1x1x8xf32> to vector<1x8xf32>
    %574 = vector.shape_cast %571 : vector<1x8xf32> to vector<1x1x1x8xf32>
    tpu.vector_store %arg6[%c0_290, %c7_291, %c5_292, %c0_293], %574 {strides = array<i32>} : memref<1x8x8x8xf32, #tpu.memory_space<vmem>>, vector<1x1x1x8xf32>,
    %575 = vector.extract_strided_slice %528 {offsets = [0, 88], sizes = [1, 8], strides = [1, 1]} : vector<1x128xf32> to vector<1x8xf32>
    %576 = vector.extract_strided_slice %528 {offsets = [0, 96], sizes = [1, 8], strides = [1, 1]} : vector<1x128xf32> to vector<1x8xf32>
    %577 = arith.maximumf %575, %576 : vector<1x8xf32>
    %578 = vector.extract_strided_slice %528 {offsets = [0, 104], sizes = [1, 8], strides = [1, 1]} : vector<1x128xf32> to vector<1x8xf32>
    %579 = arith.maximumf %577, %578 : vector<1x8xf32>
    %c0_294 = arith.constant 0 : index
    %c7_295 = arith.constant 7 : index
    %c6_296 = arith.constant 6 : index
    %c0_297 = arith.constant 0 : index
    %580 = vector.load %arg6[%c0_294, %c7_295, %c6_296, %c0_297] : memref<1x8x8x8xf32, #tpu.memory_space<vmem>>, vector<1x1x1x8xf32>
    %581 = vector.shape_cast %580 : vector<1x1x1x8xf32> to vector<1x8xf32>
    %582 = vector.shape_cast %579 : vector<1x8xf32> to vector<1x1x1x8xf32>
    tpu.vector_store %arg6[%c0_294, %c7_295, %c6_296, %c0_297], %582 {strides = array<i32>} : memref<1x8x8x8xf32, #tpu.memory_space<vmem>>, vector<1x1x1x8xf32>,
    %583 = vector.extract_strided_slice %528 {offsets = [0, 104], sizes = [1, 8], strides = [1, 1]} : vector<1x128xf32> to vector<1x8xf32>
    %584 = vector.extract_strided_slice %528 {offsets = [0, 112], sizes = [1, 8], strides = [1, 1]} : vector<1x128xf32> to vector<1x8xf32>
    %585 = arith.maximumf %583, %584 : vector<1x8xf32>
    %586 = vector.extract_strided_slice %528 {offsets = [0, 120], sizes = [1, 8], strides = [1, 1]} : vector<1x128xf32> to vector<1x8xf32>
    %587 = arith.maximumf %585, %586 : vector<1x8xf32>
    %c0_298 = arith.constant 0 : index
    %c7_299 = arith.constant 7 : index
    %c7_300 = arith.constant 7 : index
    %c0_301 = arith.constant 0 : index
    %588 = vector.load %arg6[%c0_298, %c7_299, %c7_300, %c0_301] : memref<1x8x8x8xf32, #tpu.memory_space<vmem>>, vector<1x1x1x8xf32>
    %589 = vector.shape_cast %588 : vector<1x1x1x8xf32> to vector<1x8xf32>
    %590 = vector.shape_cast %587 : vector<1x8xf32> to vector<1x1x1x8xf32>
    tpu.vector_store %arg6[%c0_298, %c7_299, %c7_300, %c0_301], %590 {strides = array<i32>} : memref<1x8x8x8xf32, #tpu.memory_space<vmem>>, vector<1x1x1x8xf32>,
    return
  }
  func.func @transform_0(%arg0: i32) -> (i32, i32, i32) {
    %c0_i32 = arith.constant 0 : i32
    %c0_i32_0 = arith.constant 0 : i32
    %c0_i32_1 = arith.constant 0 : i32
    return %arg0, %c0_i32, %c0_i32_0 : i32, i32, i32
  }
  func.func @transform_1(%arg0: i32) -> (i32, i32, i32) {
    %c0_i32 = arith.constant 0 : i32
    %c0_i32_0 = arith.constant 0 : i32
    %c0_i32_1 = arith.constant 0 : i32
    %c0_i32_2 = arith.constant 0 : i32
    return %c0_i32, %c0_i32_0, %c0_i32_1 : i32, i32, i32
  }
  func.func @transform_2(%arg0: i32) -> (i32, i32) {
    %c0_i32 = arith.constant 0 : i32
    %c0_i32_0 = arith.constant 0 : i32
    %c0_i32_1 = arith.constant 0 : i32
    return %c0_i32, %c0_i32_0 : i32, i32
  }
  func.func @transform_3(%arg0: i32) -> (i32, i32, i32) {
    %c0_i32 = arith.constant 0 : i32
    %c0_i32_0 = arith.constant 0 : i32
    %c0_i32_1 = arith.constant 0 : i32
    %c0_i32_2 = arith.constant 0 : i32
    return %c0_i32, %c0_i32_0, %c0_i32_1 : i32, i32, i32
  }
  func.func @transform_4(%arg0: i32) -> (i32, i32) {
    %c0_i32 = arith.constant 0 : i32
    %c0_i32_0 = arith.constant 0 : i32
    %c0_i32_1 = arith.constant 0 : i32
    return %c0_i32, %c0_i32_0 : i32, i32
  }
  func.func @transform_5(%arg0: i32) -> (i32, i32, i32, i32) {
    %c0_i32 = arith.constant 0 : i32
    %c0_i32_0 = arith.constant 0 : i32
    %c0_i32_1 = arith.constant 0 : i32
    %c0_i32_2 = arith.constant 0 : i32
    return %arg0, %c0_i32, %c0_i32_0, %c0_i32_1 : i32, i32, i32, i32
  }
}

module attributes {stable_mosaic.version = 11 : i64} {
  func.func @kernel(%arg0: i32, %arg1: memref<1x8x64xf32, #tpu.memory_space<vmem>>, %arg2: memref<3x64x256xf32, #tpu.memory_space<vmem>>, %arg3: memref<1x256xf32, #tpu.memory_space<vmem>>, %arg4: memref<3x128x128xf32, #tpu.memory_space<vmem>>, %arg5: memref<1x128xf32, #tpu.memory_space<vmem>>, %arg6: memref<1x4x4x16xf32, #tpu.memory_space<vmem>>, %arg7: memref<24x64xf32, #tpu.memory_space<vmem>>, %arg8: memref<24x128xf32, #tpu.memory_space<vmem>>) attributes {dimension_semantics = [#tpu.dimension_semantics<parallel>], iteration_bounds = array<i64: 2>, scalar_prefetch = 0 : i64, scratch_operands = 2 : i64, tpu.core_type = #tpu.core_type<tc>, window_params = [{transform_indices = @transform_0, window_bounds = array<i64: 1, 8, 64>}, {pipeline_mode = #tpu.pipeline_mode<synchronous>, transform_indices = @transform_1, window_bounds = array<i64: 3, 64, 256>}, {pipeline_mode = #tpu.pipeline_mode<synchronous>, transform_indices = @transform_2, window_bounds = array<i64: 1, 256>}, {pipeline_mode = #tpu.pipeline_mode<synchronous>, transform_indices = @transform_3, window_bounds = array<i64: 3, 128, 128>}, {pipeline_mode = #tpu.pipeline_mode<synchronous>, transform_indices = @transform_4, window_bounds = array<i64: 1, 128>}, {transform_indices = @transform_5, window_bounds = array<i64: 1, 4, 4, 16>}]} {
    %cst = arith.constant 0.000000e+00 : f32
    %0 = vector.broadcast %cst : f32 to vector<24x64xf32>
    %c0 = arith.constant 0 : index
    %c0_0 = arith.constant 0 : index
    %1 = vector.load %arg7[%c0, %c0_0] : memref<24x64xf32, #tpu.memory_space<vmem>>, vector<24x64xf32>
    tpu.vector_store %arg7[%c0, %c0_0], %0 {strides = array<i32>} : memref<24x64xf32, #tpu.memory_space<vmem>>, vector<24x64xf32>,
    %c0_1 = arith.constant 0 : index
    %c0_2 = arith.constant 0 : index
    %c0_3 = arith.constant 0 : index
    %2 = vector.load %arg1[%c0_1, %c0_2, %c0_3] : memref<1x8x64xf32, #tpu.memory_space<vmem>>, vector<1x8x64xf32>
    %3 = vector.shape_cast %2 : vector<1x8x64xf32> to vector<8x64xf32>
    %c8 = arith.constant 8 : index
    %c0_4 = arith.constant 0 : index
    %4 = vector.load %arg7[%c8, %c0_4] : memref<24x64xf32, #tpu.memory_space<vmem>>, vector<8x64xf32>
    tpu.vector_store %arg7[%c8, %c0_4], %3 {strides = array<i32>} : memref<24x64xf32, #tpu.memory_space<vmem>>, vector<8x64xf32>,
    %cst_5 = arith.constant 0.000000e+00 : f32
    %5 = vector.broadcast %cst_5 : f32 to vector<8x256xf32>
    %c7 = arith.constant 7 : index
    %c0_6 = arith.constant 0 : index
    %6 = vector.load %arg7[%c7, %c0_6] : memref<24x64xf32, #tpu.memory_space<vmem>>, vector<8x64xf32>
    %c0_7 = arith.constant 0 : index
    %c0_8 = arith.constant 0 : index
    %c0_9 = arith.constant 0 : index
    %7 = vector.load %arg2[%c0_7, %c0_8, %c0_9] : memref<3x64x256xf32, #tpu.memory_space<vmem>>, vector<1x64x256xf32>
    %8 = vector.shape_cast %7 : vector<1x64x256xf32> to vector<64x256xf32>
    %cst_10 = arith.constant dense<0.000000e+00> : vector<8x256xf32>
    %9 = tpu.matmul %6, %8, %cst_10 {dimension_numbers = #tpu.dot_dimension_numbers<[1], [0], [0], [1], [0, 0, 1, 1], [], []>} : vector<8x64xf32>, vector<64x256xf32>, vector<8x256xf32> -> vector<8x256xf32>
    %10 = arith.addf %5, %9 : vector<8x256xf32>
    %c8_11 = arith.constant 8 : index
    %c0_12 = arith.constant 0 : index
    %11 = vector.load %arg7[%c8_11, %c0_12] : memref<24x64xf32, #tpu.memory_space<vmem>>, vector<8x64xf32>
    %c1 = arith.constant 1 : index
    %c0_13 = arith.constant 0 : index
    %c0_14 = arith.constant 0 : index
    %12 = vector.load %arg2[%c1, %c0_13, %c0_14] : memref<3x64x256xf32, #tpu.memory_space<vmem>>, vector<1x64x256xf32>
    %13 = vector.shape_cast %12 : vector<1x64x256xf32> to vector<64x256xf32>
    %cst_15 = arith.constant dense<0.000000e+00> : vector<8x256xf32>
    %14 = tpu.matmul %11, %13, %cst_15 {dimension_numbers = #tpu.dot_dimension_numbers<[1], [0], [0], [1], [0, 0, 1, 1], [], []>} : vector<8x64xf32>, vector<64x256xf32>, vector<8x256xf32> -> vector<8x256xf32>
    %15 = arith.addf %10, %14 : vector<8x256xf32>
    %c9 = arith.constant 9 : index
    %c0_16 = arith.constant 0 : index
    %16 = vector.load %arg7[%c9, %c0_16] : memref<24x64xf32, #tpu.memory_space<vmem>>, vector<8x64xf32>
    %c2 = arith.constant 2 : index
    %c0_17 = arith.constant 0 : index
    %c0_18 = arith.constant 0 : index
    %17 = vector.load %arg2[%c2, %c0_17, %c0_18] : memref<3x64x256xf32, #tpu.memory_space<vmem>>, vector<1x64x256xf32>
    %18 = vector.shape_cast %17 : vector<1x64x256xf32> to vector<64x256xf32>
    %cst_19 = arith.constant dense<0.000000e+00> : vector<8x256xf32>
    %19 = tpu.matmul %16, %18, %cst_19 {dimension_numbers = #tpu.dot_dimension_numbers<[1], [0], [0], [1], [0, 0, 1, 1], [], []>} : vector<8x64xf32>, vector<64x256xf32>, vector<8x256xf32> -> vector<8x256xf32>
    %20 = arith.addf %15, %19 : vector<8x256xf32>
    %c0_20 = arith.constant 0 : index
    %c0_21 = arith.constant 0 : index
    %21 = vector.load %arg3[%c0_20, %c0_21] : memref<1x256xf32, #tpu.memory_space<vmem>>, vector<1x256xf32>
    %22 = vector.shape_cast %21 : vector<1x256xf32> to vector<256xf32>
    %23 = vector.shape_cast %22 : vector<256xf32> to vector<1x256xf32>
    %24 = vector.broadcast %23 : vector<1x256xf32> to vector<8x256xf32>
    %25 = arith.addf %20, %24 : vector<8x256xf32>
    %26 = vector.extract_strided_slice %25 {offsets = [0, 0], sizes = [8, 128], strides = [1, 1]} : vector<8x256xf32> to vector<8x128xf32>
    %27 = vector.extract_strided_slice %25 {offsets = [0, 128], sizes = [8, 128], strides = [1, 1]} : vector<8x256xf32> to vector<8x128xf32>
    %cst_22 = arith.constant 0.000000e+00 : f32
    %28 = vector.broadcast %cst_22 : f32 to vector<8x128xf32>
    %29 = arith.maximumf %27, %28 : vector<8x128xf32>
    %cst_23 = arith.constant 0.000000e+00 : f32
    %30 = vector.broadcast %cst_23 : f32 to vector<24x128xf32>
    %c0_24 = arith.constant 0 : index
    %c0_25 = arith.constant 0 : index
    %31 = vector.load %arg8[%c0_24, %c0_25] : memref<24x128xf32, #tpu.memory_space<vmem>>, vector<24x128xf32>
    tpu.vector_store %arg8[%c0_24, %c0_25], %30 {strides = array<i32>} : memref<24x128xf32, #tpu.memory_space<vmem>>, vector<24x128xf32>,
    %c8_26 = arith.constant 8 : index
    %c0_27 = arith.constant 0 : index
    %32 = vector.load %arg8[%c8_26, %c0_27] : memref<24x128xf32, #tpu.memory_space<vmem>>, vector<8x128xf32>
    tpu.vector_store %arg8[%c8_26, %c0_27], %29 {strides = array<i32>} : memref<24x128xf32, #tpu.memory_space<vmem>>, vector<8x128xf32>,
    %cst_28 = arith.constant 0.000000e+00 : f32
    %33 = vector.broadcast %cst_28 : f32 to vector<8x128xf32>
    %c7_29 = arith.constant 7 : index
    %c0_30 = arith.constant 0 : index
    %34 = vector.load %arg8[%c7_29, %c0_30] : memref<24x128xf32, #tpu.memory_space<vmem>>, vector<8x128xf32>
    %c0_31 = arith.constant 0 : index
    %c0_32 = arith.constant 0 : index
    %c0_33 = arith.constant 0 : index
    %35 = vector.load %arg4[%c0_31, %c0_32, %c0_33] : memref<3x128x128xf32, #tpu.memory_space<vmem>>, vector<1x128x128xf32>
    %36 = vector.shape_cast %35 : vector<1x128x128xf32> to vector<128x128xf32>
    %cst_34 = arith.constant dense<0.000000e+00> : vector<8x128xf32>
    %37 = tpu.matmul %34, %36, %cst_34 {dimension_numbers = #tpu.dot_dimension_numbers<[1], [0], [0], [1], [0, 0, 1, 1], [], []>} : vector<8x128xf32>, vector<128x128xf32>, vector<8x128xf32> -> vector<8x128xf32>
    %38 = arith.addf %33, %37 : vector<8x128xf32>
    %c8_35 = arith.constant 8 : index
    %c0_36 = arith.constant 0 : index
    %39 = vector.load %arg8[%c8_35, %c0_36] : memref<24x128xf32, #tpu.memory_space<vmem>>, vector<8x128xf32>
    %c1_37 = arith.constant 1 : index
    %c0_38 = arith.constant 0 : index
    %c0_39 = arith.constant 0 : index
    %40 = vector.load %arg4[%c1_37, %c0_38, %c0_39] : memref<3x128x128xf32, #tpu.memory_space<vmem>>, vector<1x128x128xf32>
    %41 = vector.shape_cast %40 : vector<1x128x128xf32> to vector<128x128xf32>
    %cst_40 = arith.constant dense<0.000000e+00> : vector<8x128xf32>
    %42 = tpu.matmul %39, %41, %cst_40 {dimension_numbers = #tpu.dot_dimension_numbers<[1], [0], [0], [1], [0, 0, 1, 1], [], []>} : vector<8x128xf32>, vector<128x128xf32>, vector<8x128xf32> -> vector<8x128xf32>
    %43 = arith.addf %38, %42 : vector<8x128xf32>
    %c9_41 = arith.constant 9 : index
    %c0_42 = arith.constant 0 : index
    %44 = vector.load %arg8[%c9_41, %c0_42] : memref<24x128xf32, #tpu.memory_space<vmem>>, vector<8x128xf32>
    %c2_43 = arith.constant 2 : index
    %c0_44 = arith.constant 0 : index
    %c0_45 = arith.constant 0 : index
    %45 = vector.load %arg4[%c2_43, %c0_44, %c0_45] : memref<3x128x128xf32, #tpu.memory_space<vmem>>, vector<1x128x128xf32>
    %46 = vector.shape_cast %45 : vector<1x128x128xf32> to vector<128x128xf32>
    %cst_46 = arith.constant dense<0.000000e+00> : vector<8x128xf32>
    %47 = tpu.matmul %44, %46, %cst_46 {dimension_numbers = #tpu.dot_dimension_numbers<[1], [0], [0], [1], [0, 0, 1, 1], [], []>} : vector<8x128xf32>, vector<128x128xf32>, vector<8x128xf32> -> vector<8x128xf32>
    %48 = arith.addf %43, %47 : vector<8x128xf32>
    %c0_47 = arith.constant 0 : index
    %c0_48 = arith.constant 0 : index
    %49 = vector.load %arg5[%c0_47, %c0_48] : memref<1x128xf32, #tpu.memory_space<vmem>>, vector<1x128xf32>
    %50 = vector.shape_cast %49 : vector<1x128xf32> to vector<128xf32>
    %51 = vector.shape_cast %50 : vector<128xf32> to vector<1x128xf32>
    %52 = vector.broadcast %51 : vector<1x128xf32> to vector<8x128xf32>
    %53 = arith.addf %48, %52 : vector<8x128xf32>
    %cst_49 = arith.constant 0.000000e+00 : f32
    %54 = vector.broadcast %cst_49 : f32 to vector<8x128xf32>
    %55 = arith.maximumf %53, %54 : vector<8x128xf32>
    %56 = arith.addf %55, %26 : vector<8x128xf32>
    %57 = vector.extract_strided_slice %56 {offsets = [0, 0], sizes = [1, 128], strides = [1, 1]} : vector<8x128xf32> to vector<1x128xf32>
    %58 = vector.extract_strided_slice %56 {offsets = [1, 0], sizes = [1, 128], strides = [1, 1]} : vector<8x128xf32> to vector<1x128xf32>
    %59 = arith.maximumf %57, %58 : vector<1x128xf32>
    %60 = vector.extract_strided_slice %59 {offsets = [0, 0], sizes = [1, 16], strides = [1, 1]} : vector<1x128xf32> to vector<1x16xf32>
    %61 = vector.extract_strided_slice %59 {offsets = [0, 16], sizes = [1, 16], strides = [1, 1]} : vector<1x128xf32> to vector<1x16xf32>
    %62 = arith.maximumf %60, %61 : vector<1x16xf32>
    %c0_50 = arith.constant 0 : index
    %c0_51 = arith.constant 0 : index
    %c0_52 = arith.constant 0 : index
    %c0_53 = arith.constant 0 : index
    %63 = vector.load %arg6[%c0_50, %c0_51, %c0_52, %c0_53] : memref<1x4x4x16xf32, #tpu.memory_space<vmem>>, vector<1x1x1x16xf32>
    %64 = vector.shape_cast %63 : vector<1x1x1x16xf32> to vector<1x16xf32>
    %65 = vector.shape_cast %62 : vector<1x16xf32> to vector<1x1x1x16xf32>
    tpu.vector_store %arg6[%c0_50, %c0_51, %c0_52, %c0_53], %65 {strides = array<i32>} : memref<1x4x4x16xf32, #tpu.memory_space<vmem>>, vector<1x1x1x16xf32>,
    %66 = vector.extract_strided_slice %59 {offsets = [0, 16], sizes = [1, 16], strides = [1, 1]} : vector<1x128xf32> to vector<1x16xf32>
    %67 = vector.extract_strided_slice %59 {offsets = [0, 32], sizes = [1, 16], strides = [1, 1]} : vector<1x128xf32> to vector<1x16xf32>
    %68 = arith.maximumf %66, %67 : vector<1x16xf32>
    %69 = vector.extract_strided_slice %59 {offsets = [0, 48], sizes = [1, 16], strides = [1, 1]} : vector<1x128xf32> to vector<1x16xf32>
    %70 = arith.maximumf %68, %69 : vector<1x16xf32>
    %c0_54 = arith.constant 0 : index
    %c0_55 = arith.constant 0 : index
    %c1_56 = arith.constant 1 : index
    %c0_57 = arith.constant 0 : index
    %71 = vector.load %arg6[%c0_54, %c0_55, %c1_56, %c0_57] : memref<1x4x4x16xf32, #tpu.memory_space<vmem>>, vector<1x1x1x16xf32>
    %72 = vector.shape_cast %71 : vector<1x1x1x16xf32> to vector<1x16xf32>
    %73 = vector.shape_cast %70 : vector<1x16xf32> to vector<1x1x1x16xf32>
    tpu.vector_store %arg6[%c0_54, %c0_55, %c1_56, %c0_57], %73 {strides = array<i32>} : memref<1x4x4x16xf32, #tpu.memory_space<vmem>>, vector<1x1x1x16xf32>,
    %74 = vector.extract_strided_slice %59 {offsets = [0, 48], sizes = [1, 16], strides = [1, 1]} : vector<1x128xf32> to vector<1x16xf32>
    %75 = vector.extract_strided_slice %59 {offsets = [0, 64], sizes = [1, 16], strides = [1, 1]} : vector<1x128xf32> to vector<1x16xf32>
    %76 = arith.maximumf %74, %75 : vector<1x16xf32>
    %77 = vector.extract_strided_slice %59 {offsets = [0, 80], sizes = [1, 16], strides = [1, 1]} : vector<1x128xf32> to vector<1x16xf32>
    %78 = arith.maximumf %76, %77 : vector<1x16xf32>
    %c0_58 = arith.constant 0 : index
    %c0_59 = arith.constant 0 : index
    %c2_60 = arith.constant 2 : index
    %c0_61 = arith.constant 0 : index
    %79 = vector.load %arg6[%c0_58, %c0_59, %c2_60, %c0_61] : memref<1x4x4x16xf32, #tpu.memory_space<vmem>>, vector<1x1x1x16xf32>
    %80 = vector.shape_cast %79 : vector<1x1x1x16xf32> to vector<1x16xf32>
    %81 = vector.shape_cast %78 : vector<1x16xf32> to vector<1x1x1x16xf32>
    tpu.vector_store %arg6[%c0_58, %c0_59, %c2_60, %c0_61], %81 {strides = array<i32>} : memref<1x4x4x16xf32, #tpu.memory_space<vmem>>, vector<1x1x1x16xf32>,
    %82 = vector.extract_strided_slice %59 {offsets = [0, 80], sizes = [1, 16], strides = [1, 1]} : vector<1x128xf32> to vector<1x16xf32>
    %83 = vector.extract_strided_slice %59 {offsets = [0, 96], sizes = [1, 16], strides = [1, 1]} : vector<1x128xf32> to vector<1x16xf32>
    %84 = arith.maximumf %82, %83 : vector<1x16xf32>
    %85 = vector.extract_strided_slice %59 {offsets = [0, 112], sizes = [1, 16], strides = [1, 1]} : vector<1x128xf32> to vector<1x16xf32>
    %86 = arith.maximumf %84, %85 : vector<1x16xf32>
    %c0_62 = arith.constant 0 : index
    %c0_63 = arith.constant 0 : index
    %c3 = arith.constant 3 : index
    %c0_64 = arith.constant 0 : index
    %87 = vector.load %arg6[%c0_62, %c0_63, %c3, %c0_64] : memref<1x4x4x16xf32, #tpu.memory_space<vmem>>, vector<1x1x1x16xf32>
    %88 = vector.shape_cast %87 : vector<1x1x1x16xf32> to vector<1x16xf32>
    %89 = vector.shape_cast %86 : vector<1x16xf32> to vector<1x1x1x16xf32>
    tpu.vector_store %arg6[%c0_62, %c0_63, %c3, %c0_64], %89 {strides = array<i32>} : memref<1x4x4x16xf32, #tpu.memory_space<vmem>>, vector<1x1x1x16xf32>,
    %90 = vector.extract_strided_slice %56 {offsets = [1, 0], sizes = [1, 128], strides = [1, 1]} : vector<8x128xf32> to vector<1x128xf32>
    %91 = vector.extract_strided_slice %56 {offsets = [2, 0], sizes = [1, 128], strides = [1, 1]} : vector<8x128xf32> to vector<1x128xf32>
    %92 = arith.maximumf %90, %91 : vector<1x128xf32>
    %93 = vector.extract_strided_slice %56 {offsets = [3, 0], sizes = [1, 128], strides = [1, 1]} : vector<8x128xf32> to vector<1x128xf32>
    %94 = arith.maximumf %92, %93 : vector<1x128xf32>
    %95 = vector.extract_strided_slice %94 {offsets = [0, 0], sizes = [1, 16], strides = [1, 1]} : vector<1x128xf32> to vector<1x16xf32>
    %96 = vector.extract_strided_slice %94 {offsets = [0, 16], sizes = [1, 16], strides = [1, 1]} : vector<1x128xf32> to vector<1x16xf32>
    %97 = arith.maximumf %95, %96 : vector<1x16xf32>
    %c0_65 = arith.constant 0 : index
    %c1_66 = arith.constant 1 : index
    %c0_67 = arith.constant 0 : index
    %c0_68 = arith.constant 0 : index
    %98 = vector.load %arg6[%c0_65, %c1_66, %c0_67, %c0_68] : memref<1x4x4x16xf32, #tpu.memory_space<vmem>>, vector<1x1x1x16xf32>
    %99 = vector.shape_cast %98 : vector<1x1x1x16xf32> to vector<1x16xf32>
    %100 = vector.shape_cast %97 : vector<1x16xf32> to vector<1x1x1x16xf32>
    tpu.vector_store %arg6[%c0_65, %c1_66, %c0_67, %c0_68], %100 {strides = array<i32>} : memref<1x4x4x16xf32, #tpu.memory_space<vmem>>, vector<1x1x1x16xf32>,
    %101 = vector.extract_strided_slice %94 {offsets = [0, 16], sizes = [1, 16], strides = [1, 1]} : vector<1x128xf32> to vector<1x16xf32>
    %102 = vector.extract_strided_slice %94 {offsets = [0, 32], sizes = [1, 16], strides = [1, 1]} : vector<1x128xf32> to vector<1x16xf32>
    %103 = arith.maximumf %101, %102 : vector<1x16xf32>
    %104 = vector.extract_strided_slice %94 {offsets = [0, 48], sizes = [1, 16], strides = [1, 1]} : vector<1x128xf32> to vector<1x16xf32>
    %105 = arith.maximumf %103, %104 : vector<1x16xf32>
    %c0_69 = arith.constant 0 : index
    %c1_70 = arith.constant 1 : index
    %c1_71 = arith.constant 1 : index
    %c0_72 = arith.constant 0 : index
    %106 = vector.load %arg6[%c0_69, %c1_70, %c1_71, %c0_72] : memref<1x4x4x16xf32, #tpu.memory_space<vmem>>, vector<1x1x1x16xf32>
    %107 = vector.shape_cast %106 : vector<1x1x1x16xf32> to vector<1x16xf32>
    %108 = vector.shape_cast %105 : vector<1x16xf32> to vector<1x1x1x16xf32>
    tpu.vector_store %arg6[%c0_69, %c1_70, %c1_71, %c0_72], %108 {strides = array<i32>} : memref<1x4x4x16xf32, #tpu.memory_space<vmem>>, vector<1x1x1x16xf32>,
    %109 = vector.extract_strided_slice %94 {offsets = [0, 48], sizes = [1, 16], strides = [1, 1]} : vector<1x128xf32> to vector<1x16xf32>
    %110 = vector.extract_strided_slice %94 {offsets = [0, 64], sizes = [1, 16], strides = [1, 1]} : vector<1x128xf32> to vector<1x16xf32>
    %111 = arith.maximumf %109, %110 : vector<1x16xf32>
    %112 = vector.extract_strided_slice %94 {offsets = [0, 80], sizes = [1, 16], strides = [1, 1]} : vector<1x128xf32> to vector<1x16xf32>
    %113 = arith.maximumf %111, %112 : vector<1x16xf32>
    %c0_73 = arith.constant 0 : index
    %c1_74 = arith.constant 1 : index
    %c2_75 = arith.constant 2 : index
    %c0_76 = arith.constant 0 : index
    %114 = vector.load %arg6[%c0_73, %c1_74, %c2_75, %c0_76] : memref<1x4x4x16xf32, #tpu.memory_space<vmem>>, vector<1x1x1x16xf32>
    %115 = vector.shape_cast %114 : vector<1x1x1x16xf32> to vector<1x16xf32>
    %116 = vector.shape_cast %113 : vector<1x16xf32> to vector<1x1x1x16xf32>
    tpu.vector_store %arg6[%c0_73, %c1_74, %c2_75, %c0_76], %116 {strides = array<i32>} : memref<1x4x4x16xf32, #tpu.memory_space<vmem>>, vector<1x1x1x16xf32>,
    %117 = vector.extract_strided_slice %94 {offsets = [0, 80], sizes = [1, 16], strides = [1, 1]} : vector<1x128xf32> to vector<1x16xf32>
    %118 = vector.extract_strided_slice %94 {offsets = [0, 96], sizes = [1, 16], strides = [1, 1]} : vector<1x128xf32> to vector<1x16xf32>
    %119 = arith.maximumf %117, %118 : vector<1x16xf32>
    %120 = vector.extract_strided_slice %94 {offsets = [0, 112], sizes = [1, 16], strides = [1, 1]} : vector<1x128xf32> to vector<1x16xf32>
    %121 = arith.maximumf %119, %120 : vector<1x16xf32>
    %c0_77 = arith.constant 0 : index
    %c1_78 = arith.constant 1 : index
    %c3_79 = arith.constant 3 : index
    %c0_80 = arith.constant 0 : index
    %122 = vector.load %arg6[%c0_77, %c1_78, %c3_79, %c0_80] : memref<1x4x4x16xf32, #tpu.memory_space<vmem>>, vector<1x1x1x16xf32>
    %123 = vector.shape_cast %122 : vector<1x1x1x16xf32> to vector<1x16xf32>
    %124 = vector.shape_cast %121 : vector<1x16xf32> to vector<1x1x1x16xf32>
    tpu.vector_store %arg6[%c0_77, %c1_78, %c3_79, %c0_80], %124 {strides = array<i32>} : memref<1x4x4x16xf32, #tpu.memory_space<vmem>>, vector<1x1x1x16xf32>,
    %125 = vector.extract_strided_slice %56 {offsets = [3, 0], sizes = [1, 128], strides = [1, 1]} : vector<8x128xf32> to vector<1x128xf32>
    %126 = vector.extract_strided_slice %56 {offsets = [4, 0], sizes = [1, 128], strides = [1, 1]} : vector<8x128xf32> to vector<1x128xf32>
    %127 = arith.maximumf %125, %126 : vector<1x128xf32>
    %128 = vector.extract_strided_slice %56 {offsets = [5, 0], sizes = [1, 128], strides = [1, 1]} : vector<8x128xf32> to vector<1x128xf32>
    %129 = arith.maximumf %127, %128 : vector<1x128xf32>
    %130 = vector.extract_strided_slice %129 {offsets = [0, 0], sizes = [1, 16], strides = [1, 1]} : vector<1x128xf32> to vector<1x16xf32>
    %131 = vector.extract_strided_slice %129 {offsets = [0, 16], sizes = [1, 16], strides = [1, 1]} : vector<1x128xf32> to vector<1x16xf32>
    %132 = arith.maximumf %130, %131 : vector<1x16xf32>
    %c0_81 = arith.constant 0 : index
    %c2_82 = arith.constant 2 : index
    %c0_83 = arith.constant 0 : index
    %c0_84 = arith.constant 0 : index
    %133 = vector.load %arg6[%c0_81, %c2_82, %c0_83, %c0_84] : memref<1x4x4x16xf32, #tpu.memory_space<vmem>>, vector<1x1x1x16xf32>
    %134 = vector.shape_cast %133 : vector<1x1x1x16xf32> to vector<1x16xf32>
    %135 = vector.shape_cast %132 : vector<1x16xf32> to vector<1x1x1x16xf32>
    tpu.vector_store %arg6[%c0_81, %c2_82, %c0_83, %c0_84], %135 {strides = array<i32>} : memref<1x4x4x16xf32, #tpu.memory_space<vmem>>, vector<1x1x1x16xf32>,
    %136 = vector.extract_strided_slice %129 {offsets = [0, 16], sizes = [1, 16], strides = [1, 1]} : vector<1x128xf32> to vector<1x16xf32>
    %137 = vector.extract_strided_slice %129 {offsets = [0, 32], sizes = [1, 16], strides = [1, 1]} : vector<1x128xf32> to vector<1x16xf32>
    %138 = arith.maximumf %136, %137 : vector<1x16xf32>
    %139 = vector.extract_strided_slice %129 {offsets = [0, 48], sizes = [1, 16], strides = [1, 1]} : vector<1x128xf32> to vector<1x16xf32>
    %140 = arith.maximumf %138, %139 : vector<1x16xf32>
    %c0_85 = arith.constant 0 : index
    %c2_86 = arith.constant 2 : index
    %c1_87 = arith.constant 1 : index
    %c0_88 = arith.constant 0 : index
    %141 = vector.load %arg6[%c0_85, %c2_86, %c1_87, %c0_88] : memref<1x4x4x16xf32, #tpu.memory_space<vmem>>, vector<1x1x1x16xf32>
    %142 = vector.shape_cast %141 : vector<1x1x1x16xf32> to vector<1x16xf32>
    %143 = vector.shape_cast %140 : vector<1x16xf32> to vector<1x1x1x16xf32>
    tpu.vector_store %arg6[%c0_85, %c2_86, %c1_87, %c0_88], %143 {strides = array<i32>} : memref<1x4x4x16xf32, #tpu.memory_space<vmem>>, vector<1x1x1x16xf32>,
    %144 = vector.extract_strided_slice %129 {offsets = [0, 48], sizes = [1, 16], strides = [1, 1]} : vector<1x128xf32> to vector<1x16xf32>
    %145 = vector.extract_strided_slice %129 {offsets = [0, 64], sizes = [1, 16], strides = [1, 1]} : vector<1x128xf32> to vector<1x16xf32>
    %146 = arith.maximumf %144, %145 : vector<1x16xf32>
    %147 = vector.extract_strided_slice %129 {offsets = [0, 80], sizes = [1, 16], strides = [1, 1]} : vector<1x128xf32> to vector<1x16xf32>
    %148 = arith.maximumf %146, %147 : vector<1x16xf32>
    %c0_89 = arith.constant 0 : index
    %c2_90 = arith.constant 2 : index
    %c2_91 = arith.constant 2 : index
    %c0_92 = arith.constant 0 : index
    %149 = vector.load %arg6[%c0_89, %c2_90, %c2_91, %c0_92] : memref<1x4x4x16xf32, #tpu.memory_space<vmem>>, vector<1x1x1x16xf32>
    %150 = vector.shape_cast %149 : vector<1x1x1x16xf32> to vector<1x16xf32>
    %151 = vector.shape_cast %148 : vector<1x16xf32> to vector<1x1x1x16xf32>
    tpu.vector_store %arg6[%c0_89, %c2_90, %c2_91, %c0_92], %151 {strides = array<i32>} : memref<1x4x4x16xf32, #tpu.memory_space<vmem>>, vector<1x1x1x16xf32>,
    %152 = vector.extract_strided_slice %129 {offsets = [0, 80], sizes = [1, 16], strides = [1, 1]} : vector<1x128xf32> to vector<1x16xf32>
    %153 = vector.extract_strided_slice %129 {offsets = [0, 96], sizes = [1, 16], strides = [1, 1]} : vector<1x128xf32> to vector<1x16xf32>
    %154 = arith.maximumf %152, %153 : vector<1x16xf32>
    %155 = vector.extract_strided_slice %129 {offsets = [0, 112], sizes = [1, 16], strides = [1, 1]} : vector<1x128xf32> to vector<1x16xf32>
    %156 = arith.maximumf %154, %155 : vector<1x16xf32>
    %c0_93 = arith.constant 0 : index
    %c2_94 = arith.constant 2 : index
    %c3_95 = arith.constant 3 : index
    %c0_96 = arith.constant 0 : index
    %157 = vector.load %arg6[%c0_93, %c2_94, %c3_95, %c0_96] : memref<1x4x4x16xf32, #tpu.memory_space<vmem>>, vector<1x1x1x16xf32>
    %158 = vector.shape_cast %157 : vector<1x1x1x16xf32> to vector<1x16xf32>
    %159 = vector.shape_cast %156 : vector<1x16xf32> to vector<1x1x1x16xf32>
    tpu.vector_store %arg6[%c0_93, %c2_94, %c3_95, %c0_96], %159 {strides = array<i32>} : memref<1x4x4x16xf32, #tpu.memory_space<vmem>>, vector<1x1x1x16xf32>,
    %160 = vector.extract_strided_slice %56 {offsets = [5, 0], sizes = [1, 128], strides = [1, 1]} : vector<8x128xf32> to vector<1x128xf32>
    %161 = vector.extract_strided_slice %56 {offsets = [6, 0], sizes = [1, 128], strides = [1, 1]} : vector<8x128xf32> to vector<1x128xf32>
    %162 = arith.maximumf %160, %161 : vector<1x128xf32>
    %163 = vector.extract_strided_slice %56 {offsets = [7, 0], sizes = [1, 128], strides = [1, 1]} : vector<8x128xf32> to vector<1x128xf32>
    %164 = arith.maximumf %162, %163 : vector<1x128xf32>
    %165 = vector.extract_strided_slice %164 {offsets = [0, 0], sizes = [1, 16], strides = [1, 1]} : vector<1x128xf32> to vector<1x16xf32>
    %166 = vector.extract_strided_slice %164 {offsets = [0, 16], sizes = [1, 16], strides = [1, 1]} : vector<1x128xf32> to vector<1x16xf32>
    %167 = arith.maximumf %165, %166 : vector<1x16xf32>
    %c0_97 = arith.constant 0 : index
    %c3_98 = arith.constant 3 : index
    %c0_99 = arith.constant 0 : index
    %c0_100 = arith.constant 0 : index
    %168 = vector.load %arg6[%c0_97, %c3_98, %c0_99, %c0_100] : memref<1x4x4x16xf32, #tpu.memory_space<vmem>>, vector<1x1x1x16xf32>
    %169 = vector.shape_cast %168 : vector<1x1x1x16xf32> to vector<1x16xf32>
    %170 = vector.shape_cast %167 : vector<1x16xf32> to vector<1x1x1x16xf32>
    tpu.vector_store %arg6[%c0_97, %c3_98, %c0_99, %c0_100], %170 {strides = array<i32>} : memref<1x4x4x16xf32, #tpu.memory_space<vmem>>, vector<1x1x1x16xf32>,
    %171 = vector.extract_strided_slice %164 {offsets = [0, 16], sizes = [1, 16], strides = [1, 1]} : vector<1x128xf32> to vector<1x16xf32>
    %172 = vector.extract_strided_slice %164 {offsets = [0, 32], sizes = [1, 16], strides = [1, 1]} : vector<1x128xf32> to vector<1x16xf32>
    %173 = arith.maximumf %171, %172 : vector<1x16xf32>
    %174 = vector.extract_strided_slice %164 {offsets = [0, 48], sizes = [1, 16], strides = [1, 1]} : vector<1x128xf32> to vector<1x16xf32>
    %175 = arith.maximumf %173, %174 : vector<1x16xf32>
    %c0_101 = arith.constant 0 : index
    %c3_102 = arith.constant 3 : index
    %c1_103 = arith.constant 1 : index
    %c0_104 = arith.constant 0 : index
    %176 = vector.load %arg6[%c0_101, %c3_102, %c1_103, %c0_104] : memref<1x4x4x16xf32, #tpu.memory_space<vmem>>, vector<1x1x1x16xf32>
    %177 = vector.shape_cast %176 : vector<1x1x1x16xf32> to vector<1x16xf32>
    %178 = vector.shape_cast %175 : vector<1x16xf32> to vector<1x1x1x16xf32>
    tpu.vector_store %arg6[%c0_101, %c3_102, %c1_103, %c0_104], %178 {strides = array<i32>} : memref<1x4x4x16xf32, #tpu.memory_space<vmem>>, vector<1x1x1x16xf32>,
    %179 = vector.extract_strided_slice %164 {offsets = [0, 48], sizes = [1, 16], strides = [1, 1]} : vector<1x128xf32> to vector<1x16xf32>
    %180 = vector.extract_strided_slice %164 {offsets = [0, 64], sizes = [1, 16], strides = [1, 1]} : vector<1x128xf32> to vector<1x16xf32>
    %181 = arith.maximumf %179, %180 : vector<1x16xf32>
    %182 = vector.extract_strided_slice %164 {offsets = [0, 80], sizes = [1, 16], strides = [1, 1]} : vector<1x128xf32> to vector<1x16xf32>
    %183 = arith.maximumf %181, %182 : vector<1x16xf32>
    %c0_105 = arith.constant 0 : index
    %c3_106 = arith.constant 3 : index
    %c2_107 = arith.constant 2 : index
    %c0_108 = arith.constant 0 : index
    %184 = vector.load %arg6[%c0_105, %c3_106, %c2_107, %c0_108] : memref<1x4x4x16xf32, #tpu.memory_space<vmem>>, vector<1x1x1x16xf32>
    %185 = vector.shape_cast %184 : vector<1x1x1x16xf32> to vector<1x16xf32>
    %186 = vector.shape_cast %183 : vector<1x16xf32> to vector<1x1x1x16xf32>
    tpu.vector_store %arg6[%c0_105, %c3_106, %c2_107, %c0_108], %186 {strides = array<i32>} : memref<1x4x4x16xf32, #tpu.memory_space<vmem>>, vector<1x1x1x16xf32>,
    %187 = vector.extract_strided_slice %164 {offsets = [0, 80], sizes = [1, 16], strides = [1, 1]} : vector<1x128xf32> to vector<1x16xf32>
    %188 = vector.extract_strided_slice %164 {offsets = [0, 96], sizes = [1, 16], strides = [1, 1]} : vector<1x128xf32> to vector<1x16xf32>
    %189 = arith.maximumf %187, %188 : vector<1x16xf32>
    %190 = vector.extract_strided_slice %164 {offsets = [0, 112], sizes = [1, 16], strides = [1, 1]} : vector<1x128xf32> to vector<1x16xf32>
    %191 = arith.maximumf %189, %190 : vector<1x16xf32>
    %c0_109 = arith.constant 0 : index
    %c3_110 = arith.constant 3 : index
    %c3_111 = arith.constant 3 : index
    %c0_112 = arith.constant 0 : index
    %192 = vector.load %arg6[%c0_109, %c3_110, %c3_111, %c0_112] : memref<1x4x4x16xf32, #tpu.memory_space<vmem>>, vector<1x1x1x16xf32>
    %193 = vector.shape_cast %192 : vector<1x1x1x16xf32> to vector<1x16xf32>
    %194 = vector.shape_cast %191 : vector<1x16xf32> to vector<1x1x1x16xf32>
    tpu.vector_store %arg6[%c0_109, %c3_110, %c3_111, %c0_112], %194 {strides = array<i32>} : memref<1x4x4x16xf32, #tpu.memory_space<vmem>>, vector<1x1x1x16xf32>,
    return
  }
  func.func @transform_0(%arg0: i32) -> (i32, i32, i32) {
    %c0_i32 = arith.constant 0 : i32
    %c0_i32_0 = arith.constant 0 : i32
    %c0_i32_1 = arith.constant 0 : i32
    return %arg0, %c0_i32, %c0_i32_0 : i32, i32, i32
  }
  func.func @transform_1(%arg0: i32) -> (i32, i32, i32) {
    %c0_i32 = arith.constant 0 : i32
    %c0_i32_0 = arith.constant 0 : i32
    %c0_i32_1 = arith.constant 0 : i32
    %c0_i32_2 = arith.constant 0 : i32
    return %c0_i32, %c0_i32_0, %c0_i32_1 : i32, i32, i32
  }
  func.func @transform_2(%arg0: i32) -> (i32, i32) {
    %c0_i32 = arith.constant 0 : i32
    %c0_i32_0 = arith.constant 0 : i32
    %c0_i32_1 = arith.constant 0 : i32
    return %c0_i32, %c0_i32_0 : i32, i32
  }
  func.func @transform_3(%arg0: i32) -> (i32, i32, i32) {
    %c0_i32 = arith.constant 0 : i32
    %c0_i32_0 = arith.constant 0 : i32
    %c0_i32_1 = arith.constant 0 : i32
    %c0_i32_2 = arith.constant 0 : i32
    return %c0_i32, %c0_i32_0, %c0_i32_1 : i32, i32, i32
  }
  func.func @transform_4(%arg0: i32) -> (i32, i32) {
    %c0_i32 = arith.constant 0 : i32
    %c0_i32_0 = arith.constant 0 : i32
    %c0_i32_1 = arith.constant 0 : i32
    return %c0_i32, %c0_i32_0 : i32, i32
  }
  func.func @transform_5(%arg0: i32) -> (i32, i32, i32, i32) {
    %c0_i32 = arith.constant 0 : i32
    %c0_i32_0 = arith.constant 0 : i32
    %c0_i32_1 = arith.constant 0 : i32
    %c0_i32_2 = arith.constant 0 : i32
    return %arg0, %c0_i32, %c0_i32_0, %c0_i32_1 : i32, i32, i32, i32
  }
}

module attributes {stable_mosaic.version = 11 : i64} {
  func.func @kernel(%arg0: i32, %arg1: memref<1x4x64xf32, #tpu.memory_space<vmem>>, %arg2: memref<3x64x256xf32, #tpu.memory_space<vmem>>, %arg3: memref<1x256xf32, #tpu.memory_space<vmem>>, %arg4: memref<3x128x128xf32, #tpu.memory_space<vmem>>, %arg5: memref<1x128xf32, #tpu.memory_space<vmem>>, %arg6: memref<1x2x2x32xf32, #tpu.memory_space<vmem>>, %arg7: memref<20x64xf32, #tpu.memory_space<vmem>>, %arg8: memref<20x128xf32, #tpu.memory_space<vmem>>) attributes {dimension_semantics = [#tpu.dimension_semantics<parallel>], iteration_bounds = array<i64: 2>, scalar_prefetch = 0 : i64, scratch_operands = 2 : i64, tpu.core_type = #tpu.core_type<tc>, window_params = [{transform_indices = @transform_0, window_bounds = array<i64: 1, 4, 64>}, {pipeline_mode = #tpu.pipeline_mode<synchronous>, transform_indices = @transform_1, window_bounds = array<i64: 3, 64, 256>}, {pipeline_mode = #tpu.pipeline_mode<synchronous>, transform_indices = @transform_2, window_bounds = array<i64: 1, 256>}, {pipeline_mode = #tpu.pipeline_mode<synchronous>, transform_indices = @transform_3, window_bounds = array<i64: 3, 128, 128>}, {pipeline_mode = #tpu.pipeline_mode<synchronous>, transform_indices = @transform_4, window_bounds = array<i64: 1, 128>}, {transform_indices = @transform_5, window_bounds = array<i64: 1, 2, 2, 32>}]} {
    %cst = arith.constant 0.000000e+00 : f32
    %0 = vector.broadcast %cst : f32 to vector<20x64xf32>
    %c0 = arith.constant 0 : index
    %c0_0 = arith.constant 0 : index
    %1 = vector.load %arg7[%c0, %c0_0] : memref<20x64xf32, #tpu.memory_space<vmem>>, vector<20x64xf32>
    tpu.vector_store %arg7[%c0, %c0_0], %0 {strides = array<i32>} : memref<20x64xf32, #tpu.memory_space<vmem>>, vector<20x64xf32>,
    %c0_1 = arith.constant 0 : index
    %c0_2 = arith.constant 0 : index
    %c0_3 = arith.constant 0 : index
    %2 = vector.load %arg1[%c0_1, %c0_2, %c0_3] : memref<1x4x64xf32, #tpu.memory_space<vmem>>, vector<1x4x64xf32>
    %3 = vector.shape_cast %2 : vector<1x4x64xf32> to vector<4x64xf32>
    %c8 = arith.constant 8 : index
    %c0_4 = arith.constant 0 : index
    %4 = vector.load %arg7[%c8, %c0_4] : memref<20x64xf32, #tpu.memory_space<vmem>>, vector<4x64xf32>
    tpu.vector_store %arg7[%c8, %c0_4], %3 {strides = array<i32>} : memref<20x64xf32, #tpu.memory_space<vmem>>, vector<4x64xf32>,
    %cst_5 = arith.constant 0.000000e+00 : f32
    %5 = vector.broadcast %cst_5 : f32 to vector<4x256xf32>
    %c7 = arith.constant 7 : index
    %c0_6 = arith.constant 0 : index
    %6 = vector.load %arg7[%c7, %c0_6] : memref<20x64xf32, #tpu.memory_space<vmem>>, vector<4x64xf32>
    %c0_7 = arith.constant 0 : index
    %c0_8 = arith.constant 0 : index
    %c0_9 = arith.constant 0 : index
    %7 = vector.load %arg2[%c0_7, %c0_8, %c0_9] : memref<3x64x256xf32, #tpu.memory_space<vmem>>, vector<1x64x256xf32>
    %8 = vector.shape_cast %7 : vector<1x64x256xf32> to vector<64x256xf32>
    %cst_10 = arith.constant dense<0.000000e+00> : vector<4x256xf32>
    %9 = tpu.matmul %6, %8, %cst_10 {dimension_numbers = #tpu.dot_dimension_numbers<[1], [0], [0], [1], [0, 0, 1, 1], [], []>} : vector<4x64xf32>, vector<64x256xf32>, vector<4x256xf32> -> vector<4x256xf32>
    %10 = arith.addf %5, %9 : vector<4x256xf32>
    %c8_11 = arith.constant 8 : index
    %c0_12 = arith.constant 0 : index
    %11 = vector.load %arg7[%c8_11, %c0_12] : memref<20x64xf32, #tpu.memory_space<vmem>>, vector<4x64xf32>
    %c1 = arith.constant 1 : index
    %c0_13 = arith.constant 0 : index
    %c0_14 = arith.constant 0 : index
    %12 = vector.load %arg2[%c1, %c0_13, %c0_14] : memref<3x64x256xf32, #tpu.memory_space<vmem>>, vector<1x64x256xf32>
    %13 = vector.shape_cast %12 : vector<1x64x256xf32> to vector<64x256xf32>
    %cst_15 = arith.constant dense<0.000000e+00> : vector<4x256xf32>
    %14 = tpu.matmul %11, %13, %cst_15 {dimension_numbers = #tpu.dot_dimension_numbers<[1], [0], [0], [1], [0, 0, 1, 1], [], []>} : vector<4x64xf32>, vector<64x256xf32>, vector<4x256xf32> -> vector<4x256xf32>
    %15 = arith.addf %10, %14 : vector<4x256xf32>
    %c9 = arith.constant 9 : index
    %c0_16 = arith.constant 0 : index
    %16 = vector.load %arg7[%c9, %c0_16] : memref<20x64xf32, #tpu.memory_space<vmem>>, vector<4x64xf32>
    %c2 = arith.constant 2 : index
    %c0_17 = arith.constant 0 : index
    %c0_18 = arith.constant 0 : index
    %17 = vector.load %arg2[%c2, %c0_17, %c0_18] : memref<3x64x256xf32, #tpu.memory_space<vmem>>, vector<1x64x256xf32>
    %18 = vector.shape_cast %17 : vector<1x64x256xf32> to vector<64x256xf32>
    %cst_19 = arith.constant dense<0.000000e+00> : vector<4x256xf32>
    %19 = tpu.matmul %16, %18, %cst_19 {dimension_numbers = #tpu.dot_dimension_numbers<[1], [0], [0], [1], [0, 0, 1, 1], [], []>} : vector<4x64xf32>, vector<64x256xf32>, vector<4x256xf32> -> vector<4x256xf32>
    %20 = arith.addf %15, %19 : vector<4x256xf32>
    %c0_20 = arith.constant 0 : index
    %c0_21 = arith.constant 0 : index
    %21 = vector.load %arg3[%c0_20, %c0_21] : memref<1x256xf32, #tpu.memory_space<vmem>>, vector<1x256xf32>
    %22 = vector.shape_cast %21 : vector<1x256xf32> to vector<256xf32>
    %23 = vector.shape_cast %22 : vector<256xf32> to vector<1x256xf32>
    %24 = vector.broadcast %23 : vector<1x256xf32> to vector<4x256xf32>
    %25 = arith.addf %20, %24 : vector<4x256xf32>
    %26 = vector.extract_strided_slice %25 {offsets = [0, 0], sizes = [4, 128], strides = [1, 1]} : vector<4x256xf32> to vector<4x128xf32>
    %27 = vector.extract_strided_slice %25 {offsets = [0, 128], sizes = [4, 128], strides = [1, 1]} : vector<4x256xf32> to vector<4x128xf32>
    %cst_22 = arith.constant 0.000000e+00 : f32
    %28 = vector.broadcast %cst_22 : f32 to vector<4x128xf32>
    %29 = arith.maximumf %27, %28 : vector<4x128xf32>
    %cst_23 = arith.constant 0.000000e+00 : f32
    %30 = vector.broadcast %cst_23 : f32 to vector<20x128xf32>
    %c0_24 = arith.constant 0 : index
    %c0_25 = arith.constant 0 : index
    %31 = vector.load %arg8[%c0_24, %c0_25] : memref<20x128xf32, #tpu.memory_space<vmem>>, vector<20x128xf32>
    tpu.vector_store %arg8[%c0_24, %c0_25], %30 {strides = array<i32>} : memref<20x128xf32, #tpu.memory_space<vmem>>, vector<20x128xf32>,
    %c8_26 = arith.constant 8 : index
    %c0_27 = arith.constant 0 : index
    %32 = vector.load %arg8[%c8_26, %c0_27] : memref<20x128xf32, #tpu.memory_space<vmem>>, vector<4x128xf32>
    tpu.vector_store %arg8[%c8_26, %c0_27], %29 {strides = array<i32>} : memref<20x128xf32, #tpu.memory_space<vmem>>, vector<4x128xf32>,
    %cst_28 = arith.constant 0.000000e+00 : f32
    %33 = vector.broadcast %cst_28 : f32 to vector<4x128xf32>
    %c7_29 = arith.constant 7 : index
    %c0_30 = arith.constant 0 : index
    %34 = vector.load %arg8[%c7_29, %c0_30] : memref<20x128xf32, #tpu.memory_space<vmem>>, vector<4x128xf32>
    %c0_31 = arith.constant 0 : index
    %c0_32 = arith.constant 0 : index
    %c0_33 = arith.constant 0 : index
    %35 = vector.load %arg4[%c0_31, %c0_32, %c0_33] : memref<3x128x128xf32, #tpu.memory_space<vmem>>, vector<1x128x128xf32>
    %36 = vector.shape_cast %35 : vector<1x128x128xf32> to vector<128x128xf32>
    %cst_34 = arith.constant dense<0.000000e+00> : vector<4x128xf32>
    %37 = tpu.matmul %34, %36, %cst_34 {dimension_numbers = #tpu.dot_dimension_numbers<[1], [0], [0], [1], [0, 0, 1, 1], [], []>} : vector<4x128xf32>, vector<128x128xf32>, vector<4x128xf32> -> vector<4x128xf32>
    %38 = arith.addf %33, %37 : vector<4x128xf32>
    %c8_35 = arith.constant 8 : index
    %c0_36 = arith.constant 0 : index
    %39 = vector.load %arg8[%c8_35, %c0_36] : memref<20x128xf32, #tpu.memory_space<vmem>>, vector<4x128xf32>
    %c1_37 = arith.constant 1 : index
    %c0_38 = arith.constant 0 : index
    %c0_39 = arith.constant 0 : index
    %40 = vector.load %arg4[%c1_37, %c0_38, %c0_39] : memref<3x128x128xf32, #tpu.memory_space<vmem>>, vector<1x128x128xf32>
    %41 = vector.shape_cast %40 : vector<1x128x128xf32> to vector<128x128xf32>
    %cst_40 = arith.constant dense<0.000000e+00> : vector<4x128xf32>
    %42 = tpu.matmul %39, %41, %cst_40 {dimension_numbers = #tpu.dot_dimension_numbers<[1], [0], [0], [1], [0, 0, 1, 1], [], []>} : vector<4x128xf32>, vector<128x128xf32>, vector<4x128xf32> -> vector<4x128xf32>
    %43 = arith.addf %38, %42 : vector<4x128xf32>
    %c9_41 = arith.constant 9 : index
    %c0_42 = arith.constant 0 : index
    %44 = vector.load %arg8[%c9_41, %c0_42] : memref<20x128xf32, #tpu.memory_space<vmem>>, vector<4x128xf32>
    %c2_43 = arith.constant 2 : index
    %c0_44 = arith.constant 0 : index
    %c0_45 = arith.constant 0 : index
    %45 = vector.load %arg4[%c2_43, %c0_44, %c0_45] : memref<3x128x128xf32, #tpu.memory_space<vmem>>, vector<1x128x128xf32>
    %46 = vector.shape_cast %45 : vector<1x128x128xf32> to vector<128x128xf32>
    %cst_46 = arith.constant dense<0.000000e+00> : vector<4x128xf32>
    %47 = tpu.matmul %44, %46, %cst_46 {dimension_numbers = #tpu.dot_dimension_numbers<[1], [0], [0], [1], [0, 0, 1, 1], [], []>} : vector<4x128xf32>, vector<128x128xf32>, vector<4x128xf32> -> vector<4x128xf32>
    %48 = arith.addf %43, %47 : vector<4x128xf32>
    %c0_47 = arith.constant 0 : index
    %c0_48 = arith.constant 0 : index
    %49 = vector.load %arg5[%c0_47, %c0_48] : memref<1x128xf32, #tpu.memory_space<vmem>>, vector<1x128xf32>
    %50 = vector.shape_cast %49 : vector<1x128xf32> to vector<128xf32>
    %51 = vector.shape_cast %50 : vector<128xf32> to vector<1x128xf32>
    %52 = vector.broadcast %51 : vector<1x128xf32> to vector<4x128xf32>
    %53 = arith.addf %48, %52 : vector<4x128xf32>
    %cst_49 = arith.constant 0.000000e+00 : f32
    %54 = vector.broadcast %cst_49 : f32 to vector<4x128xf32>
    %55 = arith.maximumf %53, %54 : vector<4x128xf32>
    %56 = arith.addf %55, %26 : vector<4x128xf32>
    %57 = vector.extract_strided_slice %56 {offsets = [0, 0], sizes = [1, 128], strides = [1, 1]} : vector<4x128xf32> to vector<1x128xf32>
    %58 = vector.extract_strided_slice %56 {offsets = [1, 0], sizes = [1, 128], strides = [1, 1]} : vector<4x128xf32> to vector<1x128xf32>
    %59 = arith.maximumf %57, %58 : vector<1x128xf32>
    %60 = vector.extract_strided_slice %59 {offsets = [0, 0], sizes = [1, 32], strides = [1, 1]} : vector<1x128xf32> to vector<1x32xf32>
    %61 = vector.extract_strided_slice %59 {offsets = [0, 32], sizes = [1, 32], strides = [1, 1]} : vector<1x128xf32> to vector<1x32xf32>
    %62 = arith.maximumf %60, %61 : vector<1x32xf32>
    %c0_50 = arith.constant 0 : index
    %c0_51 = arith.constant 0 : index
    %c0_52 = arith.constant 0 : index
    %c0_53 = arith.constant 0 : index
    %63 = vector.load %arg6[%c0_50, %c0_51, %c0_52, %c0_53] : memref<1x2x2x32xf32, #tpu.memory_space<vmem>>, vector<1x1x1x32xf32>
    %64 = vector.shape_cast %63 : vector<1x1x1x32xf32> to vector<1x32xf32>
    %65 = vector.shape_cast %62 : vector<1x32xf32> to vector<1x1x1x32xf32>
    tpu.vector_store %arg6[%c0_50, %c0_51, %c0_52, %c0_53], %65 {strides = array<i32>} : memref<1x2x2x32xf32, #tpu.memory_space<vmem>>, vector<1x1x1x32xf32>,
    %66 = vector.extract_strided_slice %59 {offsets = [0, 32], sizes = [1, 32], strides = [1, 1]} : vector<1x128xf32> to vector<1x32xf32>
    %67 = vector.extract_strided_slice %59 {offsets = [0, 64], sizes = [1, 32], strides = [1, 1]} : vector<1x128xf32> to vector<1x32xf32>
    %68 = arith.maximumf %66, %67 : vector<1x32xf32>
    %69 = vector.extract_strided_slice %59 {offsets = [0, 96], sizes = [1, 32], strides = [1, 1]} : vector<1x128xf32> to vector<1x32xf32>
    %70 = arith.maximumf %68, %69 : vector<1x32xf32>
    %c0_54 = arith.constant 0 : index
    %c0_55 = arith.constant 0 : index
    %c1_56 = arith.constant 1 : index
    %c0_57 = arith.constant 0 : index
    %71 = vector.load %arg6[%c0_54, %c0_55, %c1_56, %c0_57] : memref<1x2x2x32xf32, #tpu.memory_space<vmem>>, vector<1x1x1x32xf32>
    %72 = vector.shape_cast %71 : vector<1x1x1x32xf32> to vector<1x32xf32>
    %73 = vector.shape_cast %70 : vector<1x32xf32> to vector<1x1x1x32xf32>
    tpu.vector_store %arg6[%c0_54, %c0_55, %c1_56, %c0_57], %73 {strides = array<i32>} : memref<1x2x2x32xf32, #tpu.memory_space<vmem>>, vector<1x1x1x32xf32>,
    %74 = vector.extract_strided_slice %56 {offsets = [1, 0], sizes = [1, 128], strides = [1, 1]} : vector<4x128xf32> to vector<1x128xf32>
    %75 = vector.extract_strided_slice %56 {offsets = [2, 0], sizes = [1, 128], strides = [1, 1]} : vector<4x128xf32> to vector<1x128xf32>
    %76 = arith.maximumf %74, %75 : vector<1x128xf32>
    %77 = vector.extract_strided_slice %56 {offsets = [3, 0], sizes = [1, 128], strides = [1, 1]} : vector<4x128xf32> to vector<1x128xf32>
    %78 = arith.maximumf %76, %77 : vector<1x128xf32>
    %79 = vector.extract_strided_slice %78 {offsets = [0, 0], sizes = [1, 32], strides = [1, 1]} : vector<1x128xf32> to vector<1x32xf32>
    %80 = vector.extract_strided_slice %78 {offsets = [0, 32], sizes = [1, 32], strides = [1, 1]} : vector<1x128xf32> to vector<1x32xf32>
    %81 = arith.maximumf %79, %80 : vector<1x32xf32>
    %c0_58 = arith.constant 0 : index
    %c1_59 = arith.constant 1 : index
    %c0_60 = arith.constant 0 : index
    %c0_61 = arith.constant 0 : index
    %82 = vector.load %arg6[%c0_58, %c1_59, %c0_60, %c0_61] : memref<1x2x2x32xf32, #tpu.memory_space<vmem>>, vector<1x1x1x32xf32>
    %83 = vector.shape_cast %82 : vector<1x1x1x32xf32> to vector<1x32xf32>
    %84 = vector.shape_cast %81 : vector<1x32xf32> to vector<1x1x1x32xf32>
    tpu.vector_store %arg6[%c0_58, %c1_59, %c0_60, %c0_61], %84 {strides = array<i32>} : memref<1x2x2x32xf32, #tpu.memory_space<vmem>>, vector<1x1x1x32xf32>,
    %85 = vector.extract_strided_slice %78 {offsets = [0, 32], sizes = [1, 32], strides = [1, 1]} : vector<1x128xf32> to vector<1x32xf32>
    %86 = vector.extract_strided_slice %78 {offsets = [0, 64], sizes = [1, 32], strides = [1, 1]} : vector<1x128xf32> to vector<1x32xf32>
    %87 = arith.maximumf %85, %86 : vector<1x32xf32>
    %88 = vector.extract_strided_slice %78 {offsets = [0, 96], sizes = [1, 32], strides = [1, 1]} : vector<1x128xf32> to vector<1x32xf32>
    %89 = arith.maximumf %87, %88 : vector<1x32xf32>
    %c0_62 = arith.constant 0 : index
    %c1_63 = arith.constant 1 : index
    %c1_64 = arith.constant 1 : index
    %c0_65 = arith.constant 0 : index
    %90 = vector.load %arg6[%c0_62, %c1_63, %c1_64, %c0_65] : memref<1x2x2x32xf32, #tpu.memory_space<vmem>>, vector<1x1x1x32xf32>
    %91 = vector.shape_cast %90 : vector<1x1x1x32xf32> to vector<1x32xf32>
    %92 = vector.shape_cast %89 : vector<1x32xf32> to vector<1x1x1x32xf32>
    tpu.vector_store %arg6[%c0_62, %c1_63, %c1_64, %c0_65], %92 {strides = array<i32>} : memref<1x2x2x32xf32, #tpu.memory_space<vmem>>, vector<1x1x1x32xf32>,
    return
  }
  func.func @transform_0(%arg0: i32) -> (i32, i32, i32) {
    %c0_i32 = arith.constant 0 : i32
    %c0_i32_0 = arith.constant 0 : i32
    %c0_i32_1 = arith.constant 0 : i32
    return %arg0, %c0_i32, %c0_i32_0 : i32, i32, i32
  }
  func.func @transform_1(%arg0: i32) -> (i32, i32, i32) {
    %c0_i32 = arith.constant 0 : i32
    %c0_i32_0 = arith.constant 0 : i32
    %c0_i32_1 = arith.constant 0 : i32
    %c0_i32_2 = arith.constant 0 : i32
    return %c0_i32, %c0_i32_0, %c0_i32_1 : i32, i32, i32
  }
  func.func @transform_2(%arg0: i32) -> (i32, i32) {
    %c0_i32 = arith.constant 0 : i32
    %c0_i32_0 = arith.constant 0 : i32
    %c0_i32_1 = arith.constant 0 : i32
    return %c0_i32, %c0_i32_0 : i32, i32
  }
  func.func @transform_3(%arg0: i32) -> (i32, i32, i32) {
    %c0_i32 = arith.constant 0 : i32
    %c0_i32_0 = arith.constant 0 : i32
    %c0_i32_1 = arith.constant 0 : i32
    %c0_i32_2 = arith.constant 0 : i32
    return %c0_i32, %c0_i32_0, %c0_i32_1 : i32, i32, i32
  }
  func.func @transform_4(%arg0: i32) -> (i32, i32) {
    %c0_i32 = arith.constant 0 : i32
    %c0_i32_0 = arith.constant 0 : i32
    %c0_i32_1 = arith.constant 0 : i32
    return %c0_i32, %c0_i32_0 : i32, i32
  }
  func.func @transform_5(%arg0: i32) -> (i32, i32, i32, i32) {
    %c0_i32 = arith.constant 0 : i32
    %c0_i32_0 = arith.constant 0 : i32
    %c0_i32_1 = arith.constant 0 : i32
    %c0_i32_2 = arith.constant 0 : i32
    return %arg0, %c0_i32, %c0_i32_0, %c0_i32_1 : i32, i32, i32, i32
  }
}

module attributes {stable_mosaic.version = 11 : i64} {
  func.func @kernel(%arg0: i32, %arg1: memref<1x2x64xf32, #tpu.memory_space<vmem>>, %arg2: memref<3x64x256xf32, #tpu.memory_space<vmem>>, %arg3: memref<1x256xf32, #tpu.memory_space<vmem>>, %arg4: memref<3x128x128xf32, #tpu.memory_space<vmem>>, %arg5: memref<1x128xf32, #tpu.memory_space<vmem>>, %arg6: memref<1x1x1x64xf32, #tpu.memory_space<vmem>>, %arg7: memref<18x64xf32, #tpu.memory_space<vmem>>, %arg8: memref<18x128xf32, #tpu.memory_space<vmem>>) attributes {dimension_semantics = [#tpu.dimension_semantics<parallel>], iteration_bounds = array<i64: 2>, scalar_prefetch = 0 : i64, scratch_operands = 2 : i64, tpu.core_type = #tpu.core_type<tc>, window_params = [{transform_indices = @transform_0, window_bounds = array<i64: 1, 2, 64>}, {pipeline_mode = #tpu.pipeline_mode<synchronous>, transform_indices = @transform_1, window_bounds = array<i64: 3, 64, 256>}, {pipeline_mode = #tpu.pipeline_mode<synchronous>, transform_indices = @transform_2, window_bounds = array<i64: 1, 256>}, {pipeline_mode = #tpu.pipeline_mode<synchronous>, transform_indices = @transform_3, window_bounds = array<i64: 3, 128, 128>}, {pipeline_mode = #tpu.pipeline_mode<synchronous>, transform_indices = @transform_4, window_bounds = array<i64: 1, 128>}, {transform_indices = @transform_5, window_bounds = array<i64: 1, 1, 1, 64>}]} {
    %cst = arith.constant 0.000000e+00 : f32
    %0 = vector.broadcast %cst : f32 to vector<18x64xf32>
    %c0 = arith.constant 0 : index
    %c0_0 = arith.constant 0 : index
    %1 = vector.load %arg7[%c0, %c0_0] : memref<18x64xf32, #tpu.memory_space<vmem>>, vector<18x64xf32>
    tpu.vector_store %arg7[%c0, %c0_0], %0 {strides = array<i32>} : memref<18x64xf32, #tpu.memory_space<vmem>>, vector<18x64xf32>,
    %c0_1 = arith.constant 0 : index
    %c0_2 = arith.constant 0 : index
    %c0_3 = arith.constant 0 : index
    %2 = vector.load %arg1[%c0_1, %c0_2, %c0_3] : memref<1x2x64xf32, #tpu.memory_space<vmem>>, vector<1x2x64xf32>
    %3 = vector.shape_cast %2 : vector<1x2x64xf32> to vector<2x64xf32>
    %c8 = arith.constant 8 : index
    %c0_4 = arith.constant 0 : index
    %4 = vector.load %arg7[%c8, %c0_4] : memref<18x64xf32, #tpu.memory_space<vmem>>, vector<2x64xf32>
    tpu.vector_store %arg7[%c8, %c0_4], %3 {strides = array<i32>} : memref<18x64xf32, #tpu.memory_space<vmem>>, vector<2x64xf32>,
    %cst_5 = arith.constant 0.000000e+00 : f32
    %5 = vector.broadcast %cst_5 : f32 to vector<2x256xf32>
    %c7 = arith.constant 7 : index
    %c0_6 = arith.constant 0 : index
    %6 = vector.load %arg7[%c7, %c0_6] : memref<18x64xf32, #tpu.memory_space<vmem>>, vector<2x64xf32>
    %c0_7 = arith.constant 0 : index
    %c0_8 = arith.constant 0 : index
    %c0_9 = arith.constant 0 : index
    %7 = vector.load %arg2[%c0_7, %c0_8, %c0_9] : memref<3x64x256xf32, #tpu.memory_space<vmem>>, vector<1x64x256xf32>
    %8 = vector.shape_cast %7 : vector<1x64x256xf32> to vector<64x256xf32>
    %cst_10 = arith.constant dense<0.000000e+00> : vector<2x256xf32>
    %9 = tpu.matmul %6, %8, %cst_10 {dimension_numbers = #tpu.dot_dimension_numbers<[1], [0], [0], [1], [0, 0, 1, 1], [], []>} : vector<2x64xf32>, vector<64x256xf32>, vector<2x256xf32> -> vector<2x256xf32>
    %10 = arith.addf %5, %9 : vector<2x256xf32>
    %c8_11 = arith.constant 8 : index
    %c0_12 = arith.constant 0 : index
    %11 = vector.load %arg7[%c8_11, %c0_12] : memref<18x64xf32, #tpu.memory_space<vmem>>, vector<2x64xf32>
    %c1 = arith.constant 1 : index
    %c0_13 = arith.constant 0 : index
    %c0_14 = arith.constant 0 : index
    %12 = vector.load %arg2[%c1, %c0_13, %c0_14] : memref<3x64x256xf32, #tpu.memory_space<vmem>>, vector<1x64x256xf32>
    %13 = vector.shape_cast %12 : vector<1x64x256xf32> to vector<64x256xf32>
    %cst_15 = arith.constant dense<0.000000e+00> : vector<2x256xf32>
    %14 = tpu.matmul %11, %13, %cst_15 {dimension_numbers = #tpu.dot_dimension_numbers<[1], [0], [0], [1], [0, 0, 1, 1], [], []>} : vector<2x64xf32>, vector<64x256xf32>, vector<2x256xf32> -> vector<2x256xf32>
    %15 = arith.addf %10, %14 : vector<2x256xf32>
    %c9 = arith.constant 9 : index
    %c0_16 = arith.constant 0 : index
    %16 = vector.load %arg7[%c9, %c0_16] : memref<18x64xf32, #tpu.memory_space<vmem>>, vector<2x64xf32>
    %c2 = arith.constant 2 : index
    %c0_17 = arith.constant 0 : index
    %c0_18 = arith.constant 0 : index
    %17 = vector.load %arg2[%c2, %c0_17, %c0_18] : memref<3x64x256xf32, #tpu.memory_space<vmem>>, vector<1x64x256xf32>
    %18 = vector.shape_cast %17 : vector<1x64x256xf32> to vector<64x256xf32>
    %cst_19 = arith.constant dense<0.000000e+00> : vector<2x256xf32>
    %19 = tpu.matmul %16, %18, %cst_19 {dimension_numbers = #tpu.dot_dimension_numbers<[1], [0], [0], [1], [0, 0, 1, 1], [], []>} : vector<2x64xf32>, vector<64x256xf32>, vector<2x256xf32> -> vector<2x256xf32>
    %20 = arith.addf %15, %19 : vector<2x256xf32>
    %c0_20 = arith.constant 0 : index
    %c0_21 = arith.constant 0 : index
    %21 = vector.load %arg3[%c0_20, %c0_21] : memref<1x256xf32, #tpu.memory_space<vmem>>, vector<1x256xf32>
    %22 = vector.shape_cast %21 : vector<1x256xf32> to vector<256xf32>
    %23 = vector.shape_cast %22 : vector<256xf32> to vector<1x256xf32>
    %24 = vector.broadcast %23 : vector<1x256xf32> to vector<2x256xf32>
    %25 = arith.addf %20, %24 : vector<2x256xf32>
    %26 = vector.extract_strided_slice %25 {offsets = [0, 0], sizes = [2, 128], strides = [1, 1]} : vector<2x256xf32> to vector<2x128xf32>
    %27 = vector.extract_strided_slice %25 {offsets = [0, 128], sizes = [2, 128], strides = [1, 1]} : vector<2x256xf32> to vector<2x128xf32>
    %cst_22 = arith.constant 0.000000e+00 : f32
    %28 = vector.broadcast %cst_22 : f32 to vector<2x128xf32>
    %29 = arith.maximumf %27, %28 : vector<2x128xf32>
    %cst_23 = arith.constant 0.000000e+00 : f32
    %30 = vector.broadcast %cst_23 : f32 to vector<18x128xf32>
    %c0_24 = arith.constant 0 : index
    %c0_25 = arith.constant 0 : index
    %31 = vector.load %arg8[%c0_24, %c0_25] : memref<18x128xf32, #tpu.memory_space<vmem>>, vector<18x128xf32>
    tpu.vector_store %arg8[%c0_24, %c0_25], %30 {strides = array<i32>} : memref<18x128xf32, #tpu.memory_space<vmem>>, vector<18x128xf32>,
    %c8_26 = arith.constant 8 : index
    %c0_27 = arith.constant 0 : index
    %32 = vector.load %arg8[%c8_26, %c0_27] : memref<18x128xf32, #tpu.memory_space<vmem>>, vector<2x128xf32>
    tpu.vector_store %arg8[%c8_26, %c0_27], %29 {strides = array<i32>} : memref<18x128xf32, #tpu.memory_space<vmem>>, vector<2x128xf32>,
    %cst_28 = arith.constant 0.000000e+00 : f32
    %33 = vector.broadcast %cst_28 : f32 to vector<2x128xf32>
    %c7_29 = arith.constant 7 : index
    %c0_30 = arith.constant 0 : index
    %34 = vector.load %arg8[%c7_29, %c0_30] : memref<18x128xf32, #tpu.memory_space<vmem>>, vector<2x128xf32>
    %c0_31 = arith.constant 0 : index
    %c0_32 = arith.constant 0 : index
    %c0_33 = arith.constant 0 : index
    %35 = vector.load %arg4[%c0_31, %c0_32, %c0_33] : memref<3x128x128xf32, #tpu.memory_space<vmem>>, vector<1x128x128xf32>
    %36 = vector.shape_cast %35 : vector<1x128x128xf32> to vector<128x128xf32>
    %cst_34 = arith.constant dense<0.000000e+00> : vector<2x128xf32>
    %37 = tpu.matmul %34, %36, %cst_34 {dimension_numbers = #tpu.dot_dimension_numbers<[1], [0], [0], [1], [0, 0, 1, 1], [], []>} : vector<2x128xf32>, vector<128x128xf32>, vector<2x128xf32> -> vector<2x128xf32>
    %38 = arith.addf %33, %37 : vector<2x128xf32>
    %c8_35 = arith.constant 8 : index
    %c0_36 = arith.constant 0 : index
    %39 = vector.load %arg8[%c8_35, %c0_36] : memref<18x128xf32, #tpu.memory_space<vmem>>, vector<2x128xf32>
    %c1_37 = arith.constant 1 : index
    %c0_38 = arith.constant 0 : index
    %c0_39 = arith.constant 0 : index
    %40 = vector.load %arg4[%c1_37, %c0_38, %c0_39] : memref<3x128x128xf32, #tpu.memory_space<vmem>>, vector<1x128x128xf32>
    %41 = vector.shape_cast %40 : vector<1x128x128xf32> to vector<128x128xf32>
    %cst_40 = arith.constant dense<0.000000e+00> : vector<2x128xf32>
    %42 = tpu.matmul %39, %41, %cst_40 {dimension_numbers = #tpu.dot_dimension_numbers<[1], [0], [0], [1], [0, 0, 1, 1], [], []>} : vector<2x128xf32>, vector<128x128xf32>, vector<2x128xf32> -> vector<2x128xf32>
    %43 = arith.addf %38, %42 : vector<2x128xf32>
    %c9_41 = arith.constant 9 : index
    %c0_42 = arith.constant 0 : index
    %44 = vector.load %arg8[%c9_41, %c0_42] : memref<18x128xf32, #tpu.memory_space<vmem>>, vector<2x128xf32>
    %c2_43 = arith.constant 2 : index
    %c0_44 = arith.constant 0 : index
    %c0_45 = arith.constant 0 : index
    %45 = vector.load %arg4[%c2_43, %c0_44, %c0_45] : memref<3x128x128xf32, #tpu.memory_space<vmem>>, vector<1x128x128xf32>
    %46 = vector.shape_cast %45 : vector<1x128x128xf32> to vector<128x128xf32>
    %cst_46 = arith.constant dense<0.000000e+00> : vector<2x128xf32>
    %47 = tpu.matmul %44, %46, %cst_46 {dimension_numbers = #tpu.dot_dimension_numbers<[1], [0], [0], [1], [0, 0, 1, 1], [], []>} : vector<2x128xf32>, vector<128x128xf32>, vector<2x128xf32> -> vector<2x128xf32>
    %48 = arith.addf %43, %47 : vector<2x128xf32>
    %c0_47 = arith.constant 0 : index
    %c0_48 = arith.constant 0 : index
    %49 = vector.load %arg5[%c0_47, %c0_48] : memref<1x128xf32, #tpu.memory_space<vmem>>, vector<1x128xf32>
    %50 = vector.shape_cast %49 : vector<1x128xf32> to vector<128xf32>
    %51 = vector.shape_cast %50 : vector<128xf32> to vector<1x128xf32>
    %52 = vector.broadcast %51 : vector<1x128xf32> to vector<2x128xf32>
    %53 = arith.addf %48, %52 : vector<2x128xf32>
    %cst_49 = arith.constant 0.000000e+00 : f32
    %54 = vector.broadcast %cst_49 : f32 to vector<2x128xf32>
    %55 = arith.maximumf %53, %54 : vector<2x128xf32>
    %56 = arith.addf %55, %26 : vector<2x128xf32>
    %57 = vector.extract_strided_slice %56 {offsets = [0, 0], sizes = [1, 128], strides = [1, 1]} : vector<2x128xf32> to vector<1x128xf32>
    %58 = vector.extract_strided_slice %56 {offsets = [1, 0], sizes = [1, 128], strides = [1, 1]} : vector<2x128xf32> to vector<1x128xf32>
    %59 = arith.maximumf %57, %58 : vector<1x128xf32>
    %60 = vector.extract_strided_slice %59 {offsets = [0, 0], sizes = [1, 64], strides = [1, 1]} : vector<1x128xf32> to vector<1x64xf32>
    %61 = vector.extract_strided_slice %59 {offsets = [0, 64], sizes = [1, 64], strides = [1, 1]} : vector<1x128xf32> to vector<1x64xf32>
    %62 = arith.maximumf %60, %61 : vector<1x64xf32>
    %c0_50 = arith.constant 0 : index
    %c0_51 = arith.constant 0 : index
    %c0_52 = arith.constant 0 : index
    %c0_53 = arith.constant 0 : index
    %63 = vector.load %arg6[%c0_50, %c0_51, %c0_52, %c0_53] : memref<1x1x1x64xf32, #tpu.memory_space<vmem>>, vector<1x1x1x64xf32>
    %64 = vector.shape_cast %63 : vector<1x1x1x64xf32> to vector<1x64xf32>
    %65 = vector.shape_cast %62 : vector<1x64xf32> to vector<1x1x1x64xf32>
    tpu.vector_store %arg6[%c0_50, %c0_51, %c0_52, %c0_53], %65 {strides = array<i32>} : memref<1x1x1x64xf32, #tpu.memory_space<vmem>>, vector<1x1x1x64xf32>,
    return
  }
  func.func @transform_0(%arg0: i32) -> (i32, i32, i32) {
    %c0_i32 = arith.constant 0 : i32
    %c0_i32_0 = arith.constant 0 : i32
    %c0_i32_1 = arith.constant 0 : i32
    return %arg0, %c0_i32, %c0_i32_0 : i32, i32, i32
  }
  func.func @transform_1(%arg0: i32) -> (i32, i32, i32) {
    %c0_i32 = arith.constant 0 : i32
    %c0_i32_0 = arith.constant 0 : i32
    %c0_i32_1 = arith.constant 0 : i32
    %c0_i32_2 = arith.constant 0 : i32
    return %c0_i32, %c0_i32_0, %c0_i32_1 : i32, i32, i32
  }
  func.func @transform_2(%arg0: i32) -> (i32, i32) {
    %c0_i32 = arith.constant 0 : i32
    %c0_i32_0 = arith.constant 0 : i32
    %c0_i32_1 = arith.constant 0 : i32
    return %c0_i32, %c0_i32_0 : i32, i32
  }
  func.func @transform_3(%arg0: i32) -> (i32, i32, i32) {
    %c0_i32 = arith.constant 0 : i32
    %c0_i32_0 = arith.constant 0 : i32
    %c0_i32_1 = arith.constant 0 : i32
    %c0_i32_2 = arith.constant 0 : i32
    return %c0_i32, %c0_i32_0, %c0_i32_1 : i32, i32, i32
  }
  func.func @transform_4(%arg0: i32) -> (i32, i32) {
    %c0_i32 = arith.constant 0 : i32
    %c0_i32_0 = arith.constant 0 : i32
    %c0_i32_1 = arith.constant 0 : i32
    return %c0_i32, %c0_i32_0 : i32, i32
  }
  func.func @transform_5(%arg0: i32) -> (i32, i32, i32, i32) {
    %c0_i32 = arith.constant 0 : i32
    %c0_i32_0 = arith.constant 0 : i32
    %c0_i32_1 = arith.constant 0 : i32
    %c0_i32_2 = arith.constant 0 : i32
    return %arg0, %c0_i32, %c0_i32_0, %c0_i32_1 : i32, i32, i32, i32
  }
}

</mosaic_0001>

<bundles_post_ra>
// kernel: tile.68
= control target key start
LH: loop header
LB: loop body
LE: loop exit
PB: predicated region body
PF: predicated region fallthrough
CT: control target
= control target key end

     0   :  { %s28_s0 = inlined_call_operand.vmem [shape: f32[8], index: 0, kind: input, shape index: {}]   ;;  %s29_s1 = inlined_call_operand.vmem [shape: f32[16,8], index: 1, kind: output, shape index: {}]  }
   0x1   :  { %v4_v0 = vld [vmem:[%s28_s0] ss:$0 sm:$0xff] }
   0x2   :  { %5 = vst [vmem:[%s29_s1] sm:$0xff] %v4_v0 }
   0x3   :  { %8 = vst [vmem:[%s29_s1 + $0x8] sm:$0xff] %v4_v0 }

// kernel: tile.69
= control target key start
LH: loop header
LB: loop body
LE: loop exit
PB: predicated region body
PF: predicated region fallthrough
CT: control target
= control target key end

     0   :  { %s131_s10 = smov 120   ;;  %s132_s11 = smov 104   ;;  %vm3_vm0 = vcmask 64512   ;;  %vm9_vm1 = vcmask 1048512   ;;  %vm15_vm2 = vcmask 982912   ;;  %vm21_vm3 = vcmask 917312   ;;  %s207_s0 = inlined_call_operand.vmem [shape: f32[16,8], index: 0, kind: input, shape index: {}]   ;;  %s208_s1 = inlined_call_operand.vmem [shape: f32[128], index: 1, kind: output, shape index: {}]  }
   0x1   :  { %v101_v0 = vld [vmem:[%s207_s0 + $0xf] sm:$0x1]   ;;  %v103_v1 = vld [vmem:[%s207_s0 + $0xd] sm:$0x1]   ;;  %v105_v2 = vld [vmem:[%s207_s0 + $0xb] sm:$0x1]  }
   0x2   :  { %7 = vrot.lane.b32.xlu0 %v101_v0, %s131_s10  ;;  %19 = vrot.lane.b32.xlu1 %v103_v1, %s132_s11  ;;  %s133_s14 = smov 88   ;;  %v102_v3 = vld [vmem:[%s207_s0 + $0xe] sm:$0x1]   ;;  %v104_v4 = vld [vmem:[%s207_s0 + $0xc] sm:$0x1]   ;;  %s134_s19 = smov 112  }
   0x3   :  { %31 = vrot.lane.b32.xlu2 %v105_v2, %s133_s14  ;;  %s135_s20 = smov 96   ;;  %v106_v5 = vld [vmem:[%s207_s0 + $0xa] sm:$0x1]   ;;  %s136_s23 = smov 80   ;;  %v107_v6 = vld [vmem:[%s207_s0 + $0x9] sm:$0x1]  }
   0x4   :  { %v108_v7 = vld [vmem:[%s207_s0 + $0x8] sm:$0x1]   ;;  %s137_s28 = smov 72   ;;  %s138_s29 = smov 64   ;;  %v109_v8 = vld [vmem:[%s207_s0 + $0x7] sm:$0x1]  }
   0x5   :  { %s139_s3 = smov 56   ;;  %v110_v9 = vld [vmem:[%s207_s0 + $0x6] sm:$0x1]   ;;  %v111_v10 = vld [vmem:[%s207_s0 + $0x5] sm:$0x1]   ;;  %s140_s8 = smov 48  }
   0x6   :  { %s141_s9 = smov 40   ;;  %v112_v11 = vld [vmem:[%s207_s0 + $0x4] sm:$0x1]   ;;  %s142_s12 = smov 32   ;;  %v113_v12 = vld [vmem:[%s207_s0 + $0x3] sm:$0x1]  }
   0x7   :  { %v114_v13 = vld [vmem:[%s207_s0 + $0x2] sm:$0x1]   ;;  %s143_s17 = smov 24   ;;  %s144_s18 = smov 16   ;;  %v115_v14 = vld [vmem:[%s207_s0 + $0x1] sm:$0x1]  }
   0x8   :  { %s145_s21 = smov 8   ;;  %v2_v15 = vld [vmem:[%s207_s0] sm:$0x1]   ;;  %vm27_vm4 = vcmask 851712   ;;  %vm33_vm5 = vcmask 786112   ;;  %vm39_vm6 = vcmask 720512  }
   0x9   :  { %4 = vst.msk [vmem:[#allocation0] sm:$0x1] %vm3_vm0, %v2_v15   ;;  %vm45_vm7 = vcmask 654912   ;;  %vm51_vm8 = vcmask 589312   ;;  %vm57_vm9 = vcmask 523712   ;;  %vm63_vm10 = vcmask 458112  }
   0xa   :  { %13 = vrot.lane.b32.xlu0 %v102_v3, %s134_s19  ;;  %25 = vrot.lane.b32.xlu1 %v104_v4, %s135_s20  ;;  %vm69_vm11 = vcmask 392512   ;;  %vm75_vm12 = vcmask 326912   ;;  %vm81_vm13 = vcmask 261312   ;;  %vm87_vm14 = vcmask 195712  }
   0xb   :  { %37 = vrot.lane.b32.xlu2 %v106_v5, %s136_s23  ;;  %vm93_vm15 = vcmask 130112  }
  0x12   :  { %43 = vrot.lane.b32.xlu0 %v107_v6, %s137_s28  ;;  %49 = vrot.lane.b32.xlu1 %v108_v7, %s138_s29 }
  0x13   :  { %55 = vrot.lane.b32.xlu2 %v109_v8, %s139_s3 }
  0x1a   :  { %61 = vrot.lane.b32.xlu0 %v110_v9, %s140_s8  ;;  %67 = vrot.lane.b32.xlu1 %v111_v10, %s141_s9 }
  0x1b   :  { %73 = vrot.lane.b32.xlu2 %v112_v11, %s142_s12 }
  0x22   :  { %79 = vrot.lane.b32.xlu0 %v113_v12, %s143_s17  ;;  %85 = vrot.lane.b32.xlu1 %v114_v13, %s144_s18 }
  0x23   :  { %91 = vrot.lane.b32.xlu2 %v115_v14, %s145_s21 }
  0x5d   :  { %v32_v16 = vpop.permute.xlu2 %31  }
  0x65   :  { %v38_v17 = vpop.permute.xlu2 %37  }
  0x6d   :  { %v56_v18 = vpop.permute.xlu2 %55  }
  0x74   :  { %v8_v19 = vpop.permute.xlu0 %7   ;;  %v20_v20 = vpop.permute.xlu1 %19  }
  0x75   :  { %10 = vst.msk [vmem:[#allocation0] sm:$0x1] %vm9_vm1, %v8_v19   ;;  %v74_v21 = vpop.permute.xlu2 %73  }
  0x7c   :  { %v14_v22 = vpop.permute.xlu0 %13   ;;  %v26_v23 = vpop.permute.xlu1 %25  }
  0x7d   :  { %16 = vst.msk [vmem:[#allocation0] sm:$0x1] %vm15_vm2, %v14_v22   ;;  %v92_v24 = vpop.permute.xlu2 %91  }
  0x7e   :  { %22 = vst.msk [vmem:[#allocation0] sm:$0x1] %vm21_vm3, %v20_v20  }
  0x7f   :  { %28 = vst.msk [vmem:[#allocation0] sm:$0x1] %vm27_vm4, %v26_v23  }
  0x80   :  { %34 = vst.msk [vmem:[#allocation0] sm:$0x1] %vm33_vm5, %v32_v16  }
  0x81   :  { %40 = vst.msk [vmem:[#allocation0] sm:$0x1] %vm39_vm6, %v38_v17  }
  0x84   :  { %v44_v25 = vpop.permute.xlu0 %43   ;;  %v50_v26 = vpop.permute.xlu1 %49  }
  0x85   :  { %46 = vst.msk [vmem:[#allocation0] sm:$0x1] %vm45_vm7, %v44_v25  }
  0x86   :  { %52 = vst.msk [vmem:[#allocation0] sm:$0x1] %vm51_vm8, %v50_v26  }
  0x87   :  { %58 = vst.msk [vmem:[#allocation0] sm:$0x1] %vm57_vm9, %v56_v18  }
  0x8c   :  { %v62_v27 = vpop.permute.xlu0 %61   ;;  %v68_v28 = vpop.permute.xlu1 %67  }
  0x8d   :  { %64 = vst.msk [vmem:[#allocation0] sm:$0x1] %vm63_vm10, %v62_v27  }
  0x8e   :  { %70 = vst.msk [vmem:[#allocation0] sm:$0x1] %vm69_vm11, %v68_v28  }
  0x8f   :  { %76 = vst.msk [vmem:[#allocation0] sm:$0x1] %vm75_vm12, %v74_v21  }
  0x94   :  { %v80_v29 = vpop.permute.xlu0 %79   ;;  %v86_v30 = vpop.permute.xlu1 %85  }
  0x95   :  { %82 = vst.msk [vmem:[#allocation0] sm:$0x1] %vm81_vm13, %v80_v29  }
  0x96   :  { %88 = vst.msk [vmem:[#allocation0] sm:$0x1] %vm87_vm14, %v86_v30  }
  0x97   :  { %94 = vst.msk [vmem:[#allocation0] sm:$0x1] %vm93_vm15, %v92_v24  }
  0x9e   :  { %v97_v31 = vld [vmem:[#allocation0] sm:$0x1] }
  0x9f   :  { %100 = vst [vmem:[%s208_s1] sm:$0x1] %v97_v31 }

// kernel: tile.74
= control target key start
LH: loop header
LB: loop body
LE: loop exit
PB: predicated region body
PF: predicated region fallthrough
CT: control target
= control target key end

     0   :  { %s131_s10 = smov 120   ;;  %s132_s11 = smov 104   ;;  %vm3_vm0 = vcmask 64512   ;;  %vm9_vm1 = vcmask 1048512   ;;  %vm15_vm2 = vcmask 982912   ;;  %vm21_vm3 = vcmask 917312   ;;  %s207_s0 = inlined_call_operand.vmem [shape: f32[16,8], index: 0, kind: input, shape index: {}]   ;;  %s208_s1 = inlined_call_operand.vmem [shape: f32[1,128], index: 1, kind: output, shape index: {}]  }
   0x1   :  { %v101_v0 = vld [vmem:[%s207_s0 + $0xf] sm:$0x1]   ;;  %v103_v1 = vld [vmem:[%s207_s0 + $0xd] sm:$0x1]   ;;  %v105_v2 = vld [vmem:[%s207_s0 + $0xb] sm:$0x1]  }
   0x2   :  { %7 = vrot.lane.b32.xlu0 %v101_v0, %s131_s10  ;;  %19 = vrot.lane.b32.xlu1 %v103_v1, %s132_s11  ;;  %s133_s14 = smov 88   ;;  %v102_v3 = vld [vmem:[%s207_s0 + $0xe] sm:$0x1]   ;;  %v104_v4 = vld [vmem:[%s207_s0 + $0xc] sm:$0x1]   ;;  %s134_s19 = smov 112  }
   0x3   :  { %31 = vrot.lane.b32.xlu2 %v105_v2, %s133_s14  ;;  %s135_s20 = smov 96   ;;  %v106_v5 = vld [vmem:[%s207_s0 + $0xa] sm:$0x1]   ;;  %s136_s23 = smov 80   ;;  %v107_v6 = vld [vmem:[%s207_s0 + $0x9] sm:$0x1]  }
   0x4   :  { %v108_v7 = vld [vmem:[%s207_s0 + $0x8] sm:$0x1]   ;;  %s137_s28 = smov 72   ;;  %s138_s29 = smov 64   ;;  %v109_v8 = vld [vmem:[%s207_s0 + $0x7] sm:$0x1]  }
   0x5   :  { %s139_s3 = smov 56   ;;  %v110_v9 = vld [vmem:[%s207_s0 + $0x6] sm:$0x1]   ;;  %v111_v10 = vld [vmem:[%s207_s0 + $0x5] sm:$0x1]   ;;  %s140_s8 = smov 48  }
   0x6   :  { %s141_s9 = smov 40   ;;  %v112_v11 = vld [vmem:[%s207_s0 + $0x4] sm:$0x1]   ;;  %s142_s12 = smov 32   ;;  %v113_v12 = vld [vmem:[%s207_s0 + $0x3] sm:$0x1]  }
   0x7   :  { %v114_v13 = vld [vmem:[%s207_s0 + $0x2] sm:$0x1]   ;;  %s143_s17 = smov 24   ;;  %s144_s18 = smov 16   ;;  %v115_v14 = vld [vmem:[%s207_s0 + $0x1] sm:$0x1]  }
   0x8   :  { %s145_s21 = smov 8   ;;  %v2_v15 = vld [vmem:[%s207_s0] sm:$0x1]   ;;  %vm27_vm4 = vcmask 851712   ;;  %vm33_vm5 = vcmask 786112   ;;  %vm39_vm6 = vcmask 720512  }
   0x9   :  { %4 = vst.msk [vmem:[#allocation0] sm:$0x1] %vm3_vm0, %v2_v15   ;;  %vm45_vm7 = vcmask 654912   ;;  %vm51_vm8 = vcmask 589312   ;;  %vm57_vm9 = vcmask 523712   ;;  %vm63_vm10 = vcmask 458112  }
   0xa   :  { %13 = vrot.lane.b32.xlu0 %v102_v3, %s134_s19  ;;  %25 = vrot.lane.b32.xlu1 %v104_v4, %s135_s20  ;;  %vm69_vm11 = vcmask 392512   ;;  %vm75_vm12 = vcmask 326912   ;;  %vm81_vm13 = vcmask 261312   ;;  %vm87_vm14 = vcmask 195712  }
   0xb   :  { %37 = vrot.lane.b32.xlu2 %v106_v5, %s136_s23  ;;  %vm93_vm15 = vcmask 130112  }
  0x12   :  { %43 = vrot.lane.b32.xlu0 %v107_v6, %s137_s28  ;;  %49 = vrot.lane.b32.xlu1 %v108_v7, %s138_s29 }
  0x13   :  { %55 = vrot.lane.b32.xlu2 %v109_v8, %s139_s3 }
  0x1a   :  { %61 = vrot.lane.b32.xlu0 %v110_v9, %s140_s8  ;;  %67 = vrot.lane.b32.xlu1 %v111_v10, %s141_s9 }
  0x1b   :  { %73 = vrot.lane.b32.xlu2 %v112_v11, %s142_s12 }
  0x22   :  { %79 = vrot.lane.b32.xlu0 %v113_v12, %s143_s17  ;;  %85 = vrot.lane.b32.xlu1 %v114_v13, %s144_s18 }
  0x23   :  { %91 = vrot.lane.b32.xlu2 %v115_v14, %s145_s21 }
  0x5d   :  { %v32_v16 = vpop.permute.xlu2 %31  }
  0x65   :  { %v38_v17 = vpop.permute.xlu2 %37  }
  0x6d   :  { %v56_v18 = vpop.permute.xlu2 %55  }
  0x74   :  { %v8_v19 = vpop.permute.xlu0 %7   ;;  %v20_v20 = vpop.permute.xlu1 %19  }
  0x75   :  { %10 = vst.msk [vmem:[#allocation0] sm:$0x1] %vm9_vm1, %v8_v19   ;;  %v74_v21 = vpop.permute.xlu2 %73  }
  0x7c   :  { %v14_v22 = vpop.permute.xlu0 %13   ;;  %v26_v23 = vpop.permute.xlu1 %25  }
  0x7d   :  { %16 = vst.msk [vmem:[#allocation0] sm:$0x1] %vm15_vm2, %v14_v22   ;;  %v92_v24 = vpop.permute.xlu2 %91  }
  0x7e   :  { %22 = vst.msk [vmem:[#allocation0] sm:$0x1] %vm21_vm3, %v20_v20  }
  0x7f   :  { %28 = vst.msk [vmem:[#allocation0] sm:$0x1] %vm27_vm4, %v26_v23  }
  0x80   :  { %34 = vst.msk [vmem:[#allocation0] sm:$0x1] %vm33_vm5, %v32_v16  }
  0x81   :  { %40 = vst.msk [vmem:[#allocation0] sm:$0x1] %vm39_vm6, %v38_v17  }
  0x84   :  { %v44_v25 = vpop.permute.xlu0 %43   ;;  %v50_v26 = vpop.permute.xlu1 %49  }
  0x85   :  { %46 = vst.msk [vmem:[#allocation0] sm:$0x1] %vm45_vm7, %v44_v25  }
  0x86   :  { %52 = vst.msk [vmem:[#allocation0] sm:$0x1] %vm51_vm8, %v50_v26  }
  0x87   :  { %58 = vst.msk [vmem:[#allocation0] sm:$0x1] %vm57_vm9, %v56_v18  }
  0x8c   :  { %v62_v27 = vpop.permute.xlu0 %61   ;;  %v68_v28 = vpop.permute.xlu1 %67  }
  0x8d   :  { %64 = vst.msk [vmem:[#allocation0] sm:$0x1] %vm63_vm10, %v62_v27  }
  0x8e   :  { %70 = vst.msk [vmem:[#allocation0] sm:$0x1] %vm69_vm11, %v68_v28  }
  0x8f   :  { %76 = vst.msk [vmem:[#allocation0] sm:$0x1] %vm75_vm12, %v74_v21  }
  0x94   :  { %v80_v29 = vpop.permute.xlu0 %79   ;;  %v86_v30 = vpop.permute.xlu1 %85  }
  0x95   :  { %82 = vst.msk [vmem:[#allocation0] sm:$0x1] %vm81_vm13, %v80_v29  }
  0x96   :  { %88 = vst.msk [vmem:[#allocation0] sm:$0x1] %vm87_vm14, %v86_v30  }
  0x97   :  { %94 = vst.msk [vmem:[#allocation0] sm:$0x1] %vm93_vm15, %v92_v24  }
  0x9e   :  { %v97_v31 = vld [vmem:[#allocation0] sm:$0x1] }
  0x9f   :  { %100 = vst [vmem:[%s208_s1] sm:$0x1] %v97_v31 }

// kernel: pyramid_feature.4
= control target key start
LH: loop header
LB: loop body
LE: loop exit
PB: predicated region body
PF: predicated region fallthrough
CT: control target
= control target key end

     0   :  { %s1066_s18 = smov 0   ;;  %s1517_s0 = inlined_call_operand.vmem [shape: f32[2,16,48], index: 0, kind: input, shape index: {}]   ;;  %s1518_s1 = inlined_call_operand.vmem [shape: f32[3,48,256], index: 1, kind: input, shape index: {}]   ;;  %s1519_s2 = inlined_call_operand.vmem [shape: f32[1,256], index: 2, kind: input, shape index: {}]   ;;  %s1520_s3 = inlined_call_operand.vmem [shape: f32[3,128,128], index: 3, kind: input, shape index: {}]   ;;  %s1521_s4 = inlined_call_operand.vmem [shape: f32[1,128], index: 4, kind: input, shape index: {}]   ;;  %s1522_s5 = inlined_call_operand.vmem [shape: f32[2,8,8,8], index: 5, kind: output, shape index: {}]  }
   0x1 LB: > { %s864_s19 = sadd.s32 4294967295, %s1025_s18   ;;  %p868_p0 = scmp.ge.s32.totalorder %s1025_s18, 1  ;;  %s1025_s18 = sphi %s1066_s18, %s15_s18  }
   0x2   : > { %p187_p1 = scmp.lt.s32.totalorder %s1025_s18, 3 }
   0x4   : > { %p188_p2 = pnand %p868_p0, %p187_p1 }
   0x5   : > { %p215_p3 = scmp.lt.s32.totalorder (!%p188_p2), %s864_s19, 1  ;;  %s1028_s10 = smov (!%p188_p2), 120  }
   0x6   : > { %191 = sbr.rel (%p188_p2) target bundleno = 661 (0x295), region = 40  ;;  %s1029_s11 = smov (!%p188_p2), 112  }
   0x7   : > { %s1031_s16 = smov (!%p188_p2), 56   ;;  %s1033_s20 = smov (!%p188_p2), 104  }
   0x8   : > { %s1034_s21 = smov (!%p188_p2), 24   ;;  %s1035_s23 = smov (!%p188_p2), 40  }
   0xb   : > { %v883_v0 = vld [vmem:[%s1518_s1 + $0xb0] sm:$0xff]  ;;  %v881_v2 = vld [vmem:[%s1518_s1 + $0xa0] sm:$0xff]  ;;  %vm225_vm0 = vcmask 392192   ;;  %v1027_v4 = vmov 0.0   ;;  %s1524_s19 = smov (!%p215_p3, %s864_s19), 1  ;;  %v247_v10 = vld [vmem:[%s1518_s1 + $0x58] sm:$0xff] }
   0xc   : > { %v246_v1 = vld [vmem:[%s1518_s1 + $0x50] sm:$0xff]  ;;  %279 = vmatpush.msra.mxu1 %v883_v0  ;;  %v244_v3 = vld [vmem:[%s1518_s1 + $0x40] sm:$0xff]  ;;  %227 = vst.msk [vmem:[#allocation2 + $0x8] sm:$0xff] %vm225_vm0, %v1027_v4  ;;  %s999_s17 = sshll.u32 %s1524_s19, 4  ;;  %v245_v12 = vld [vmem:[%s1518_s1 + $0x48] sm:$0xff]  ;;  %354 = vmatpush.msra.mxu3 %v247_v10  ;;  %s1000_s12 = sshll.u32 %s1524_s19, 6 }
   0xd   : > { %331 = vmatpush.msra.mxu2 %v246_v1  ;;  %v879_v5 = vld [vmem:[%s1518_s1 + $0x90] sm:$0xff]  ;;  %226 = vst.msk [vmem:[#allocation2] sm:$0xff] %vm225_vm0, %v1027_v4  ;;  %v877_v7 = vld [vmem:[%s1518_s1 + $0x80] sm:$0xff]  ;;  %s219_s22 = scalar_lea.vmem %s1517_s0, %s999_s17  ;;  %v243_v17 = vld [vmem:[%s1518_s1 + $0x38] sm:$0xff]  ;;  %s1368_s15 = scalar_lea.vmem %s1522_s5, %s1000_s12  ;;  %vm646_vm1 = vcmask 58369   ;;  %vm682_vm2 = vcmask 60419  }
   0xe   : > { %v242_v6 = vld [vmem:[%s1518_s1 + $0x30] sm:$0xff]  ;;  %280 = vmatpush.msra.mxu1 %v881_v2  ;;  %228 = vst.msk [vmem:[#allocation2 + $0x10] sm:$0xff] %vm225_vm0, %v1027_v4  ;;  %v240_v9 = vld [vmem:[%s1518_s1 + $0x20] sm:$0xff]  ;;  %355 = vmatpush.msra.mxu3 %v245_v12  ;;  %v884_v21 = vld [vmem:[%s1518_s1 + $0xb8] sm:$0xff]  ;;  %vm692_vm3 = vcmask 62469   ;;  %vm602_vm4 = vcmask 57344  }
   0xf   : > { %332 = vmatpush.msra.mxu2 %v244_v3  ;;  %v903_v8 = vld [vmem:[%s1518_s1 + $0x110] sm:$0xff]  ;;  %v901_v11 = vld [vmem:[%s1518_s1 + $0x100] sm:$0xff]  ;;  %229 = vst.msk [vmem:[#allocation2 + $0x18] sm:$0xff] %vm225_vm0, %v1027_v4  ;;  %v241_v22 = vld [vmem:[%s1518_s1 + $0x28] sm:$0xff]  ;;  %vm714_vm5 = vcmask 64519   ;;  %s1030_s19 = smov 88  }
  0x10   : > { %398 = vmatpush.msra.mxu0 %v903_v8  ;;  %281 = vmatpush.msra.mxu1 %v879_v5  ;;  %450 = vst [vmem:[#allocation3] sm:$0xff] %v1027_v4  ;;  %v899_v13 = vld [vmem:[%s1518_s1 + $0xf0] sm:$0xff]  ;;  %v230_v16 = vld [vmem:[%s219_s22] sm:$0xff]  ;;  %v231_v23 = vld [vmem:[%s219_s22 + $0x8] sm:$0xff]  ;;  %s1032_s17 = smov 72  }
  0x11   : > { %333 = vmatpush.msra.mxu2 %v242_v6  ;;  %v875_v14 = vld [vmem:[%s1518_s1 + $0x70] sm:$0xff]  ;;  %453 = vst [vmem:[#allocation3 + $0x18] sm:$0xff] %v1027_v4  ;;  %v897_v18 = vld [vmem:[%s1518_s1 + $0xe0] sm:$0xff]  ;;  %356 = vmatpush.msra.mxu3 %v243_v17  ;;  %v882_v25 = vld [vmem:[%s1518_s1 + $0xa8] sm:$0xff] }
  0x12   : > { %v238_v15 = vld [vmem:[%s1518_s1 + $0x10] sm:$0xff]  ;;  %399 = vmatpush.msra.mxu0 %v901_v11  ;;  %282 = vmatpush.msra.mxu1 %v877_v7  ;;  %232 = vst.msk [vmem:[#allocation2 + $0x8] sm:$0xff] %vm225_vm0, %v230_v16  ;;  %v873_v19 = vld [vmem:[%s1518_s1 + $0x60] sm:$0xff]  ;;  %v239_v26 = vld [vmem:[%s1518_s1 + $0x18] sm:$0xff] }
  0x13   : > { %334 = vmatpush.msra.mxu2 %v240_v9  ;;  %v236_v20 = vld [vmem:[%s1518_s1] sm:$0xff]  ;;  %v895_v24 = vld [vmem:[%s1518_s1 + $0xd0] sm:$0xff]  ;;  %233 = vst.msk [vmem:[#allocation2 + $0x10] sm:$0xff] %vm225_vm0, %v231_v23  ;;  %357 = vmatpush.msra.mxu3 %v241_v22  ;;  %v880_v27 = vld [vmem:[%s1518_s1 + $0x98] sm:$0xff] }
  0x14   : > { %400 = vmatpush.msra.mxu0 %v899_v13  ;;  %283 = vmatpush.msra.mxu1 %v875_v14  ;;  %v893_v28 = vld [vmem:[%s1518_s1 + $0xc0] sm:$0xff]  ;;  %v237_v31 = vld [vmem:[%s1518_s1 + $0x8] sm:$0xff]  ;;  %v876_v34 = vld [vmem:[%s1518_s1 + $0x78] sm:$0xff] }
  0x15   : > { %335 = vmatpush.msra.mxu2 %v238_v15  ;;  %358 = vmatpush.msra.mxu3 %v239_v26  ;;  %v878_v32 = vld [vmem:[%s1518_s1 + $0x88] sm:$0xff]  ;;  %v904_v38 = vld [vmem:[%s1518_s1 + $0x118] sm:$0xff]  ;;  %v923_v46 = vld [vmem:[%s1520_s3 + $0xf0] sm:$0xff] }
  0x16   : > { %401 = vmatpush.msra.mxu0 %v897_v18  ;;  %284 = vmatpush.msra.mxu1 %v873_v19  ;;  %v874_v35 = vld [vmem:[%s1518_s1 + $0x68] sm:$0xff]  ;;  %v900_v41 = vld [vmem:[%s1518_s1 + $0xf8] sm:$0xff]  ;;  %v921_v48 = vld [vmem:[%s1520_s3 + $0xe0] sm:$0xff] }
  0x17   : > { %336 = vmatpush.msra.mxu2 %v236_v20  ;;  %359 = vmatpush.msra.mxu3 %v237_v31  ;;  %v902_v40 = vld [vmem:[%s1518_s1 + $0x108] sm:$0xff]  ;;  %v896_v43 = vld [vmem:[%s1518_s1 + $0xd8] sm:$0xff]  ;;  %v472_v51 = vld [vmem:[%s1520_s3 + $0x70] sm:$0xff] }
  0x18   : > { %302 = vmatpush.msrb.mxu1 %v884_v21  ;;  %402 = vmatpush.msra.mxu0 %v895_v24  ;;  %v898_v42 = vld [vmem:[%s1518_s1 + $0xe8] sm:$0xff]  ;;  %v924_v45 = vld [vmem:[%s1520_s3 + $0xf8] sm:$0xff]  ;;  %v919_v52 = vld [vmem:[%s1520_s3 + $0xd0] sm:$0xff] }
  0x19   : > { %v248_v29 = vld [vmem:[#allocation2 + $0x8] sm:$0xff]  ;;  %493 = vmatpush.msrb.mxu2 %v924_v45  ;;  %v473_v49 = vld [vmem:[%s1520_s3 + $0x78] sm:$0xff]  ;;  %v470_v54 = vld [vmem:[%s1520_s3 + $0x60] sm:$0xff] }
  0x1a   : > { %v234_v30 = vld [vmem:[#allocation2 + $0x7] sm:$0xff]  ;;  %303 = vmatpush.msrb.mxu1 %v882_v25  ;;  %403 = vmatpush.msra.mxu0 %v893_v28  ;;  %v249_v36 = vld [vmem:[#allocation2 + $0x10] sm:$0xff]  ;;  %v920_v50 = vld [vmem:[%s1520_s3 + $0xd8] sm:$0xff] }
  0x1b   : > { %885 = vmatmul.msk.f32.vlgmr.msra.gmra.mxu1 %vm225_vm0, %v248_v29  ;;  %889 = vmatmul.msk.f32.vlgmr.msra.gmra.mxu2 %vm225_vm0, %v234_v30  ;;  %v367_v33 = vld [vmem:[#allocation2 + $0x9] sm:$0xff]  ;;  %v368_v39 = vld [vmem:[#allocation2 + $0x11] sm:$0xff]  ;;  %v917_v56 = vld [vmem:[%s1520_s3 + $0xc0] sm:$0xff] }
  0x1c   : > { %304 = vmatpush.msrb.mxu1 %v880_v27  ;;  %905 = vmatmul.msk.f32.vlgmr.msra.gmra.mxu0 %vm225_vm0, %v367_v33  ;;  %v235_v37 = vld [vmem:[#allocation2 + $0xf] sm:$0xff]  ;;  %v469_v57 = vld [vmem:[%s1520_s3 + $0x58] sm:$0xff]  ;;  %v466_v0 = vld [vmem:[%s1520_s3 + $0x40] sm:$0xff] }
  0x1d   : > { %891 = vmatmul.msk.f32.vlgmr.msra.gmra.mxu3 %vm225_vm0, %v234_v30  ;;  %v894_v44 = vld [vmem:[%s1518_s1 + $0xc8] sm:$0xff]  ;;  %494 = vmatpush.msrb.mxu2 %v923_v46  ;;  %v940_v58 = vld [vmem:[%s1520_s3 + $0x178] sm:$0xff]  ;;  %v468_v60 = vld [vmem:[%s1520_s3 + $0x50] sm:$0xff] }
  0x1e   : > { %305 = vmatpush.msrb.mxu1 %v878_v32  ;;  %v922_v47 = vld [vmem:[%s1520_s3 + $0xe8] sm:$0xff]  ;;  %516 = vmatpush.msrb.mxu3 %v473_v49  ;;  %v916_v59 = vld [vmem:[%s1520_s3 + $0xb8] sm:$0xff]  ;;  %v939_v61 = vld [vmem:[%s1520_s3 + $0x170] sm:$0xff] }
  0x1f   : > { %495 = vmatpush.msrb.mxu2 %v922_v47  ;;  %v471_v53 = vld [vmem:[%s1520_s3 + $0x68] sm:$0xff]  ;;  %558 = vmatpush.msrb.mxu0 %v940_v58  ;;  %v937_v1 = vld [vmem:[%s1520_s3 + $0x160] sm:$0xff]  ;;  %v915_v2 = vld [vmem:[%s1520_s3 + $0xb0] sm:$0xff] }
  0x20   : > { %306 = vmatpush.msrb.mxu1 %v876_v34  ;;  %517 = vmatpush.msrb.mxu3 %v472_v51  ;;  %v918_v55 = vld [vmem:[%s1520_s3 + $0xc8] sm:$0xff]  ;;  %v913_v4 = vld [vmem:[%s1520_s3 + $0xa0] sm:$0xff]  ;;  %v465_v5 = vld [vmem:[%s1520_s3 + $0x38] sm:$0xff] }
  0x21   : > { %496 = vmatpush.msrb.mxu2 %v921_v48  ;;  %v467_v62 = vld [vmem:[%s1520_s3 + $0x48] sm:$0xff]  ;;  %559 = vmatpush.msrb.mxu0 %v939_v61  ;;  %v936_v6 = vld [vmem:[%s1520_s3 + $0x158] sm:$0xff]  ;;  %v464_v9 = vld [vmem:[%s1520_s3 + $0x30] sm:$0xff] }
  0x22   : > { %307 = vmatpush.msrb.mxu1 %v874_v35  ;;  %518 = vmatpush.msrb.mxu3 %v471_v53  ;;  %v938_v63 = vld [vmem:[%s1520_s3 + $0x168] sm:$0xff]  ;;  %v912_v8 = vld [vmem:[%s1520_s3 + $0x98] sm:$0xff]  ;;  %v935_v10 = vld [vmem:[%s1520_s3 + $0x150] sm:$0xff] }
  0x23   : > { %886 = vmatmul.msk.f32.gmra.mxu1 %vm225_vm0, %v249_v36  ;;  %890 = vmatmul.msk.f32.gmra.mxu2 %vm225_vm0, %v235_v37  ;;  %v914_v3 = vld [vmem:[%s1520_s3 + $0xa8] sm:$0xff]  ;;  %v911_v11 = vld [vmem:[%s1520_s3 + $0x90] sm:$0xff]  ;;  %v1305_v15 = vld [vmem:[%s1519_s2] sm:$0x3] }
  0x24   : > { %421 = vmatpush.msra.mxu1 %v904_v38  ;;  %906 = vmatmul.msk.f32.gmra.mxu0 %vm225_vm0, %v368_v39  ;;  %v463_v12 = vld [vmem:[%s1520_s3 + $0x28] sm:$0xff]  ;;  %v462_v17 = vld [vmem:[%s1520_s3 + $0x20] sm:$0xff]  ;;  %v440_v22 = vperm.slane %v1305_v15, 0  ;;  %v461_v23 = vld [vmem:[%s1520_s3 + $0x18] sm:$0xff]  ;;  %v441_v47 = vperm.slane %v1305_v15, 1 }
  0x25   : > { %892 = vmatmul.msk.f32.gmra.mxu3 %vm225_vm0, %v235_v37  ;;  %497 = vmatpush.msrb.mxu2 %v920_v50  ;;  %v934_v13 = vld [vmem:[%s1520_s3 + $0x148] sm:$0xff]  ;;  %v933_v18 = vld [vmem:[%s1520_s3 + $0x140] sm:$0xff]  ;;  %v932_v24 = vld [vmem:[%s1520_s3 + $0x138] sm:$0xff] }
  0x26   : > { %422 = vmatpush.msra.mxu1 %v902_v40  ;;  %519 = vmatpush.msrb.mxu3 %v470_v54  ;;  %v910_v16 = vld [vmem:[%s1520_s3 + $0x88] sm:$0xff]  ;;  %v909_v20 = vld [vmem:[%s1520_s3 + $0x80] sm:$0xff]  ;;  %v460_v27 = vld [vmem:[%s1520_s3 + $0x10] sm:$0xff] }
  0x27   : > { %498 = vmatpush.msrb.mxu2 %v919_v52  ;;  %560 = vmatpush.msrb.mxu0 %v938_v63  ;;  %v931_v28 = vld [vmem:[%s1520_s3 + $0x130] sm:$0xff]  ;;  %v459_v30 = vld [vmem:[%s1520_s3 + $0x8] sm:$0xff]  ;;  %v458_v32 = vld [vmem:[%s1520_s3] sm:$0xff] }
  0x28   : > { %423 = vmatpush.msra.mxu1 %v900_v41  ;;  %520 = vmatpush.msrb.mxu3 %v469_v57  ;;  %v930_v31 = vld [vmem:[%s1520_s3 + $0x128] sm:$0xff]  ;;  %v928_v37 = vld [vmem:[%s1520_s3 + $0x118] sm:$0xff]  ;;  %v927_v38 = vld [vmem:[%s1520_s3 + $0x110] sm:$0xff] }
  0x29   : > { %499 = vmatpush.msrb.mxu2 %v918_v55  ;;  %561 = vmatpush.msrb.mxu0 %v937_v1  ;;  %v926_v41 = vld [vmem:[%s1520_s3 + $0x108] sm:$0xff]  ;;  %v1018_v1 = vld [vmem:[%s1521_s4] ss:$0 sm:$0xff] }
  0x2a   : > { %424 = vmatpush.msra.mxu1 %v898_v42  ;;  %521 = vmatpush.msrb.mxu3 %v468_v60 }
  0x2b   : > { %887 = vmatmul.msk.f32.vlgmr.msrb.gmra.mxu1 %vm225_vm0, %v248_v29  ;;  %500 = vmatpush.msrb.mxu2 %v917_v56 }
  0x2c   : > { %425 = vmatpush.msra.mxu1 %v896_v43  ;;  %522 = vmatpush.msrb.mxu3 %v467_v62  ;;  %v925_v43 = vld [vmem:[%s1520_s3 + $0x100] sm:$0xff] }
  0x2d   : > { %501 = vmatpush.msrb.mxu2 %v916_v59  ;;  %562 = vmatpush.msrb.mxu0 %v936_v6 }
  0x2e   : > { %426 = vmatpush.msra.mxu1 %v894_v44  ;;  %523 = vmatpush.msrb.mxu3 %v466_v0 }
  0x2f   : > { %502 = vmatpush.msrb.mxu2 %v915_v2  ;;  %563 = vmatpush.msrb.mxu0 %v935_v10 }
  0x30   : > { %524 = vmatpush.msrb.mxu3 %v465_v5 }
  0x31   : > { %503 = vmatpush.msrb.mxu2 %v914_v3  ;;  %564 = vmatpush.msrb.mxu0 %v934_v13 }
  0x32   : > { %525 = vmatpush.msrb.mxu3 %v464_v9 }
  0x33   : > { %888 = vmatmul.msk.f32.gmra.mxu1 %vm225_vm0, %v249_v36  ;;  %504 = vmatpush.msrb.mxu2 %v913_v4 }
  0x34   : > { %526 = vmatpush.msrb.mxu3 %v463_v12  ;;  %565 = vmatpush.msrb.mxu0 %v933_v18 }
  0x35   : > { %505 = vmatpush.msrb.mxu2 %v912_v8 }
  0x36   : > { %527 = vmatpush.msrb.mxu3 %v462_v17  ;;  %566 = vmatpush.msrb.mxu0 %v932_v24 }
  0x37   : > { %506 = vmatpush.msrb.mxu2 %v911_v11 }
  0x38   : > { %528 = vmatpush.msrb.mxu3 %v461_v23  ;;  %567 = vmatpush.msrb.mxu0 %v931_v28 }
  0x39   : > { %507 = vmatpush.msrb.mxu2 %v910_v16 }
  0x3a   : > { %529 = vmatpush.msrb.mxu3 %v460_v27  ;;  %568 = vmatpush.msrb.mxu0 %v930_v31 }
  0x3b   : > { %907 = vmatmul.msk.f32.vlgmr.msra.gmra.mxu1 %vm225_vm0, %v367_v33  ;;  %508 = vmatpush.msrb.mxu2 %v909_v20  ;;  %v929_v33 = vld [vmem:[%s1520_s3 + $0x120] sm:$0xff] }
  0x3c   : > { %530 = vmatpush.msrb.mxu3 %v459_v30  ;;  %569 = vmatpush.msrb.mxu0 %v929_v33 }
  0x3e   : > { %531 = vmatpush.msrb.mxu3 %v458_v32  ;;  %570 = vmatpush.msrb.mxu0 %v928_v37 }
  0x40   : > { %571 = vmatpush.msrb.mxu0 %v927_v38 }
  0x42   : > { %572 = vmatpush.msrb.mxu0 %v926_v41 }
  0x43   : > { %908 = vmatmul.msk.f32.gmra.mxu1 %vm225_vm0, %v368_v39 }
  0x44   : > { %573 = vmatpush.msrb.mxu0 %v925_v43 }
  0x98   : > { %v286_v7 = vpop.f32.mrf.mxu1 }
  0x99   : > { %v405_v14 = vpop.f32.mrf.mxu0 }
  0x9e   : > { %v338_v19 = vpop.f32.mrf.mxu2 }
  0x9f   : > { %v339_v21 = vadd.f32 %v338_v19, %v286_v7 }
  0xa0   : > { %v289_v25 = vpop.f32.mrf.mxu1  ;;  %v361_v45 = vpop.f32.mrf.mxu3 }
  0xa1   : > { %v434_v26 = vadd.f32 %v405_v14, %v339_v21  ;;  %v408_v35 = vpop.f32.mrf.mxu0 }
  0xa3   : > { %v444_v29 = vadd.f32 %v440_v22, %v434_v26 }
  0xa6   : > { %v341_v34 = vpop.f32.mrf.mxu2 }
  0xa7   : > { %v342_v36 = vadd.f32 %v341_v34, %v289_v25 }
  0xa8   : > { %v309_v39 = vpop.f32.mrf.mxu1  ;;  %v364_v51 = vpop.f32.mrf.mxu3 }
  0xa9   : > { %v436_v40 = vadd.f32 %v408_v35, %v342_v36  ;;  %v362_v46 = vadd.f32 %v361_v45, %v309_v39 }
  0xab   : > { %v446_v42 = vadd.f32 %v440_v22, %v436_v40 }
  0xb0   : > { %v312_v44 = vpop.f32.mrf.mxu1 }
  0xb1   : > { %v365_v53 = vadd.f32 %v364_v51, %v312_v44 }
  0xb8   : > { %v428_v48 = vpop.f32.mrf.mxu1 }
  0xb9   : > { %v435_v49 = vadd.f32 %v428_v48, %v362_v46 }
  0xbb   : > { %v445_v50 = vadd.f32 %v441_v47, %v435_v49 }
  0xbd   : > { %v448_v52 = vmax.f32 %v445_v50, 0.0 }
  0xbf   : > { %454 = vst [vmem:[#allocation3 + $0x8] sm:$0xff] %v448_v52  ;;  %509 = vmatmul.f32.vlgmr.msrb.gmra.mxu2 %v448_v52 }
  0xc0   : > { %v431_v54 = vpop.f32.mrf.mxu1 }
  0xc1   : > { %v437_v55 = vadd.f32 %v431_v54, %v365_v53 }
  0xc3   : > { %v447_v56 = vadd.f32 %v441_v47, %v437_v55 }
  0xc5   : > { %v449_v57 = vmax.f32 %v447_v56, 0.0 }
  0xc6   : > { %v456_v58 = vld [vmem:[#allocation3 + $0x7] sm:$0xff] }
  0xc7   : > { %455 = vst [vmem:[#allocation3 + $0x10] sm:$0xff] %v449_v57  ;;  %532 = vmatmul.f32.vlgmr.msrb.gmra.mxu3 %v456_v58  ;;  %512 = vmatmul.f32.gmra.mxu2 %v449_v57 }
  0xce   : > { %v457_v59 = vld [vmem:[#allocation3 + $0xf] sm:$0xff] }
  0xcf   : > { %v539_v60 = vld [vmem:[#allocation3 + $0x9] sm:$0xff]  ;;  %535 = vmatmul.f32.gmra.mxu3 %v457_v59  ;;  %v540_v61 = vld [vmem:[#allocation3 + $0x11] sm:$0xff] }
  0xd0   : > { %574 = vmatmul.f32.vlgmr.msrb.gmra.mxu0 %v539_v60 }
  0xd8   : > { %577 = vmatmul.f32.gmra.mxu0 %v540_v61 }
 0x142   : > { %v510_v62 = vpop.f32.mrf.mxu2 }
 0x14a   : > { %v533_v63 = vpop.f32.mrf.mxu3  ;;  %v513_v6 = vpop.f32.mrf.mxu2 }
 0x14b   : > { %v534_v0 = vadd.f32 %v533_v63, %v510_v62 }
 0x14d   : > { %v575_v2 = vpop.f32.mrf.mxu0 }
 0x14e   : > { %v581_v3 = vadd.f32 %v575_v2, %v534_v0 }
 0x150   : > { %v587_v4 = vadd.f32 %v1018_v1, %v581_v3 }
 0x152   : > { %v589_v5 = vmax.f32 %v587_v4, 0.0  ;;  %v536_v7 = vpop.f32.mrf.mxu3 }
 0x153   : > { %v537_v9 = vadd.f32 %v536_v7, %v513_v6 }
 0x154   : > { %v591_v8 = vadd.f32 %v589_v5, %v444_v29 }
 0x155   : > { %v578_v10 = vpop.f32.mrf.mxu0 }
 0x156   : > { %v582_v11 = vadd.f32 %v578_v10, %v537_v9  ;;  %v594_v12 = vrot.slane %v591_v8, 1  ;;  %v637_v23 = vrot.slane %v591_v8, 2 }
 0x158   : > { %v588_v13 = vadd.f32 %v1018_v1, %v582_v11  ;;  %v596_v14 = vmax.f32 %v591_v8, %v594_v12 }
 0x15a   : > { %v590_v15 = vmax.f32 %v588_v13, 0.0  ;;  %598 = vrot.lane.b32.xlu0 %v596_v14, %s1028_s10  ;;  %v639_v24 = vmax.f32 %v596_v14, %v637_v23 }
 0x15c   : > { %v592_v16 = vadd.f32 %v590_v15, %v446_v42 }
 0x15e   : > { %v702_v17 = vrot.slane %v592_v16, 1  ;;  %v705_v18 = vrot.slane %v592_v16, 2 }
 0x160   : > { %v749_v19 = vmax.f32 %v592_v16, %v702_v17  ;;  %v704_v20 = vmax.f32 %v591_v8, %v702_v17 }
 0x162   : > { %604 = vrot.lane.b32.xlu0 %v596_v14, %s1029_s11  ;;  %v750_v21 = vmax.f32 %v749_v19, %v705_v18  ;;  %v707_v22 = vmax.f32 %v704_v20, %v705_v18 }
 0x164   : > { %752 = vrot.lane.b32.xlu2 %v750_v21, %s1028_s10  ;;  %709 = vrot.lane.b32.xlu1 %v707_v22, %s1028_s10 }
 0x16a   : > { %641 = vrot.lane.b32.xlu0 %v639_v24, %s1028_s10 }
 0x16c   : > { %758 = vrot.lane.b32.xlu2 %v750_v21, %s1029_s11  ;;  %716 = vrot.lane.b32.xlu1 %v707_v22, %s1029_s11 }
 0x172   : > { %648 = vrot.lane.b32.xlu0 %v639_v24, %s1029_s11 }
 0x1be   : > { %v753_v25 = vpop.permute.xlu2 %752 }
 0x1bf   : > { %v755_v26 = vmax.f32 %v750_v21, %v753_v25 }
 0x1c1   : > { %973 = vst.msk [vmem:[%s1368_s15 + $0x27] sm:$0x2] %vm646_vm1, %v755_v26 }
 0x1c2   : > { %981 = vst.msk [vmem:[%s1368_s15 + $0x2d] sm:$0x8] %vm682_vm2, %v755_v26 }
 0x1c3   : > { %989 = vst.msk [vmem:[%s1368_s15 + $0x33] sm:$0x20] %vm692_vm3, %v755_v26 }
 0x1c6   : > { %v759_v39 = vpop.permute.xlu2 %758 }
 0x1c7   : > { %v761_v40 = vmax.f32 %v755_v26, %v759_v39 }
 0x1cc   : > { %v599_v27 = vpop.permute.xlu0 %598 }
 0x1cd   : > { %v601_v28 = vmax.f32 %v596_v14, %v599_v27 }
 0x1cf   : > { %603 = vst.msk [vmem:[%s1368_s15] sm:$0x1] %vm602_vm4, %v601_v28 }
 0x1d4   : > { %v605_v29 = vpop.permute.xlu0 %604 }
 0x1d5   : > { %v607_v30 = vmax.f32 %v601_v28, %v605_v29 }
 0x1d6   : > { %v710_v31 = vpop.permute.xlu1 %709 }
 0x1d7   : > { %v712_v32 = vmax.f32 %v707_v22, %v710_v31  ;;  %617 = vrot.lane.b32.xlu2 %v607_v30, %s1030_s19  ;;  %609 = vrot.lane.b32.xlu1 %v607_v30, %s1028_s10 }
 0x1d8   : > { %625 = vrot.lane.b32.xlu0 %v607_v30, %s1031_s16 }
 0x1d9   : > { %965 = vst.msk [vmem:[%s1368_s15 + $0x19] sm:$0x80] %vm714_vm5, %v712_v32 }
 0x1dc   : > { %v642_v33 = vpop.permute.xlu0 %641 }
 0x1dd   : > { %v644_v34 = vmax.f32 %v639_v24, %v642_v33 }
 0x1de   : > { %v717_v37 = vpop.permute.xlu1 %716 }
 0x1df   : > { %941 = vst.msk [vmem:[%s1368_s15 + $0x7] sm:$0x2] %vm646_vm1, %v644_v34  ;;  %621 = vrot.lane.b32.xlu2 %v607_v30, %s1032_s17  ;;  %613 = vrot.lane.b32.xlu1 %v607_v30, %s1033_s20  ;;  %v719_v38 = vmax.f32 %v712_v32, %v717_v37 }
 0x1e0   : > { %949 = vst.msk [vmem:[%s1368_s15 + $0xd] sm:$0x8] %vm682_vm2, %v644_v34 }
 0x1e1   : > { %957 = vst.msk [vmem:[%s1368_s15 + $0x13] sm:$0x20] %vm692_vm3, %v644_v34 }
 0x1e4   : > { %v649_v35 = vpop.permute.xlu0 %648 }
 0x1e5   : > { %v651_v36 = vmax.f32 %v644_v34, %v649_v35 }
 0x1e7   : > { %633 = vrot.lane.b32.xlu2 %v607_v30, %s1034_s21  ;;  %629 = vrot.lane.b32.xlu1 %v607_v30, %s1035_s23 }
 0x1e8   : > { %653 = vrot.lane.b32.xlu0 %v651_v36, %s1028_s10 }
 0x1ef   : > { %661 = vrot.lane.b32.xlu2 %v651_v36, %s1030_s19  ;;  %657 = vrot.lane.b32.xlu1 %v651_v36, %s1033_s20 }
 0x1f0   : > { %665 = vrot.lane.b32.xlu0 %v651_v36, %s1032_s17 }
 0x1f7   : > { %673 = vrot.lane.b32.xlu2 %v651_v36, %s1035_s23  ;;  %669 = vrot.lane.b32.xlu1 %v651_v36, %s1031_s16 }
 0x1f8   : > { %677 = vrot.lane.b32.xlu0 %v651_v36, %s1034_s21 }
 0x1ff   : > { %725 = vrot.lane.b32.xlu2 %v719_v38, %s1033_s20  ;;  %721 = vrot.lane.b32.xlu1 %v719_v38, %s1028_s10 }
 0x200   : > { %729 = vrot.lane.b32.xlu0 %v719_v38, %s1030_s19 }
 0x207   : > { %737 = vrot.lane.b32.xlu2 %v719_v38, %s1031_s16  ;;  %733 = vrot.lane.b32.xlu1 %v719_v38, %s1032_s17 }
 0x208   : > { %741 = vrot.lane.b32.xlu0 %v719_v38, %s1035_s23 }
 0x20f   : > { %763 = vrot.lane.b32.xlu2 %v761_v40, %s1028_s10  ;;  %745 = vrot.lane.b32.xlu1 %v719_v38, %s1034_s21 }
 0x210   : > { %767 = vrot.lane.b32.xlu0 %v761_v40, %s1033_s20 }
 0x217   : > { %775 = vrot.lane.b32.xlu2 %v761_v40, %s1032_s17  ;;  %771 = vrot.lane.b32.xlu1 %v761_v40, %s1030_s19 }
 0x218   : > { %779 = vrot.lane.b32.xlu0 %v761_v40, %s1031_s16 }
 0x21f   : > { %787 = vrot.lane.b32.xlu2 %v761_v40, %s1034_s21  ;;  %783 = vrot.lane.b32.xlu1 %v761_v40, %s1035_s23 }
 0x231   : > { %v618_v41 = vpop.permute.xlu2 %617 }
 0x232   : > { %620 = vst.msk [vmem:[%s1368_s15 + $0x3] sm:$0x1] %vm602_vm4, %v618_v41 }
 0x239   : > { %v622_v42 = vpop.permute.xlu2 %621 }
 0x23a   : > { %624 = vst.msk [vmem:[%s1368_s15 + $0x4] sm:$0x1] %vm602_vm4, %v622_v42 }
 0x241   : > { %v634_v43 = vpop.permute.xlu2 %633 }
 0x242   : > { %636 = vst.msk [vmem:[%s1368_s15 + $0x7] sm:$0x1] %vm602_vm4, %v634_v43 }
 0x249   : > { %v610_v44 = vpop.permute.xlu1 %609  ;;  %v662_v45 = vpop.permute.xlu2 %661 }
 0x24a   : > { %612 = vst.msk [vmem:[%s1368_s15 + $0x1] sm:$0x1] %vm602_vm4, %v610_v44  ;;  %v626_v46 = vpop.permute.xlu0 %625 }
 0x24b   : > { %944 = vst.msk [vmem:[%s1368_s15 + $0xa] sm:$0x2] %vm646_vm1, %v662_v45 }
 0x24c   : > { %952 = vst.msk [vmem:[%s1368_s15 + $0x10] sm:$0x8] %vm682_vm2, %v662_v45 }
 0x24d   : > { %960 = vst.msk [vmem:[%s1368_s15 + $0x16] sm:$0x20] %vm692_vm3, %v662_v45 }
 0x24e   : > { %628 = vst.msk [vmem:[%s1368_s15 + $0x5] sm:$0x1] %vm602_vm4, %v626_v46 }
 0x251   : > { %v614_v47 = vpop.permute.xlu1 %613  ;;  %v674_v48 = vpop.permute.xlu2 %673 }
 0x252   : > { %616 = vst.msk [vmem:[%s1368_s15 + $0x2] sm:$0x1] %vm602_vm4, %v614_v47 }
 0x253   : > { %947 = vst.msk [vmem:[%s1368_s15 + $0xd] sm:$0x2] %vm646_vm1, %v674_v48 }
 0x254   : > { %955 = vst.msk [vmem:[%s1368_s15 + $0x13] sm:$0x8] %vm682_vm2, %v674_v48 }
 0x255   : > { %963 = vst.msk [vmem:[%s1368_s15 + $0x19] sm:$0x20] %vm692_vm3, %v674_v48 }
 0x259   : > { %v630_v49 = vpop.permute.xlu1 %629  ;;  %v726_v50 = vpop.permute.xlu2 %725 }
 0x25a   : > { %632 = vst.msk [vmem:[%s1368_s15 + $0x6] sm:$0x1] %vm602_vm4, %v630_v49  ;;  %v654_v51 = vpop.permute.xlu0 %653 }
 0x25b   : > { %967 = vst.msk [vmem:[%s1368_s15 + $0x1b] sm:$0x80] %vm714_vm5, %v726_v50 }
 0x25c   : > { %942 = vst.msk [vmem:[%s1368_s15 + $0x8] sm:$0x2] %vm646_vm1, %v654_v51 }
 0x25d   : > { %950 = vst.msk [vmem:[%s1368_s15 + $0xe] sm:$0x8] %vm682_vm2, %v654_v51 }
 0x25e   : > { %958 = vst.msk [vmem:[%s1368_s15 + $0x14] sm:$0x20] %vm692_vm3, %v654_v51 }
 0x261   : > { %v738_v52 = vpop.permute.xlu2 %737  ;;  %v658_v53 = vpop.permute.xlu1 %657 }
 0x262   : > { %970 = vst.msk [vmem:[%s1368_s15 + $0x1e] sm:$0x80] %vm714_vm5, %v738_v52  ;;  %v666_v54 = vpop.permute.xlu0 %665 }
 0x263   : > { %943 = vst.msk [vmem:[%s1368_s15 + $0x9] sm:$0x2] %vm646_vm1, %v658_v53 }
 0x264   : > { %951 = vst.msk [vmem:[%s1368_s15 + $0xf] sm:$0x8] %vm682_vm2, %v658_v53 }
 0x265   : > { %959 = vst.msk [vmem:[%s1368_s15 + $0x15] sm:$0x20] %vm692_vm3, %v658_v53 }
 0x266   : > { %945 = vst.msk [vmem:[%s1368_s15 + $0xb] sm:$0x2] %vm646_vm1, %v666_v54 }
 0x267   : > { %953 = vst.msk [vmem:[%s1368_s15 + $0x11] sm:$0x8] %vm682_vm2, %v666_v54 }
 0x268   : > { %961 = vst.msk [vmem:[%s1368_s15 + $0x17] sm:$0x20] %vm692_vm3, %v666_v54 }
 0x269   : > { %v764_v55 = vpop.permute.xlu2 %763  ;;  %v670_v56 = vpop.permute.xlu1 %669 }
 0x26a   : > { %974 = vst.msk [vmem:[%s1368_s15 + $0x28] sm:$0x2] %vm646_vm1, %v764_v55  ;;  %v678_v57 = vpop.permute.xlu0 %677 }
 0x26b   : > { %982 = vst.msk [vmem:[%s1368_s15 + $0x2e] sm:$0x8] %vm682_vm2, %v764_v55 }
 0x26c   : > { %990 = vst.msk [vmem:[%s1368_s15 + $0x34] sm:$0x20] %vm692_vm3, %v764_v55 }
 0x26d   : > { %946 = vst.msk [vmem:[%s1368_s15 + $0xc] sm:$0x2] %vm646_vm1, %v670_v56 }
 0x26e   : > { %954 = vst.msk [vmem:[%s1368_s15 + $0x12] sm:$0x8] %vm682_vm2, %v670_v56 }
 0x26f   : > { %962 = vst.msk [vmem:[%s1368_s15 + $0x18] sm:$0x20] %vm692_vm3, %v670_v56 }
 0x270   : > { %948 = vst.msk [vmem:[%s1368_s15 + $0xe] sm:$0x2] %vm646_vm1, %v678_v57 }
 0x271   : > { %956 = vst.msk [vmem:[%s1368_s15 + $0x14] sm:$0x8] %vm682_vm2, %v678_v57  ;;  %v776_v58 = vpop.permute.xlu2 %775  ;;  %v722_v59 = vpop.permute.xlu1 %721 }
 0x272   : > { %964 = vst.msk [vmem:[%s1368_s15 + $0x1a] sm:$0x20] %vm692_vm3, %v678_v57  ;;  %v730_v60 = vpop.permute.xlu0 %729 }
 0x273   : > { %977 = vst.msk [vmem:[%s1368_s15 + $0x2b] sm:$0x2] %vm646_vm1, %v776_v58 }
 0x274   : > { %985 = vst.msk [vmem:[%s1368_s15 + $0x31] sm:$0x8] %vm682_vm2, %v776_v58 }
 0x275   : > { %993 = vst.msk [vmem:[%s1368_s15 + $0x37] sm:$0x20] %vm692_vm3, %v776_v58 }
 0x276   : > { %966 = vst.msk [vmem:[%s1368_s15 + $0x1a] sm:$0x80] %vm714_vm5, %v722_v59 }
 0x277   : > { %968 = vst.msk [vmem:[%s1368_s15 + $0x1c] sm:$0x80] %vm714_vm5, %v730_v60 }
 0x279   : > { %v788_v61 = vpop.permute.xlu2 %787  ;;  %v734_v62 = vpop.permute.xlu1 %733 }
 0x27a   : > { %980 = vst.msk [vmem:[%s1368_s15 + $0x2e] sm:$0x2] %vm646_vm1, %v788_v61  ;;  %v742_v63 = vpop.permute.xlu0 %741 }
 0x27b   : > { %988 = vst.msk [vmem:[%s1368_s15 + $0x34] sm:$0x8] %vm682_vm2, %v788_v61 }
 0x27c   : > { %996 = vst.msk [vmem:[%s1368_s15 + $0x3a] sm:$0x20] %vm692_vm3, %v788_v61 }
 0x27d   : > { %969 = vst.msk [vmem:[%s1368_s15 + $0x1d] sm:$0x80] %vm714_vm5, %v734_v62 }
 0x27e   : > { %971 = vst.msk [vmem:[%s1368_s15 + $0x1f] sm:$0x80] %vm714_vm5, %v742_v63 }
 0x281   : > { %v746_v0 = vpop.permute.xlu1 %745 }
 0x282   : > { %972 = vst.msk [vmem:[%s1368_s15 + $0x20] sm:$0x80] %vm714_vm5, %v746_v0  ;;  %v768_v1 = vpop.permute.xlu0 %767 }
 0x283   : > { %975 = vst.msk [vmem:[%s1368_s15 + $0x29] sm:$0x2] %vm646_vm1, %v768_v1 }
 0x284   : > { %983 = vst.msk [vmem:[%s1368_s15 + $0x2f] sm:$0x8] %vm682_vm2, %v768_v1 }
 0x285   : > { %991 = vst.msk [vmem:[%s1368_s15 + $0x35] sm:$0x20] %vm692_vm3, %v768_v1 }
 0x289   : > { %v772_v2 = vpop.permute.xlu1 %771 }
 0x28a   : > { %976 = vst.msk [vmem:[%s1368_s15 + $0x2a] sm:$0x2] %vm646_vm1, %v772_v2  ;;  %v780_v3 = vpop.permute.xlu0 %779 }
 0x28b   : > { %984 = vst.msk [vmem:[%s1368_s15 + $0x30] sm:$0x8] %vm682_vm2, %v772_v2 }
 0x28c   : > { %992 = vst.msk [vmem:[%s1368_s15 + $0x36] sm:$0x20] %vm692_vm3, %v772_v2 }
 0x28d   : > { %978 = vst.msk [vmem:[%s1368_s15 + $0x2c] sm:$0x2] %vm646_vm1, %v780_v3 }
 0x28e   : > { %986 = vst.msk [vmem:[%s1368_s15 + $0x32] sm:$0x8] %vm682_vm2, %v780_v3 }
 0x28f   : > { %994 = vst.msk [vmem:[%s1368_s15 + $0x38] sm:$0x20] %vm692_vm3, %v780_v3 }
 0x291   : > { %v784_v4 = vpop.permute.xlu1 %783 }
 0x292   : > { %979 = vst.msk [vmem:[%s1368_s15 + $0x2d] sm:$0x2] %vm646_vm1, %v784_v4 }
 0x293   : > { %987 = vst.msk [vmem:[%s1368_s15 + $0x33] sm:$0x8] %vm682_vm2, %v784_v4 }
 0x294   : > { %995 = vst.msk [vmem:[%s1368_s15 + $0x39] sm:$0x20] %vm692_vm3, %v784_v4 }
 0x295 PF: > { %s15_s18 = sadd.s32 1, %s1025_s18  }
 0x296   : > { %p12_p4 = scmp.ge.s32.totalorder %s15_s18, 4  }
 0x298   :  { %14 = sbr.rel (!%p12_p4) target bundleno = 1 (0x1), region = 81 }

// kernel: tile.83
= control target key start
LH: loop header
LB: loop body
LE: loop exit
PB: predicated region body
PF: predicated region fallthrough
CT: control target
= control target key end

     0   :  { %s22_s0 = inlined_call_operand.vmem [shape: f32[16], index: 0, kind: input, shape index: {}]   ;;  %s23_s1 = inlined_call_operand.vmem [shape: f32[8,16], index: 1, kind: output, shape index: {}]  }
   0x1   :  { %v4_v0 = vld [vmem:[%s22_s0] ss:$0 sm:$0xff] }
   0x2   :  { %5 = vst [vmem:[%s23_s1] sm:$0xff] %v4_v0 }

// kernel: tile.84
= control target key start
LH: loop header
LB: loop body
LE: loop exit
PB: predicated region body
PF: predicated region fallthrough
CT: control target
= control target key end

     0   :  { %s67_s10 = smov 112   ;;  %s68_s11 = smov 80   ;;  %vm3_vm0 = vcmask 130048   ;;  %vm9_vm1 = vcmask 1048448   ;;  %vm15_vm2 = vcmask 917248   ;;  %vm21_vm3 = vcmask 786048   ;;  %s111_s0 = inlined_call_operand.vmem [shape: f32[8,16], index: 0, kind: input, shape index: {}]   ;;  %s112_s1 = inlined_call_operand.vmem [shape: f32[128], index: 1, kind: output, shape index: {}]  }
   0x1   :  { %v53_v0 = vld [vmem:[%s111_s0 + $0x7] sm:$0x1]   ;;  %v55_v1 = vld [vmem:[%s111_s0 + $0x5] sm:$0x1]   ;;  %v57_v2 = vld [vmem:[%s111_s0 + $0x3] sm:$0x1]  }
   0x2   :  { %7 = vrot.lane.b32.xlu0 %v53_v0, %s67_s10  ;;  %19 = vrot.lane.b32.xlu1 %v55_v1, %s68_s11  ;;  %s69_s14 = smov 48   ;;  %v54_v3 = vld [vmem:[%s111_s0 + $0x6] sm:$0x1]   ;;  %v56_v4 = vld [vmem:[%s111_s0 + $0x4] sm:$0x1]   ;;  %s70_s21 = smov 96  }
   0x3   :  { %31 = vrot.lane.b32.xlu2 %v57_v2, %s69_s14  ;;  %v58_v5 = vld [vmem:[%s111_s0 + $0x2] sm:$0x1]   ;;  %s71_s22 = smov 64   ;;  %s72_s23 = smov 32   ;;  %v59_v6 = vld [vmem:[%s111_s0 + $0x1] sm:$0x1]  }
   0x4   :  { %s73_s26 = smov 16   ;;  %v2_v7 = vld [vmem:[%s111_s0] sm:$0x1]   ;;  %vm27_vm4 = vcmask 654848   ;;  %vm33_vm5 = vcmask 523648   ;;  %vm39_vm6 = vcmask 392448  }
   0x5   :  { %4 = vst.msk [vmem:[#allocation0] sm:$0x1] %vm3_vm0, %v2_v7   ;;  %vm45_vm7 = vcmask 261248  }
   0xa   :  { %13 = vrot.lane.b32.xlu0 %v54_v3, %s70_s21  ;;  %25 = vrot.lane.b32.xlu1 %v56_v4, %s71_s22 }
   0xb   :  { %37 = vrot.lane.b32.xlu2 %v58_v5, %s72_s23 }
  0x12   :  { %43 = vrot.lane.b32.xlu0 %v59_v6, %s73_s26 }
  0x5d   :  { %v32_v8 = vpop.permute.xlu2 %31  }
  0x65   :  { %v38_v9 = vpop.permute.xlu2 %37  }
  0x74   :  { %v8_v10 = vpop.permute.xlu0 %7   ;;  %v20_v11 = vpop.permute.xlu1 %19  }
  0x75   :  { %10 = vst.msk [vmem:[#allocation0] sm:$0x1] %vm9_vm1, %v8_v10  }
  0x7c   :  { %v14_v12 = vpop.permute.xlu0 %13   ;;  %v26_v13 = vpop.permute.xlu1 %25  }
  0x7d   :  { %16 = vst.msk [vmem:[#allocation0] sm:$0x1] %vm15_vm2, %v14_v12  }
  0x7e   :  { %22 = vst.msk [vmem:[#allocation0] sm:$0x1] %vm21_vm3, %v20_v11  }
  0x7f   :  { %28 = vst.msk [vmem:[#allocation0] sm:$0x1] %vm27_vm4, %v26_v13  }
  0x80   :  { %34 = vst.msk [vmem:[#allocation0] sm:$0x1] %vm33_vm5, %v32_v8  }
  0x81   :  { %40 = vst.msk [vmem:[#allocation0] sm:$0x1] %vm39_vm6, %v38_v9  }
  0x84   :  { %v44_v14 = vpop.permute.xlu0 %43  }
  0x85   :  { %46 = vst.msk [vmem:[#allocation0] sm:$0x1] %vm45_vm7, %v44_v14  }
  0x8c   :  { %v49_v15 = vld [vmem:[#allocation0] sm:$0x1] }
  0x8d   :  { %52 = vst [vmem:[%s112_s1] sm:$0x1] %v49_v15 }

// kernel: tile.89
= control target key start
LH: loop header
LB: loop body
LE: loop exit
PB: predicated region body
PF: predicated region fallthrough
CT: control target
= control target key end

     0   :  { %s67_s10 = smov 112   ;;  %s68_s11 = smov 80   ;;  %vm3_vm0 = vcmask 130048   ;;  %vm9_vm1 = vcmask 1048448   ;;  %vm15_vm2 = vcmask 917248   ;;  %vm21_vm3 = vcmask 786048   ;;  %s111_s0 = inlined_call_operand.vmem [shape: f32[8,16], index: 0, kind: input, shape index: {}]   ;;  %s112_s1 = inlined_call_operand.vmem [shape: f32[1,128], index: 1, kind: output, shape index: {}]  }
   0x1   :  { %v53_v0 = vld [vmem:[%s111_s0 + $0x7] sm:$0x1]   ;;  %v55_v1 = vld [vmem:[%s111_s0 + $0x5] sm:$0x1]   ;;  %v57_v2 = vld [vmem:[%s111_s0 + $0x3] sm:$0x1]  }
   0x2   :  { %7 = vrot.lane.b32.xlu0 %v53_v0, %s67_s10  ;;  %19 = vrot.lane.b32.xlu1 %v55_v1, %s68_s11  ;;  %s69_s14 = smov 48   ;;  %v54_v3 = vld [vmem:[%s111_s0 + $0x6] sm:$0x1]   ;;  %v56_v4 = vld [vmem:[%s111_s0 + $0x4] sm:$0x1]   ;;  %s70_s21 = smov 96  }
   0x3   :  { %31 = vrot.lane.b32.xlu2 %v57_v2, %s69_s14  ;;  %v58_v5 = vld [vmem:[%s111_s0 + $0x2] sm:$0x1]   ;;  %s71_s22 = smov 64   ;;  %s72_s23 = smov 32   ;;  %v59_v6 = vld [vmem:[%s111_s0 + $0x1] sm:$0x1]  }
   0x4   :  { %s73_s26 = smov 16   ;;  %v2_v7 = vld [vmem:[%s111_s0] sm:$0x1]   ;;  %vm27_vm4 = vcmask 654848   ;;  %vm33_vm5 = vcmask 523648   ;;  %vm39_vm6 = vcmask 392448  }
   0x5   :  { %4 = vst.msk [vmem:[#allocation0] sm:$0x1] %vm3_vm0, %v2_v7   ;;  %vm45_vm7 = vcmask 261248  }
   0xa   :  { %13 = vrot.lane.b32.xlu0 %v54_v3, %s70_s21  ;;  %25 = vrot.lane.b32.xlu1 %v56_v4, %s71_s22 }
   0xb   :  { %37 = vrot.lane.b32.xlu2 %v58_v5, %s72_s23 }
  0x12   :  { %43 = vrot.lane.b32.xlu0 %v59_v6, %s73_s26 }
  0x5d   :  { %v32_v8 = vpop.permute.xlu2 %31  }
  0x65   :  { %v38_v9 = vpop.permute.xlu2 %37  }
  0x74   :  { %v8_v10 = vpop.permute.xlu0 %7   ;;  %v20_v11 = vpop.permute.xlu1 %19  }
  0x75   :  { %10 = vst.msk [vmem:[#allocation0] sm:$0x1] %vm9_vm1, %v8_v10  }
  0x7c   :  { %v14_v12 = vpop.permute.xlu0 %13   ;;  %v26_v13 = vpop.permute.xlu1 %25  }
  0x7d   :  { %16 = vst.msk [vmem:[#allocation0] sm:$0x1] %vm15_vm2, %v14_v12  }
  0x7e   :  { %22 = vst.msk [vmem:[#allocation0] sm:$0x1] %vm21_vm3, %v20_v11  }
  0x7f   :  { %28 = vst.msk [vmem:[#allocation0] sm:$0x1] %vm27_vm4, %v26_v13  }
  0x80   :  { %34 = vst.msk [vmem:[#allocation0] sm:$0x1] %vm33_vm5, %v32_v8  }
  0x81   :  { %40 = vst.msk [vmem:[#allocation0] sm:$0x1] %vm39_vm6, %v38_v9  }
  0x84   :  { %v44_v14 = vpop.permute.xlu0 %43  }
  0x85   :  { %46 = vst.msk [vmem:[#allocation0] sm:$0x1] %vm45_vm7, %v44_v14  }
  0x8c   :  { %v49_v15 = vld [vmem:[#allocation0] sm:$0x1] }
  0x8d   :  { %52 = vst [vmem:[%s112_s1] sm:$0x1] %v49_v15 }

// kernel: pyramid_feature.5
= control target key start
LH: loop header
LB: loop body
LE: loop exit
PB: predicated region body
PF: predicated region fallthrough
CT: control target
= control target key end

     0   :  { %s819_s18 = smov 0   ;;  %s1182_s0 = inlined_call_operand.vmem [shape: f32[2,8,64], index: 0, kind: input, shape index: {}]   ;;  %s1183_s1 = inlined_call_operand.vmem [shape: f32[3,64,256], index: 1, kind: input, shape index: {}]   ;;  %s1184_s2 = inlined_call_operand.vmem [shape: f32[1,256], index: 2, kind: input, shape index: {}]   ;;  %s1185_s3 = inlined_call_operand.vmem [shape: f32[3,128,128], index: 3, kind: input, shape index: {}]   ;;  %s1186_s4 = inlined_call_operand.vmem [shape: f32[1,128], index: 4, kind: input, shape index: {}]   ;;  %s1187_s5 = inlined_call_operand.vmem [shape: f32[2,4,4,16], index: 5, kind: output, shape index: {}]  }
   0x1 LB: > { %s669_s19 = sadd.s32 4294967295, %s782_s18   ;;  %p673_p0 = scmp.ge.s32.totalorder %s782_s18, 1  ;;  %s782_s18 = sphi %s819_s18, %s15_s18  }
   0x2   : > { %p186_p1 = scmp.lt.s32.totalorder %s782_s18, 3 }
   0x4   : > { %p187_p2 = pnand %p673_p0, %p186_p1 }
   0x5   : > { %p213_p3 = scmp.lt.s32.totalorder (!%p187_p2), %s669_s19, 1  ;;  %s786_s12 = smov (!%p187_p2), 112  }
   0x6   : > { %190 = sbr.rel (%p187_p2) target bundleno = 593 (0x251), region = 40  ;;  %s787_s17 = smov (!%p187_p2), 48  }
   0xb   : > { %v691_v0 = vld [vmem:[%s1183_s1 + $0xf0] sm:$0xff]  ;;  %v689_v1 = vld [vmem:[%s1183_s1 + $0xe0] sm:$0xff]  ;;  %vm222_vm0 = vcmask 523264   ;;  %v784_v3 = vmov 0.0   ;;  %s1189_s19 = smov (!%p213_p3, %s669_s19), 1  ;;  %v244_v8 = vld [vmem:[%s1183_s1 + $0x78] sm:$0xff] }
   0xc   : > { %274 = vmatpush.msra.mxu1 %v691_v0  ;;  %v243_v2 = vld [vmem:[%s1183_s1 + $0x70] sm:$0xff]  ;;  %223 = vst.msk [vmem:[#allocation2] sm:$0xff] %vm222_vm0, %v784_v3  ;;  %v241_v5 = vld [vmem:[%s1183_s1 + $0x60] sm:$0xff]  ;;  %s674_s11 = sshll.u32 %s1189_s19, 3  ;;  %337 = vmatpush.msra.mxu3 %v244_v8  ;;  %v242_v12 = vld [vmem:[%s1183_s1 + $0x68] sm:$0xff]  ;;  %s761_s13 = sshll.u32 %s1189_s19, 4 }
   0xd   : > { %v687_v4 = vld [vmem:[%s1183_s1 + $0xd0] sm:$0xff]  ;;  %317 = vmatpush.msra.mxu2 %v243_v2  ;;  %224 = vst.msk [vmem:[#allocation2 + $0x8] sm:$0xff] %vm222_vm0, %v784_v3  ;;  %v685_v7 = vld [vmem:[%s1183_s1 + $0xc0] sm:$0xff]  ;;  %s216_s26 = scalar_lea.vmem %s1182_s0, %s674_s11  ;;  %v240_v15 = vld [vmem:[%s1183_s1 + $0x58] sm:$0xff]  ;;  %s785_s11 = smov 96   ;;  %vm555_vm1 = vcmask 122880  }
   0xe   : > { %275 = vmatpush.msra.mxu1 %v689_v1  ;;  %v239_v6 = vld [vmem:[%s1183_s1 + $0x50] sm:$0xff]  ;;  %225 = vst.msk [vmem:[#allocation2 + $0x10] sm:$0xff] %vm222_vm0, %v784_v3  ;;  %v237_v9 = vld [vmem:[%s1183_s1 + $0x40] sm:$0xff]  ;;  %338 = vmatpush.msra.mxu3 %v242_v12  ;;  %v238_v18 = vld [vmem:[%s1183_s1 + $0x48] sm:$0xff]  ;;  %s1143_s16 = scalar_lea.vmem %s1187_s5, %s761_s13  ;;  %vm603_vm2 = vcmask 125955   ;;  %vm609_vm3 = vcmask 128005  }
   0xf   : > { %318 = vmatpush.msra.mxu2 %v241_v5  ;;  %421 = vst [vmem:[#allocation3] sm:$0xff] %v784_v3  ;;  %v711_v10 = vld [vmem:[%s1183_s1 + $0x170] sm:$0xff]  ;;  %v709_v13 = vld [vmem:[%s1183_s1 + $0x160] sm:$0xff]  ;;  %v236_v23 = vld [vmem:[%s1183_s1 + $0x38] sm:$0xff]  ;;  %vm583_vm4 = vcmask 123905   ;;  %s788_s19 = smov 80  }
  0x10   : > { %276 = vmatpush.msra.mxu1 %v687_v4  ;;  %423 = vst [vmem:[#allocation3 + $0x10] sm:$0xff] %v784_v3  ;;  %v683_v11 = vld [vmem:[%s1183_s1 + $0xb0] sm:$0xff]  ;;  %378 = vmatpush.msra.mxu0 %v711_v10  ;;  %v681_v17 = vld [vmem:[%s1183_s1 + $0xa0] sm:$0xff]  ;;  %v234_v27 = vld [vmem:[%s1183_s1 + $0x28] sm:$0xff] }
  0x11   : > { %319 = vmatpush.msra.mxu2 %v239_v6  ;;  %v235_v14 = vld [vmem:[%s1183_s1 + $0x30] sm:$0xff]  ;;  %v233_v19 = vld [vmem:[%s1183_s1 + $0x20] sm:$0xff]  ;;  %339 = vmatpush.msra.mxu3 %v240_v15  ;;  %v692_v28 = vld [vmem:[%s1183_s1 + $0xf8] sm:$0xff] }
  0x12   : > { %277 = vmatpush.msra.mxu1 %v685_v7  ;;  %v707_v16 = vld [vmem:[%s1183_s1 + $0x150] sm:$0xff]  ;;  %379 = vmatpush.msra.mxu0 %v709_v13  ;;  %v705_v20 = vld [vmem:[%s1183_s1 + $0x140] sm:$0xff]  ;;  %v232_v31 = vld [vmem:[%s1183_s1 + $0x18] sm:$0xff] }
  0x13   : > { %320 = vmatpush.msra.mxu2 %v237_v9  ;;  %v226_v21 = vld [vmem:[%s216_s26] sm:$0xff]  ;;  %v679_v22 = vld [vmem:[%s1183_s1 + $0x90] sm:$0xff]  ;;  %340 = vmatpush.msra.mxu3 %v238_v18  ;;  %v690_v32 = vld [vmem:[%s1183_s1 + $0xe8] sm:$0xff] }
  0x14   : > { %278 = vmatpush.msra.mxu1 %v683_v11  ;;  %380 = vmatpush.msra.mxu0 %v707_v16  ;;  %227 = vst.msk [vmem:[#allocation2 + $0x8] sm:$0xff] %vm222_vm0, %v226_v21  ;;  %v231_v24 = vld [vmem:[%s1183_s1 + $0x10] sm:$0xff]  ;;  %v677_v26 = vld [vmem:[%s1183_s1 + $0x80] sm:$0xff]  ;;  %v688_v33 = vld [vmem:[%s1183_s1 + $0xd8] sm:$0xff] }
  0x15   : > { %321 = vmatpush.msra.mxu2 %v235_v14  ;;  %v703_v25 = vld [vmem:[%s1183_s1 + $0x130] sm:$0xff]  ;;  %v229_v29 = vld [vmem:[%s1183_s1] sm:$0xff]  ;;  %341 = vmatpush.msra.mxu3 %v236_v23  ;;  %v230_v37 = vld [vmem:[%s1183_s1 + $0x8] sm:$0xff] }
  0x16   : > { %279 = vmatpush.msra.mxu1 %v681_v17  ;;  %381 = vmatpush.msra.mxu0 %v705_v20  ;;  %v701_v30 = vld [vmem:[%s1183_s1 + $0x120] sm:$0xff]  ;;  %v699_v34 = vld [vmem:[%s1183_s1 + $0x110] sm:$0xff]  ;;  %v686_v39 = vld [vmem:[%s1183_s1 + $0xc8] sm:$0xff] }
  0x17   : > { %322 = vmatpush.msra.mxu2 %v233_v19  ;;  %342 = vmatpush.msra.mxu3 %v234_v27  ;;  %v697_v38 = vld [vmem:[%s1183_s1 + $0x100] sm:$0xff]  ;;  %v684_v41 = vld [vmem:[%s1183_s1 + $0xb8] sm:$0xff]  ;;  %v682_v42 = vld [vmem:[%s1183_s1 + $0xa8] sm:$0xff] }
  0x18   : > { %280 = vmatpush.msra.mxu1 %v679_v22  ;;  %382 = vmatpush.msra.mxu0 %v703_v25  ;;  %v680_v43 = vld [vmem:[%s1183_s1 + $0x98] sm:$0xff]  ;;  %v678_v44 = vld [vmem:[%s1183_s1 + $0x88] sm:$0xff]  ;;  %v729_v54 = vld [vmem:[%s1185_s3 + $0xf0] sm:$0xff] }
  0x19   : > { %323 = vmatpush.msra.mxu2 %v231_v24  ;;  %343 = vmatpush.msra.mxu3 %v232_v31  ;;  %v712_v45 = vld [vmem:[%s1183_s1 + $0x178] sm:$0xff]  ;;  %v710_v46 = vld [vmem:[%s1183_s1 + $0x168] sm:$0xff]  ;;  %v727_v58 = vld [vmem:[%s1185_s3 + $0xe0] sm:$0xff] }
  0x1a   : > { %281 = vmatpush.msra.mxu1 %v677_v26  ;;  %383 = vmatpush.msra.mxu0 %v701_v30  ;;  %v708_v47 = vld [vmem:[%s1183_s1 + $0x158] sm:$0xff]  ;;  %v706_v48 = vld [vmem:[%s1183_s1 + $0x148] sm:$0xff]  ;;  %v440_v59 = vld [vmem:[%s1185_s3 + $0x70] sm:$0xff] }
  0x1b   : > { %324 = vmatpush.msra.mxu2 %v229_v29  ;;  %v228_v35 = vld [vmem:[#allocation2 + $0x7] sm:$0xff]  ;;  %344 = vmatpush.msra.mxu3 %v230_v37  ;;  %v704_v49 = vld [vmem:[%s1183_s1 + $0x138] sm:$0xff]  ;;  %v745_v60 = vld [vmem:[%s1185_s3 + $0x170] sm:$0xff] }
  0x1c   : > { %294 = vmatpush.msrb.mxu1 %v692_v28  ;;  %v245_v36 = vld [vmem:[#allocation2 + $0x8] sm:$0xff]  ;;  %695 = vmatmul.msk.f32.vlgmr.msra.gmra.mxu2 %vm222_vm0, %v228_v35  ;;  %v700_v51 = vld [vmem:[%s1183_s1 + $0x118] sm:$0xff]  ;;  %v438_v63 = vld [vmem:[%s1185_s3 + $0x60] sm:$0xff] }
  0x1d   : > { %384 = vmatpush.msra.mxu0 %v699_v34  ;;  %693 = vmatmul.msk.f32.vlgmr.msra.gmra.mxu1 %vm222_vm0, %v245_v36  ;;  %v349_v40 = vld [vmem:[#allocation2 + $0x9] sm:$0xff]  ;;  %v730_v53 = vld [vmem:[%s1185_s3 + $0xf8] sm:$0xff]  ;;  %v743_v0 = vld [vmem:[%s1185_s3 + $0x160] sm:$0xff] }
  0x1e   : > { %295 = vmatpush.msrb.mxu1 %v690_v32  ;;  %696 = vmatmul.msk.f32.vlgmr.msra.gmra.mxu3 %vm222_vm0, %v228_v35  ;;  %v702_v50 = vld [vmem:[%s1183_s1 + $0x128] sm:$0xff]  ;;  %v441_v55 = vld [vmem:[%s1185_s3 + $0x78] sm:$0xff]  ;;  %v725_v2 = vld [vmem:[%s1185_s3 + $0xd0] sm:$0xff] }
  0x1f   : > { %385 = vmatpush.msra.mxu0 %v697_v38  ;;  %v698_v52 = vld [vmem:[%s1183_s1 + $0x108] sm:$0xff]  ;;  %460 = vmatpush.msrb.mxu2 %v730_v53  ;;  %v746_v56 = vld [vmem:[%s1185_s3 + $0x178] sm:$0xff]  ;;  %v436_v6 = vld [vmem:[%s1185_s3 + $0x50] sm:$0xff] }
  0x20   : > { %296 = vmatpush.msrb.mxu1 %v688_v33  ;;  %713 = vmatmul.msk.f32.vlgmr.msra.gmra.mxu0 %vm222_vm0, %v349_v40  ;;  %v728_v57 = vld [vmem:[%s1185_s3 + $0xe8] sm:$0xff]  ;;  %v726_v1 = vld [vmem:[%s1185_s3 + $0xd8] sm:$0xff]  ;;  %v741_v7 = vld [vmem:[%s1185_s3 + $0x150] sm:$0xff] }
  0x21   : > { %461 = vmatpush.msrb.mxu2 %v729_v54  ;;  %480 = vmatpush.msrb.mxu3 %v441_v55  ;;  %v439_v61 = vld [vmem:[%s1185_s3 + $0x68] sm:$0xff]  ;;  %v437_v3 = vld [vmem:[%s1185_s3 + $0x58] sm:$0xff]  ;;  %v723_v8 = vld [vmem:[%s1185_s3 + $0xc0] sm:$0xff] }
  0x22   : > { %297 = vmatpush.msrb.mxu1 %v686_v39  ;;  %518 = vmatpush.msrb.mxu0 %v746_v56  ;;  %v744_v62 = vld [vmem:[%s1185_s3 + $0x168] sm:$0xff]  ;;  %v742_v4 = vld [vmem:[%s1185_s3 + $0x158] sm:$0xff]  ;;  %v434_v12 = vld [vmem:[%s1185_s3 + $0x40] sm:$0xff] }
  0x23   : > { %462 = vmatpush.msrb.mxu2 %v728_v57  ;;  %481 = vmatpush.msrb.mxu3 %v440_v59  ;;  %v724_v5 = vld [vmem:[%s1185_s3 + $0xc8] sm:$0xff]  ;;  %v722_v11 = vld [vmem:[%s1185_s3 + $0xb8] sm:$0xff]  ;;  %v739_v13 = vld [vmem:[%s1185_s3 + $0x140] sm:$0xff] }
  0x24   : > { %298 = vmatpush.msrb.mxu1 %v684_v41  ;;  %519 = vmatpush.msrb.mxu0 %v745_v60  ;;  %v435_v9 = vld [vmem:[%s1185_s3 + $0x48] sm:$0xff]  ;;  %v721_v14 = vld [vmem:[%s1185_s3 + $0xb0] sm:$0xff]  ;;  %v719_v16 = vld [vmem:[%s1185_s3 + $0xa0] sm:$0xff] }
  0x25   : > { %463 = vmatpush.msrb.mxu2 %v727_v58  ;;  %482 = vmatpush.msrb.mxu3 %v439_v61  ;;  %v740_v10 = vld [vmem:[%s1185_s3 + $0x148] sm:$0xff]  ;;  %v433_v17 = vld [vmem:[%s1185_s3 + $0x38] sm:$0xff]  ;;  %v432_v20 = vld [vmem:[%s1185_s3 + $0x30] sm:$0xff] }
  0x26   : > { %299 = vmatpush.msrb.mxu1 %v682_v42  ;;  %520 = vmatpush.msrb.mxu0 %v744_v62  ;;  %v720_v15 = vld [vmem:[%s1185_s3 + $0xa8] sm:$0xff]  ;;  %v738_v18 = vld [vmem:[%s1185_s3 + $0x138] sm:$0xff]  ;;  %v737_v21 = vld [vmem:[%s1185_s3 + $0x130] sm:$0xff] }
  0x27   : > { %464 = vmatpush.msrb.mxu2 %v726_v1  ;;  %483 = vmatpush.msrb.mxu3 %v438_v63  ;;  %v718_v19 = vld [vmem:[%s1185_s3 + $0x98] sm:$0xff]  ;;  %v717_v22 = vld [vmem:[%s1185_s3 + $0x90] sm:$0xff]  ;;  %v431_v23 = vld [vmem:[%s1185_s3 + $0x28] sm:$0xff] }
  0x28   : > { %300 = vmatpush.msrb.mxu1 %v680_v43  ;;  %521 = vmatpush.msrb.mxu0 %v743_v0  ;;  %v736_v24 = vld [vmem:[%s1185_s3 + $0x128] sm:$0xff]  ;;  %v430_v26 = vld [vmem:[%s1185_s3 + $0x20] sm:$0xff]  ;;  %v429_v29 = vld [vmem:[%s1185_s3 + $0x18] sm:$0xff] }
  0x29   : > { %465 = vmatpush.msrb.mxu2 %v725_v2  ;;  %484 = vmatpush.msrb.mxu3 %v437_v3  ;;  %v716_v25 = vld [vmem:[%s1185_s3 + $0x88] sm:$0xff]  ;;  %v735_v27 = vld [vmem:[%s1185_s3 + $0x120] sm:$0xff]  ;;  %v734_v30 = vld [vmem:[%s1185_s3 + $0x118] sm:$0xff] }
  0x2a   : > { %301 = vmatpush.msrb.mxu1 %v678_v44  ;;  %522 = vmatpush.msrb.mxu0 %v742_v4  ;;  %v715_v28 = vld [vmem:[%s1185_s3 + $0x80] sm:$0xff]  ;;  %v428_v31 = vld [vmem:[%s1185_s3 + $0x10] sm:$0xff]  ;;  %v427_v35 = vld [vmem:[%s1185_s3 + $0x8] sm:$0xff] }
  0x2b   : > { %694 = vmatmul.msk.f32.vlgmr.msrb.gmra.mxu1 %vm222_vm0, %v245_v36  ;;  %466 = vmatpush.msrb.mxu2 %v724_v5  ;;  %v412_v33 = vld [vmem:[%s1184_s2] sm:$0x3]  ;;  %v733_v34 = vld [vmem:[%s1185_s3 + $0x110] sm:$0xff]  ;;  %v732_v36 = vld [vmem:[%s1185_s3 + $0x108] sm:$0xff] }
  0x2c   : > { %398 = vmatpush.msra.mxu1 %v712_v45  ;;  %485 = vmatpush.msrb.mxu3 %v436_v6  ;;  %v426_v41 = vld [vmem:[%s1185_s3] sm:$0xff] }
  0x2d   : > { %523 = vmatpush.msrb.mxu0 %v741_v7  ;;  %467 = vmatpush.msrb.mxu2 %v723_v8  ;;  %v731_v42 = vld [vmem:[%s1185_s3 + $0x100] sm:$0xff] }
  0x2e   : > { %399 = vmatpush.msra.mxu1 %v710_v46  ;;  %486 = vmatpush.msrb.mxu3 %v435_v9  ;;  %v775_v58 = vld [vmem:[%s1186_s4] ss:$0 sm:$0xff] }
  0x2f   : > { %524 = vmatpush.msrb.mxu0 %v740_v10  ;;  %468 = vmatpush.msrb.mxu2 %v722_v11 }
  0x30   : > { %400 = vmatpush.msra.mxu1 %v708_v47  ;;  %487 = vmatpush.msrb.mxu3 %v434_v12 }
  0x31   : > { %525 = vmatpush.msrb.mxu0 %v739_v13  ;;  %469 = vmatpush.msrb.mxu2 %v721_v14 }
  0x32   : > { %401 = vmatpush.msra.mxu1 %v706_v48  ;;  %488 = vmatpush.msrb.mxu3 %v433_v17  ;;  %v415_v48 = vperm.slane %v412_v33, 1 }
  0x33   : > { %470 = vmatpush.msrb.mxu2 %v720_v15  ;;  %526 = vmatpush.msrb.mxu0 %v738_v18 }
  0x34   : > { %402 = vmatpush.msra.mxu1 %v704_v49  ;;  %489 = vmatpush.msrb.mxu3 %v432_v20 }
  0x35   : > { %471 = vmatpush.msrb.mxu2 %v719_v16  ;;  %527 = vmatpush.msrb.mxu0 %v737_v21 }
  0x36   : > { %403 = vmatpush.msra.mxu1 %v702_v50  ;;  %490 = vmatpush.msrb.mxu3 %v431_v23 }
  0x37   : > { %472 = vmatpush.msrb.mxu2 %v718_v19  ;;  %528 = vmatpush.msrb.mxu0 %v736_v24 }
  0x38   : > { %404 = vmatpush.msra.mxu1 %v700_v51  ;;  %491 = vmatpush.msrb.mxu3 %v430_v26 }
  0x39   : > { %473 = vmatpush.msrb.mxu2 %v717_v22  ;;  %529 = vmatpush.msrb.mxu0 %v735_v27 }
  0x3a   : > { %405 = vmatpush.msra.mxu1 %v698_v52  ;;  %492 = vmatpush.msrb.mxu3 %v429_v29 }
  0x3b   : > { %714 = vmatmul.msk.f32.vlgmr.msra.gmra.mxu1 %vm222_vm0, %v349_v40  ;;  %474 = vmatpush.msrb.mxu2 %v716_v25  ;;  %v414_v40 = vperm.slane %v412_v33, 0 }
  0x3c   : > { %530 = vmatpush.msrb.mxu0 %v734_v30  ;;  %493 = vmatpush.msrb.mxu3 %v428_v31 }
  0x3d   : > { %475 = vmatpush.msrb.mxu2 %v715_v28 }
  0x3e   : > { %531 = vmatpush.msrb.mxu0 %v733_v34  ;;  %494 = vmatpush.msrb.mxu3 %v427_v35 }
  0x40   : > { %532 = vmatpush.msrb.mxu0 %v732_v36  ;;  %495 = vmatpush.msrb.mxu3 %v426_v41 }
  0x42   : > { %533 = vmatpush.msrb.mxu0 %v731_v42 }
  0x9a   : > { %v283_v32 = vpop.f32.mrf.mxu1 }
  0x9d   : > { %v387_v38 = vpop.f32.mrf.mxu0 }
  0x9f   : > { %v326_v37 = vpop.f32.mrf.mxu2 }
  0xa0   : > { %v327_v39 = vadd.f32 %v326_v37, %v283_v32 }
  0xa1   : > { %v346_v46 = vpop.f32.mrf.mxu3 }
  0xa2   : > { %v410_v43 = vadd.f32 %v387_v38, %v327_v39 }
  0xa4   : > { %v418_v44 = vadd.f32 %v414_v40, %v410_v43 }
  0xa8   : > { %v303_v45 = vpop.f32.mrf.mxu1 }
  0xa9   : > { %v347_v47 = vadd.f32 %v346_v46, %v303_v45 }
  0xb8   : > { %v407_v49 = vpop.f32.mrf.mxu1 }
  0xb9   : > { %v411_v50 = vadd.f32 %v407_v49, %v347_v47 }
  0xbb   : > { %v419_v51 = vadd.f32 %v415_v48, %v411_v50 }
  0xbd   : > { %v420_v52 = vmax.f32 %v419_v51, 0.0 }
  0xbf   : > { %424 = vst [vmem:[#allocation3 + $0x8] sm:$0xff] %v420_v52  ;;  %476 = vmatmul.f32.vlgmr.msrb.gmra.mxu2 %v420_v52 }
  0xc6   : > { %v425_v53 = vld [vmem:[#allocation3 + $0x7] sm:$0xff] }
  0xc7   : > { %v500_v54 = vld [vmem:[#allocation3 + $0x9] sm:$0xff]  ;;  %496 = vmatmul.f32.vlgmr.msrb.gmra.mxu3 %v425_v53 }
  0xc8   : > { %534 = vmatmul.f32.vlgmr.msrb.gmra.mxu0 %v500_v54 }
 0x142   : > { %v477_v55 = vpop.f32.mrf.mxu2 }
 0x145   : > { %v535_v59 = vpop.f32.mrf.mxu0 }
 0x14a   : > { %v497_v56 = vpop.f32.mrf.mxu3 }
 0x14b   : > { %v498_v57 = vadd.f32 %v497_v56, %v477_v55 }
 0x14d   : > { %v538_v60 = vadd.f32 %v535_v59, %v498_v57 }
 0x14f   : > { %v543_v61 = vadd.f32 %v775_v58, %v538_v60 }
 0x151   : > { %v544_v62 = vmax.f32 %v543_v61, 0.0 }
 0x153   : > { %v545_v63 = vadd.f32 %v544_v62, %v418_v44 }
 0x155   : > { %v547_v0 = vrot.slane %v545_v63, 1  ;;  %v574_v2 = vrot.slane %v545_v63, 2 }
 0x157   : > { %v549_v1 = vmax.f32 %v545_v63, %v547_v0 }
 0x159   : > { %557 = vrot.lane.b32.xlu1 %v549_v1, %s785_s11  ;;  %551 = vrot.lane.b32.xlu0 %v549_v1, %s786_s12  ;;  %v576_v3 = vmax.f32 %v549_v1, %v574_v2 }
 0x161   : > { %585 = vrot.lane.b32.xlu1 %v576_v3, %s785_s11  ;;  %578 = vrot.lane.b32.xlu0 %v576_v3, %s786_s12 }
 0x1cb   : > { %v558_v4 = vpop.permute.xlu1 %557  ;;  %v552_v5 = vpop.permute.xlu0 %551 }
 0x1cc   : > { %v554_v6 = vmax.f32 %v549_v1, %v552_v5 }
 0x1ce   : > { %556 = vst.msk [vmem:[%s1143_s16] sm:$0x1] %vm555_vm1, %v554_v6  ;;  %v560_v7 = vmax.f32 %v554_v6, %v558_v4 }
 0x1d0   : > { %562 = vrot.lane.b32.xlu2 %v560_v7, %s786_s12  ;;  %570 = vrot.lane.b32.xlu0 %v560_v7, %s787_s17 }
 0x1d3   : > { %v579_v8 = vpop.permute.xlu0 %578  ;;  %v586_v10 = vpop.permute.xlu1 %585 }
 0x1d4   : > { %v581_v9 = vmax.f32 %v576_v3, %v579_v8 }
 0x1d6   : > { %v588_v11 = vmax.f32 %v581_v9, %v586_v10  ;;  %751 = vst.msk [vmem:[%s1143_s16 + $0x5] sm:$0x8] %vm603_vm2, %v581_v9 }
 0x1d7   : > { %755 = vst.msk [vmem:[%s1143_s16 + $0x7] sm:$0x20] %vm609_vm3, %v581_v9 }
 0x1d8   : > { %566 = vrot.lane.b32.xlu2 %v560_v7, %s788_s19  ;;  %598 = vrot.lane.b32.xlu0 %v588_v11, %s787_s17  ;;  %747 = vst.msk [vmem:[%s1143_s16 + $0x3] sm:$0x2] %vm583_vm4, %v581_v9 }
 0x1d9   : > { %590 = vrot.lane.b32.xlu1 %v588_v11, %s786_s12 }
 0x1e0   : > { %594 = vrot.lane.b32.xlu2 %v588_v11, %s788_s19 }
 0x22a   : > { %v563_v12 = vpop.permute.xlu2 %562 }
 0x22b   : > { %565 = vst.msk [vmem:[%s1143_s16 + $0x1] sm:$0x1] %vm555_vm1, %v563_v12 }
 0x232   : > { %v567_v13 = vpop.permute.xlu2 %566 }
 0x233   : > { %569 = vst.msk [vmem:[%s1143_s16 + $0x2] sm:$0x1] %vm555_vm1, %v567_v13 }
 0x23a   : > { %v595_v14 = vpop.permute.xlu2 %594 }
 0x23b   : > { %749 = vst.msk [vmem:[%s1143_s16 + $0x5] sm:$0x2] %vm583_vm4, %v595_v14 }
 0x23c   : > { %753 = vst.msk [vmem:[%s1143_s16 + $0x7] sm:$0x8] %vm603_vm2, %v595_v14 }
 0x23d   : > { %757 = vst.msk [vmem:[%s1143_s16 + $0x9] sm:$0x20] %vm609_vm3, %v595_v14 }
 0x242   : > { %v571_v15 = vpop.permute.xlu0 %570 }
 0x243   : > { %573 = vst.msk [vmem:[%s1143_s16 + $0x3] sm:$0x1] %vm555_vm1, %v571_v15 }
 0x24a   : > { %v599_v16 = vpop.permute.xlu0 %598 }
 0x24b   : > { %v591_v17 = vpop.permute.xlu1 %590  ;;  %750 = vst.msk [vmem:[%s1143_s16 + $0x6] sm:$0x2] %vm583_vm4, %v599_v16 }
 0x24c   : > { %748 = vst.msk [vmem:[%s1143_s16 + $0x4] sm:$0x2] %vm583_vm4, %v591_v17 }
 0x24d   : > { %752 = vst.msk [vmem:[%s1143_s16 + $0x6] sm:$0x8] %vm603_vm2, %v591_v17 }
 0x24e   : > { %756 = vst.msk [vmem:[%s1143_s16 + $0x8] sm:$0x20] %vm609_vm3, %v591_v17 }
 0x24f   : > { %754 = vst.msk [vmem:[%s1143_s16 + $0x8] sm:$0x8] %vm603_vm2, %v599_v16 }
 0x250   : > { %758 = vst.msk [vmem:[%s1143_s16 + $0xa] sm:$0x20] %vm609_vm3, %v599_v16 }
 0x251 PF: > { %s15_s18 = sadd.s32 1, %s782_s18  }
 0x252   : > { %p12_p4 = scmp.ge.s32.totalorder %s15_s18, 4  }
 0x254   :  { %14 = sbr.rel (!%p12_p4) target bundleno = 1 (0x1), region = 77 }

// kernel: tile.98
= control target key start
LH: loop header
LB: loop body
LE: loop exit
PB: predicated region body
PF: predicated region fallthrough
CT: control target
= control target key end

     0   :  { %s22_s0 = inlined_call_operand.vmem [shape: f32[32], index: 0, kind: input, shape index: {}]   ;;  %s23_s1 = inlined_call_operand.vmem [shape: f32[4,32], index: 1, kind: output, shape index: {}]  }
   0x1   :  { %v4_v0 = vld [vmem:[%s22_s0] ss:$0 sm:$0xff] }
   0x2   :  { %5 = vst [vmem:[%s23_s1] sm:$0xf] %v4_v0 }

// kernel: tile.99
= control target key start
LH: loop header
LB: loop body
LE: loop exit
PB: predicated region body
PF: predicated region fallthrough
CT: control target
= control target key end

     0   :  { %s37_s8 = smov 32   ;;  %s38_s9 = smov 64   ;;  %vm7_vm0 = vcmask 261120   ;;  %vm13_vm1 = vcmask 1048320   ;;  %vm19_vm2 = vcmask 785920   ;;  %vm25_vm3 = vcmask 523520   ;;  %s55_s0 = inlined_call_operand.vmem [shape: f32[4,32], index: 0, kind: input, shape index: {}]   ;;  %s56_s1 = inlined_call_operand.vmem [shape: f32[128], index: 1, kind: output, shape index: {}]  }
   0x1   :  { %v4_v0 = vld [vmem:[%s55_s0] sm:$0xf]  ;;  %s36_s0 = smov 96  }
   0x2   :  { %5 = vst [vmem:[#allocation1] sm:$0xf] %v4_v0 }
   0x9   :  { %v10_v1 = vld [vmem:[#allocation1 + $0x3] sm:$0x1]   ;;  %v22_v2 = vld [vmem:[#allocation1 + $0x1] sm:$0x1]   ;;  %v16_v3 = vld [vmem:[#allocation1 + $0x2] sm:$0x1]  }
   0xa   :  { %11 = vrot.lane.b32.xlu0 %v10_v1, %s36_s0  ;;  %23 = vrot.lane.b32.xlu1 %v22_v2, %s37_s8  ;;  %v6_v4 = vld [vmem:[#allocation1] sm:$0x1]  }
   0xb   :  { %8 = vst.msk [vmem:[#allocation0] sm:$0x1] %vm7_vm0, %v6_v4  }
  0x12   :  { %17 = vrot.lane.b32.xlu0 %v16_v3, %s38_s9 }
  0x7c   :  { %v12_v5 = vpop.permute.xlu0 %11   ;;  %v24_v6 = vpop.permute.xlu1 %23  }
  0x7d   :  { %14 = vst.msk [vmem:[#allocation0] sm:$0x1] %vm13_vm1, %v12_v5  }
  0x84   :  { %v18_v7 = vpop.permute.xlu0 %17  }
  0x85   :  { %20 = vst.msk [vmem:[#allocation0] sm:$0x1] %vm19_vm2, %v18_v7  }
  0x86   :  { %26 = vst.msk [vmem:[#allocation0] sm:$0x1] %vm25_vm3, %v24_v6  }
  0x8d   :  { %v29_v8 = vld [vmem:[#allocation0] sm:$0x1] }
  0x8e   :  { %32 = vst [vmem:[%s56_s1] sm:$0x1] %v29_v8 }

// kernel: tile.104
= control target key start
LH: loop header
LB: loop body
LE: loop exit
PB: predicated region body
PF: predicated region fallthrough
CT: control target
= control target key end

     0   :  { %s37_s8 = smov 32   ;;  %s38_s9 = smov 64   ;;  %vm7_vm0 = vcmask 261120   ;;  %vm13_vm1 = vcmask 1048320   ;;  %vm19_vm2 = vcmask 785920   ;;  %vm25_vm3 = vcmask 523520   ;;  %s55_s0 = inlined_call_operand.vmem [shape: f32[4,32], index: 0, kind: input, shape index: {}]   ;;  %s56_s1 = inlined_call_operand.vmem [shape: f32[1,128], index: 1, kind: output, shape index: {}]  }
   0x1   :  { %v4_v0 = vld [vmem:[%s55_s0] sm:$0xf]  ;;  %s36_s0 = smov 96  }
   0x2   :  { %5 = vst [vmem:[#allocation1] sm:$0xf] %v4_v0 }
   0x9   :  { %v10_v1 = vld [vmem:[#allocation1 + $0x3] sm:$0x1]   ;;  %v22_v2 = vld [vmem:[#allocation1 + $0x1] sm:$0x1]   ;;  %v16_v3 = vld [vmem:[#allocation1 + $0x2] sm:$0x1]  }
   0xa   :  { %11 = vrot.lane.b32.xlu0 %v10_v1, %s36_s0  ;;  %23 = vrot.lane.b32.xlu1 %v22_v2, %s37_s8  ;;  %v6_v4 = vld [vmem:[#allocation1] sm:$0x1]  }
   0xb   :  { %8 = vst.msk [vmem:[#allocation0] sm:$0x1] %vm7_vm0, %v6_v4  }
  0x12   :  { %17 = vrot.lane.b32.xlu0 %v16_v3, %s38_s9 }
  0x7c   :  { %v12_v5 = vpop.permute.xlu0 %11   ;;  %v24_v6 = vpop.permute.xlu1 %23  }
  0x7d   :  { %14 = vst.msk [vmem:[#allocation0] sm:$0x1] %vm13_vm1, %v12_v5  }
  0x84   :  { %v18_v7 = vpop.permute.xlu0 %17  }
  0x85   :  { %20 = vst.msk [vmem:[#allocation0] sm:$0x1] %vm19_vm2, %v18_v7  }
  0x86   :  { %26 = vst.msk [vmem:[#allocation0] sm:$0x1] %vm25_vm3, %v24_v6  }
  0x8d   :  { %v29_v8 = vld [vmem:[#allocation0] sm:$0x1] }
  0x8e   :  { %32 = vst [vmem:[%s56_s1] sm:$0x1] %v29_v8 }

// kernel: pyramid_feature.6
= control target key start
LH: loop header
LB: loop body
LE: loop exit
PB: predicated region body
PF: predicated region fallthrough
CT: control target
= control target key end

     0   :  { %s778_s18 = smov 0   ;;  %s1105_s0 = inlined_call_operand.vmem [shape: f32[2,4,64], index: 0, kind: input, shape index: {}]   ;;  %s1106_s1 = inlined_call_operand.vmem [shape: f32[3,64,256], index: 1, kind: input, shape index: {}]   ;;  %s1107_s2 = inlined_call_operand.vmem [shape: f32[1,256], index: 2, kind: input, shape index: {}]   ;;  %s1108_s3 = inlined_call_operand.vmem [shape: f32[3,128,128], index: 3, kind: input, shape index: {}]   ;;  %s1109_s4 = inlined_call_operand.vmem [shape: f32[1,128], index: 4, kind: input, shape index: {}]   ;;  %s1110_s5 = inlined_call_operand.vmem [shape: f32[2,2,2,32], index: 5, kind: output, shape index: {}]  }
   0x1 LB: > { %s642_s19 = sadd.s32 4294967295, %s743_s18   ;;  %p646_p0 = scmp.ge.s32.totalorder %s743_s18, 1  ;;  %s743_s18 = sphi %s778_s18, %s15_s18  }
   0x2   : > { %p186_p1 = scmp.lt.s32.totalorder %s743_s18, 3 }
   0x4   : > { %p187_p2 = pnand %p646_p0, %p186_p1 }
   0x5   : > { %p213_p3 = scmp.lt.s32.totalorder (!%p187_p2), %s642_s19, 1  ;;  %s746_s21 = smov (!%p187_p2), 64  }
   0x6   : > { %190 = sbr.rel (%p187_p2) target bundleno = 565 (0x235), region = 40  ;;  %s747_s22 = smov (!%p187_p2), 96  }
   0xb   : > { %v664_v0 = vld [vmem:[%s1106_s1 + $0xf0] sm:$0xff]  ;;  %v662_v1 = vld [vmem:[%s1106_s1 + $0xe0] sm:$0xff]  ;;  %vm222_vm0 = vcmask 523264   ;;  %v745_v3 = vmov 0.0   ;;  %s1112_s19 = smov (!%p213_p3, %s642_s19), 1  ;;  %vm225_vm1 = vcmask 519168  }
   0xc   : > { %275 = vmatpush.msra.mxu1 %v664_v0  ;;  %v244_v2 = vld [vmem:[%s1106_s1 + $0x70] sm:$0xff]  ;;  %223 = vst.msk [vmem:[#allocation2] sm:$0xff] %vm222_vm0, %v745_v3  ;;  %v242_v5 = vld [vmem:[%s1106_s1 + $0x60] sm:$0xff]  ;;  %v245_v8 = vld [vmem:[%s1106_s1 + $0x78] sm:$0xff]  ;;  %s647_s11 = sshll.u32 %s1112_s19, 2  ;;  %vm556_vm2 = vcmask 253952  }
   0xd   : > { %v660_v4 = vld [vmem:[%s1106_s1 + $0xd0] sm:$0xff]  ;;  %318 = vmatpush.msra.mxu2 %v244_v2  ;;  %224 = vst.msk [vmem:[#allocation2 + $0x8] sm:$0xff] %vm222_vm0, %v745_v3  ;;  %v658_v7 = vld [vmem:[%s1106_s1 + $0xc0] sm:$0xff]  ;;  %338 = vmatpush.msra.mxu3 %v245_v8  ;;  %v243_v12 = vld [vmem:[%s1106_s1 + $0x68] sm:$0xff]  ;;  %s216_s26 = scalar_lea.vmem %s1105_s0, %s647_s11  ;;  %s221_s25 = scalar_lea.vmem %s1110_s5, %s647_s11  ;;  %vm576_vm3 = vcmask 254977  }
   0xe   : > { %276 = vmatpush.msra.mxu1 %v662_v1  ;;  %v240_v6 = vld [vmem:[%s1106_s1 + $0x50] sm:$0xff]  ;;  %v238_v9 = vld [vmem:[%s1106_s1 + $0x40] sm:$0xff]  ;;  %422 = vst [vmem:[#allocation3] sm:$0xff] %v745_v3  ;;  %v241_v15 = vld [vmem:[%s1106_s1 + $0x58] sm:$0xff] }
   0xf   : > { %319 = vmatpush.msra.mxu2 %v242_v5  ;;  %v684_v10 = vld [vmem:[%s1106_s1 + $0x170] sm:$0xff]  ;;  %v682_v13 = vld [vmem:[%s1106_s1 + $0x160] sm:$0xff]  ;;  %423 = vst [vmem:[#allocation3 + $0x8] sm:$0xff] %v745_v3  ;;  %339 = vmatpush.msra.mxu3 %v243_v12  ;;  %v239_v18 = vld [vmem:[%s1106_s1 + $0x48] sm:$0xff] }
  0x10   : > { %277 = vmatpush.msra.mxu1 %v660_v4  ;;  %v656_v11 = vld [vmem:[%s1106_s1 + $0xb0] sm:$0xff]  ;;  %379 = vmatpush.msra.mxu0 %v684_v10  ;;  %v654_v17 = vld [vmem:[%s1106_s1 + $0xa0] sm:$0xff]  ;;  %v237_v23 = vld [vmem:[%s1106_s1 + $0x38] sm:$0xff] }
  0x11   : > { %320 = vmatpush.msra.mxu2 %v240_v6  ;;  %v236_v14 = vld [vmem:[%s1106_s1 + $0x30] sm:$0xff]  ;;  %v234_v19 = vld [vmem:[%s1106_s1 + $0x20] sm:$0xff]  ;;  %340 = vmatpush.msra.mxu3 %v241_v15  ;;  %v235_v27 = vld [vmem:[%s1106_s1 + $0x28] sm:$0xff] }
  0x12   : > { %278 = vmatpush.msra.mxu1 %v658_v7  ;;  %v680_v16 = vld [vmem:[%s1106_s1 + $0x150] sm:$0xff]  ;;  %380 = vmatpush.msra.mxu0 %v682_v13  ;;  %v678_v20 = vld [vmem:[%s1106_s1 + $0x140] sm:$0xff]  ;;  %v665_v28 = vld [vmem:[%s1106_s1 + $0xf8] sm:$0xff] }
  0x13   : > { %321 = vmatpush.msra.mxu2 %v238_v9  ;;  %v227_v21 = vld [vmem:[%s216_s26] sm:$0xf]  ;;  %v652_v22 = vld [vmem:[%s1106_s1 + $0x90] sm:$0xff]  ;;  %341 = vmatpush.msra.mxu3 %v239_v18  ;;  %v233_v31 = vld [vmem:[%s1106_s1 + $0x18] sm:$0xff] }
  0x14   : > { %279 = vmatpush.msra.mxu1 %v656_v11  ;;  %381 = vmatpush.msra.mxu0 %v680_v16  ;;  %228 = vst.msk [vmem:[#allocation2 + $0x8] sm:$0xf] %vm225_vm1, %v227_v21  ;;  %v232_v24 = vld [vmem:[%s1106_s1 + $0x10] sm:$0xff]  ;;  %v650_v26 = vld [vmem:[%s1106_s1 + $0x80] sm:$0xff]  ;;  %v663_v32 = vld [vmem:[%s1106_s1 + $0xe8] sm:$0xff] }
  0x15   : > { %322 = vmatpush.msra.mxu2 %v236_v14  ;;  %v676_v25 = vld [vmem:[%s1106_s1 + $0x130] sm:$0xff]  ;;  %v230_v29 = vld [vmem:[%s1106_s1] sm:$0xff]  ;;  %342 = vmatpush.msra.mxu3 %v237_v23  ;;  %v661_v33 = vld [vmem:[%s1106_s1 + $0xd8] sm:$0xff] }
  0x16   : > { %280 = vmatpush.msra.mxu1 %v654_v17  ;;  %382 = vmatpush.msra.mxu0 %v678_v20  ;;  %v674_v30 = vld [vmem:[%s1106_s1 + $0x120] sm:$0xff]  ;;  %v672_v34 = vld [vmem:[%s1106_s1 + $0x110] sm:$0xff]  ;;  %v231_v37 = vld [vmem:[%s1106_s1 + $0x8] sm:$0xff] }
  0x17   : > { %323 = vmatpush.msra.mxu2 %v234_v19  ;;  %343 = vmatpush.msra.mxu3 %v235_v27  ;;  %v670_v38 = vld [vmem:[%s1106_s1 + $0x100] sm:$0xff]  ;;  %v659_v39 = vld [vmem:[%s1106_s1 + $0xc8] sm:$0xff]  ;;  %v657_v41 = vld [vmem:[%s1106_s1 + $0xb8] sm:$0xff] }
  0x18   : > { %281 = vmatpush.msra.mxu1 %v652_v22  ;;  %383 = vmatpush.msra.mxu0 %v676_v25  ;;  %v655_v42 = vld [vmem:[%s1106_s1 + $0xa8] sm:$0xff]  ;;  %v653_v43 = vld [vmem:[%s1106_s1 + $0x98] sm:$0xff]  ;;  %v702_v56 = vld [vmem:[%s1108_s3 + $0xf0] sm:$0xff] }
  0x19   : > { %324 = vmatpush.msra.mxu2 %v232_v24  ;;  %344 = vmatpush.msra.mxu3 %v233_v31  ;;  %v651_v44 = vld [vmem:[%s1106_s1 + $0x88] sm:$0xff]  ;;  %v685_v45 = vld [vmem:[%s1106_s1 + $0x178] sm:$0xff]  ;;  %v441_v57 = vld [vmem:[%s1108_s3 + $0x70] sm:$0xff] }
  0x1a   : > { %282 = vmatpush.msra.mxu1 %v650_v26  ;;  %384 = vmatpush.msra.mxu0 %v674_v30  ;;  %v683_v46 = vld [vmem:[%s1106_s1 + $0x168] sm:$0xff]  ;;  %v681_v47 = vld [vmem:[%s1106_s1 + $0x158] sm:$0xff]  ;;  %v718_v58 = vld [vmem:[%s1108_s3 + $0x170] sm:$0xff] }
  0x1b   : > { %325 = vmatpush.msra.mxu2 %v230_v29  ;;  %v229_v35 = vld [vmem:[#allocation2 + $0x7] sm:$0xf]  ;;  %345 = vmatpush.msra.mxu3 %v231_v37  ;;  %v677_v49 = vld [vmem:[%s1106_s1 + $0x138] sm:$0xff]  ;;  %v698_v4 = vld [vmem:[%s1108_s3 + $0xd0] sm:$0xff] }
  0x1c   : > { %295 = vmatpush.msrb.mxu1 %v665_v28  ;;  %v246_v36 = vld [vmem:[#allocation2 + $0x8] sm:$0xf]  ;;  %668 = vmatmul.msk.f32.vlgmr.msra.gmra.mxu2 %vm222_vm0, %v229_v35  ;;  %v673_v51 = vld [vmem:[%s1106_s1 + $0x118] sm:$0xff]  ;;  %v700_v62 = vld [vmem:[%s1108_s3 + $0xe0] sm:$0xff] }
  0x1d   : > { %385 = vmatpush.msra.mxu0 %v672_v34  ;;  %666 = vmatmul.msk.f32.vlgmr.msra.gmra.mxu1 %vm222_vm0, %v246_v36  ;;  %v350_v40 = vld [vmem:[#allocation2 + $0x9] sm:$0xf]  ;;  %v703_v53 = vld [vmem:[%s1108_s3 + $0xf8] sm:$0xff]  ;;  %v439_v63 = vld [vmem:[%s1108_s3 + $0x60] sm:$0xff] }
  0x1e   : > { %296 = vmatpush.msrb.mxu1 %v663_v32  ;;  %669 = vmatmul.msk.f32.vlgmr.msra.gmra.mxu3 %vm222_vm0, %v229_v35  ;;  %v679_v48 = vld [vmem:[%s1106_s1 + $0x148] sm:$0xff]  ;;  %v442_v54 = vld [vmem:[%s1108_s3 + $0x78] sm:$0xff]  ;;  %v716_v0 = vld [vmem:[%s1108_s3 + $0x160] sm:$0xff] }
  0x1f   : > { %386 = vmatpush.msra.mxu0 %v670_v38  ;;  %v675_v50 = vld [vmem:[%s1106_s1 + $0x128] sm:$0xff]  ;;  %v719_v55 = vld [vmem:[%s1108_s3 + $0x178] sm:$0xff]  ;;  %461 = vmatpush.msrb.mxu2 %v703_v53  ;;  %v437_v5 = vld [vmem:[%s1108_s3 + $0x50] sm:$0xff] }
  0x20   : > { %297 = vmatpush.msrb.mxu1 %v661_v33  ;;  %686 = vmatmul.msk.f32.vlgmr.msra.gmra.mxu0 %vm222_vm0, %v350_v40  ;;  %v671_v52 = vld [vmem:[%s1106_s1 + $0x108] sm:$0xff]  ;;  %v699_v1 = vld [vmem:[%s1108_s3 + $0xd8] sm:$0xff]  ;;  %v714_v6 = vld [vmem:[%s1108_s3 + $0x150] sm:$0xff] }
  0x21   : > { %481 = vmatpush.msrb.mxu3 %v442_v54  ;;  %519 = vmatpush.msrb.mxu0 %v719_v55  ;;  %v701_v59 = vld [vmem:[%s1108_s3 + $0xe8] sm:$0xff]  ;;  %v438_v2 = vld [vmem:[%s1108_s3 + $0x58] sm:$0xff]  ;;  %v696_v10 = vld [vmem:[%s1108_s3 + $0xc0] sm:$0xff] }
  0x22   : > { %298 = vmatpush.msrb.mxu1 %v659_v39  ;;  %462 = vmatpush.msrb.mxu2 %v702_v56  ;;  %v440_v60 = vld [vmem:[%s1108_s3 + $0x68] sm:$0xff]  ;;  %v715_v3 = vld [vmem:[%s1108_s3 + $0x158] sm:$0xff]  ;;  %v435_v11 = vld [vmem:[%s1108_s3 + $0x40] sm:$0xff] }
  0x23   : > { %482 = vmatpush.msrb.mxu3 %v441_v57  ;;  %v717_v61 = vld [vmem:[%s1108_s3 + $0x168] sm:$0xff]  ;;  %520 = vmatpush.msrb.mxu0 %v718_v58  ;;  %v712_v12 = vld [vmem:[%s1108_s3 + $0x140] sm:$0xff]  ;;  %v695_v13 = vld [vmem:[%s1108_s3 + $0xb8] sm:$0xff] }
  0x24   : > { %299 = vmatpush.msrb.mxu1 %v657_v41  ;;  %463 = vmatpush.msrb.mxu2 %v701_v59  ;;  %v697_v7 = vld [vmem:[%s1108_s3 + $0xc8] sm:$0xff]  ;;  %v434_v14 = vld [vmem:[%s1108_s3 + $0x38] sm:$0xff]  ;;  %v694_v16 = vld [vmem:[%s1108_s3 + $0xb0] sm:$0xff] }
  0x25   : > { %483 = vmatpush.msrb.mxu3 %v440_v60  ;;  %521 = vmatpush.msrb.mxu0 %v717_v61  ;;  %v436_v8 = vld [vmem:[%s1108_s3 + $0x48] sm:$0xff]  ;;  %v711_v15 = vld [vmem:[%s1108_s3 + $0x138] sm:$0xff]  ;;  %v433_v17 = vld [vmem:[%s1108_s3 + $0x30] sm:$0xff] }
  0x26   : > { %300 = vmatpush.msrb.mxu1 %v655_v42  ;;  %464 = vmatpush.msrb.mxu2 %v700_v62  ;;  %v713_v9 = vld [vmem:[%s1108_s3 + $0x148] sm:$0xff]  ;;  %v710_v18 = vld [vmem:[%s1108_s3 + $0x130] sm:$0xff]  ;;  %v692_v22 = vld [vmem:[%s1108_s3 + $0xa0] sm:$0xff] }
  0x27   : > { %484 = vmatpush.msrb.mxu3 %v439_v63  ;;  %522 = vmatpush.msrb.mxu0 %v716_v0  ;;  %v693_v19 = vld [vmem:[%s1108_s3 + $0xa8] sm:$0xff]  ;;  %v431_v23 = vld [vmem:[%s1108_s3 + $0x20] sm:$0xff]  ;;  %v691_v26 = vld [vmem:[%s1108_s3 + $0x98] sm:$0xff] }
  0x28   : > { %301 = vmatpush.msrb.mxu1 %v653_v43  ;;  %465 = vmatpush.msrb.mxu2 %v699_v1  ;;  %v432_v20 = vld [vmem:[%s1108_s3 + $0x28] sm:$0xff]  ;;  %v708_v24 = vld [vmem:[%s1108_s3 + $0x120] sm:$0xff]  ;;  %v430_v27 = vld [vmem:[%s1108_s3 + $0x18] sm:$0xff] }
  0x29   : > { %485 = vmatpush.msrb.mxu3 %v438_v2  ;;  %523 = vmatpush.msrb.mxu0 %v715_v3  ;;  %v709_v21 = vld [vmem:[%s1108_s3 + $0x128] sm:$0xff]  ;;  %v413_v25 = vld [vmem:[%s1107_s2] sm:$0x3]  ;;  %v707_v28 = vld [vmem:[%s1108_s3 + $0x118] sm:$0xff] }
  0x2a   : > { %302 = vmatpush.msrb.mxu1 %v651_v44  ;;  %466 = vmatpush.msrb.mxu2 %v698_v4  ;;  %v690_v30 = vld [vmem:[%s1108_s3 + $0x90] sm:$0xff]  ;;  %v689_v33 = vld [vmem:[%s1108_s3 + $0x88] sm:$0xff]  ;;  %v415_v39 = vperm.slane %v413_v25, 0  ;;  %v427_v41 = vld [vmem:[%s1108_s3] sm:$0xff] }
  0x2b   : > { %667 = vmatmul.msk.f32.vlgmr.msrb.gmra.mxu1 %vm222_vm0, %v246_v36  ;;  %486 = vmatpush.msrb.mxu3 %v437_v5  ;;  %v429_v31 = vld [vmem:[%s1108_s3 + $0x10] sm:$0xff]  ;;  %v428_v34 = vld [vmem:[%s1108_s3 + $0x8] sm:$0xff]  ;;  %v704_v42 = vld [vmem:[%s1108_s3 + $0x100] sm:$0xff] }
  0x2c   : > { %399 = vmatpush.msra.mxu1 %v685_v45  ;;  %524 = vmatpush.msrb.mxu0 %v714_v6  ;;  %v706_v32 = vld [vmem:[%s1108_s3 + $0x110] sm:$0xff]  ;;  %v705_v37 = vld [vmem:[%s1108_s3 + $0x108] sm:$0xff]  ;;  %v736_v59 = vld [vmem:[%s1109_s4] ss:$0 sm:$0xff] }
  0x2d   : > { %467 = vmatpush.msrb.mxu2 %v697_v7  ;;  %487 = vmatpush.msrb.mxu3 %v436_v8 }
  0x2e   : > { %400 = vmatpush.msra.mxu1 %v683_v46  ;;  %525 = vmatpush.msrb.mxu0 %v713_v9 }
  0x2f   : > { %468 = vmatpush.msrb.mxu2 %v696_v10  ;;  %488 = vmatpush.msrb.mxu3 %v435_v11 }
  0x30   : > { %401 = vmatpush.msra.mxu1 %v681_v47  ;;  %526 = vmatpush.msrb.mxu0 %v712_v12 }
  0x31   : > { %469 = vmatpush.msrb.mxu2 %v695_v13  ;;  %489 = vmatpush.msrb.mxu3 %v434_v14 }
  0x32   : > { %402 = vmatpush.msra.mxu1 %v679_v48  ;;  %527 = vmatpush.msrb.mxu0 %v711_v15  ;;  %v416_v48 = vperm.slane %v413_v25, 1 }
  0x33   : > { %470 = vmatpush.msrb.mxu2 %v694_v16  ;;  %490 = vmatpush.msrb.mxu3 %v433_v17 }
  0x34   : > { %403 = vmatpush.msra.mxu1 %v677_v49  ;;  %528 = vmatpush.msrb.mxu0 %v710_v18 }
  0x35   : > { %471 = vmatpush.msrb.mxu2 %v693_v19  ;;  %491 = vmatpush.msrb.mxu3 %v432_v20 }
  0x36   : > { %404 = vmatpush.msra.mxu1 %v675_v50  ;;  %529 = vmatpush.msrb.mxu0 %v709_v21 }
  0x37   : > { %472 = vmatpush.msrb.mxu2 %v692_v22  ;;  %492 = vmatpush.msrb.mxu3 %v431_v23 }
  0x38   : > { %405 = vmatpush.msra.mxu1 %v673_v51  ;;  %530 = vmatpush.msrb.mxu0 %v708_v24 }
  0x39   : > { %473 = vmatpush.msrb.mxu2 %v691_v26  ;;  %493 = vmatpush.msrb.mxu3 %v430_v27 }
  0x3a   : > { %406 = vmatpush.msra.mxu1 %v671_v52  ;;  %531 = vmatpush.msrb.mxu0 %v707_v28 }
  0x3b   : > { %687 = vmatmul.msk.f32.vlgmr.msra.gmra.mxu1 %vm222_vm0, %v350_v40  ;;  %474 = vmatpush.msrb.mxu2 %v690_v30  ;;  %v688_v40 = vld [vmem:[%s1108_s3 + $0x80] sm:$0xff] }
  0x3c   : > { %494 = vmatpush.msrb.mxu3 %v429_v31  ;;  %532 = vmatpush.msrb.mxu0 %v706_v32 }
  0x3d   : > { %475 = vmatpush.msrb.mxu2 %v689_v33 }
  0x3e   : > { %495 = vmatpush.msrb.mxu3 %v428_v34  ;;  %533 = vmatpush.msrb.mxu0 %v705_v37 }
  0x3f   : > { %476 = vmatpush.msrb.mxu2 %v688_v40 }
  0x40   : > { %496 = vmatpush.msrb.mxu3 %v427_v41  ;;  %534 = vmatpush.msrb.mxu0 %v704_v42 }
  0x9a   : > { %v284_v29 = vpop.f32.mrf.mxu1 }
  0x9d   : > { %v388_v36 = vpop.f32.mrf.mxu0 }
  0x9f   : > { %v327_v35 = vpop.f32.mrf.mxu2 }
  0xa0   : > { %v328_v38 = vadd.f32 %v327_v35, %v284_v29 }
  0xa1   : > { %v347_v46 = vpop.f32.mrf.mxu3 }
  0xa2   : > { %v411_v43 = vadd.f32 %v388_v36, %v328_v38 }
  0xa4   : > { %v419_v44 = vadd.f32 %v415_v39, %v411_v43 }
  0xa8   : > { %v304_v45 = vpop.f32.mrf.mxu1 }
  0xa9   : > { %v348_v47 = vadd.f32 %v347_v46, %v304_v45 }
  0xb8   : > { %v408_v49 = vpop.f32.mrf.mxu1 }
  0xb9   : > { %v412_v50 = vadd.f32 %v408_v49, %v348_v47 }
  0xbb   : > { %v420_v51 = vadd.f32 %v416_v48, %v412_v50 }
  0xbd   : > { %v421_v52 = vmax.f32 %v420_v51, 0.0 }
  0xbf   : > { %425 = vst [vmem:[#allocation3 + $0x8] sm:$0xf] %v421_v52 }
  0xc6   : > { %v443_v53 = vld [vmem:[#allocation3 + $0x8] sm:$0xf] }
  0xc7   : > { %v426_v54 = vld [vmem:[#allocation3 + $0x7] sm:$0xf]  ;;  %477 = vmatmul.f32.vlgmr.msrb.gmra.mxu2 %v443_v53 }
  0xc8   : > { %v501_v55 = vld [vmem:[#allocation3 + $0x9] sm:$0xf]  ;;  %497 = vmatmul.f32.vlgmr.msrb.gmra.mxu3 %v426_v54 }
  0xc9   : > { %535 = vmatmul.f32.vlgmr.msrb.gmra.mxu0 %v501_v55 }
 0x146   : > { %v536_v60 = vpop.f32.mrf.mxu0 }
 0x14a   : > { %v478_v56 = vpop.f32.mrf.mxu2 }
 0x14b   : > { %v498_v57 = vpop.f32.mrf.mxu3 }
 0x14c   : > { %v499_v58 = vadd.f32 %v498_v57, %v478_v56 }
 0x14e   : > { %v539_v61 = vadd.f32 %v536_v60, %v499_v58 }
 0x150   : > { %v544_v62 = vadd.f32 %v736_v59, %v539_v61 }
 0x152   : > { %v545_v63 = vmax.f32 %v544_v62, 0.0 }
 0x154   : > { %v546_v0 = vadd.f32 %v545_v63, %v419_v44 }
 0x156   : > { %v548_v1 = vrot.slane %v546_v0, 1  ;;  %v567_v3 = vrot.slane %v546_v0, 2 }
 0x158   : > { %v550_v2 = vmax.f32 %v546_v0, %v548_v1 }
 0x15a   : > { %558 = vrot.lane.b32.xlu1 %v550_v2, %s746_s21  ;;  %552 = vrot.lane.b32.xlu0 %v550_v2, %s747_s22  ;;  %v569_v4 = vmax.f32 %v550_v2, %v567_v3 }
 0x162   : > { %578 = vrot.lane.b32.xlu1 %v569_v4, %s746_s21  ;;  %571 = vrot.lane.b32.xlu0 %v569_v4, %s747_s22 }
 0x1cc   : > { %v559_v5 = vpop.permute.xlu1 %558  ;;  %v553_v6 = vpop.permute.xlu0 %552 }
 0x1cd   : > { %v555_v7 = vmax.f32 %v550_v2, %v553_v6 }
 0x1cf   : > { %v561_v8 = vmax.f32 %v555_v7, %v559_v5  ;;  %557 = vst.msk [vmem:[%s221_s25] sm:$0x1] %vm556_vm2, %v555_v7 }
 0x1d1   : > { %563 = vrot.lane.b32.xlu2 %v561_v8, %s747_s22 }
 0x1d4   : > { %v572_v9 = vpop.permute.xlu0 %571  ;;  %v579_v11 = vpop.permute.xlu1 %578 }
 0x1d5   : > { %v574_v10 = vmax.f32 %v569_v4, %v572_v9 }
 0x1d7   : > { %v581_v12 = vmax.f32 %v574_v10, %v579_v11  ;;  %720 = vst.msk [vmem:[%s221_s25 + $0x1] sm:$0x2] %vm576_vm3, %v574_v10 }
 0x1d9   : > { %583 = vrot.lane.b32.xlu2 %v581_v12, %s747_s22 }
 0x22b   : > { %v564_v13 = vpop.permute.xlu2 %563 }
 0x22c   : > { %566 = vst.msk [vmem:[%s221_s25 + $0x1] sm:$0x1] %vm556_vm2, %v564_v13 }
 0x233   : > { %v584_v14 = vpop.permute.xlu2 %583 }
 0x234   : > { %721 = vst.msk [vmem:[%s221_s25 + $0x2] sm:$0x2] %vm576_vm3, %v584_v14 }
 0x235 PF: > { %s15_s18 = sadd.s32 1, %s743_s18  }
 0x236   : > { %p12_p4 = scmp.ge.s32.totalorder %s15_s18, 4  }
 0x238   :  { %14 = sbr.rel (!%p12_p4) target bundleno = 1 (0x1), region = 75 }

// kernel: tile.113
= control target key start
LH: loop header
LB: loop body
LE: loop exit
PB: predicated region body
PF: predicated region fallthrough
CT: control target
= control target key end

     0   :  { %s22_s0 = inlined_call_operand.vmem [shape: f32[64], index: 0, kind: input, shape index: {}]   ;;  %s23_s1 = inlined_call_operand.vmem [shape: f32[2,64], index: 1, kind: output, shape index: {}]  }
   0x1   :  { %v4_v0 = vld [vmem:[%s22_s0] ss:$0 sm:$0xff] }
   0x2   :  { %5 = vst [vmem:[%s23_s1] sm:$0x3] %v4_v0 }

// kernel: tile.114
= control target key start
LH: loop header
LB: loop body
LE: loop exit
PB: predicated region body
PF: predicated region fallthrough
CT: control target
= control target key end

     0   :  { %vm7_vm0 = vcmask 523264   ;;  %vm13_vm1 = vcmask 1048064   ;;  %s39_s0 = inlined_call_operand.vmem [shape: f32[2,64], index: 0, kind: input, shape index: {}]   ;;  %s40_s1 = inlined_call_operand.vmem [shape: f32[128], index: 1, kind: output, shape index: {}]  }
   0x1   :  { %v4_v0 = vld [vmem:[%s39_s0] sm:$0x3]  ;;  %s22_s0 = smov 64  }
   0x2   :  { %5 = vst [vmem:[#allocation1] sm:$0x3] %v4_v0 }
   0x9   :  { %v10_v1 = vld [vmem:[#allocation1 + $0x1] sm:$0x1]   ;;  %v6_v2 = vld [vmem:[#allocation1] sm:$0x1]  }
   0xa   :  { %11 = vrot.lane.b32.xlu0 %v10_v1, %s22_s0  ;;  %8 = vst.msk [vmem:[#allocation0] sm:$0x1] %vm7_vm0, %v6_v2  }
  0x7c   :  { %v12_v3 = vpop.permute.xlu0 %11  }
  0x7d   :  { %14 = vst.msk [vmem:[#allocation0] sm:$0x1] %vm13_vm1, %v12_v3  }
  0x84   :  { %v17_v4 = vld [vmem:[#allocation0] sm:$0x1] }
  0x85   :  { %20 = vst [vmem:[%s40_s1] sm:$0x1] %v17_v4 }

// kernel: tile.119
= control target key start
LH: loop header
LB: loop body
LE: loop exit
PB: predicated region body
PF: predicated region fallthrough
CT: control target
= control target key end

     0   :  { %vm7_vm0 = vcmask 523264   ;;  %vm13_vm1 = vcmask 1048064   ;;  %s39_s0 = inlined_call_operand.vmem [shape: f32[2,64], index: 0, kind: input, shape index: {}]   ;;  %s40_s1 = inlined_call_operand.vmem [shape: f32[1,128], index: 1, kind: output, shape index: {}]  }
   0x1   :  { %v4_v0 = vld [vmem:[%s39_s0] sm:$0x3]  ;;  %s22_s0 = smov 64  }
   0x2   :  { %5 = vst [vmem:[#allocation1] sm:$0x3] %v4_v0 }
   0x9   :  { %v10_v1 = vld [vmem:[#allocation1 + $0x1] sm:$0x1]   ;;  %v6_v2 = vld [vmem:[#allocation1] sm:$0x1]  }
   0xa   :  { %11 = vrot.lane.b32.xlu0 %v10_v1, %s22_s0  ;;  %8 = vst.msk [vmem:[#allocation0] sm:$0x1] %vm7_vm0, %v6_v2  }
  0x7c   :  { %v12_v3 = vpop.permute.xlu0 %11  }
  0x7d   :  { %14 = vst.msk [vmem:[#allocation0] sm:$0x1] %vm13_vm1, %v12_v3  }
  0x84   :  { %v17_v4 = vld [vmem:[#allocation0] sm:$0x1] }
  0x85   :  { %20 = vst [vmem:[%s40_s1] sm:$0x1] %v17_v4 }

// kernel: pyramid_feature.7
= control target key start
LH: loop header
LB: loop body
LE: loop exit
PB: predicated region body
PF: predicated region fallthrough
CT: control target
= control target key end

     0   :  { %10 = vsyncpa [#allocation5], 0  ;;  %s1226_s0 = inlined_call_operand.vmem [shape: f32[2,2,64], index: 0, kind: input, shape index: {}]   ;;  %s1227_s1 = inlined_call_operand.vmem [shape: f32[3,64,256], index: 1, kind: input, shape index: {}]   ;;  %s1228_s2 = inlined_call_operand.vmem [shape: f32[1,256], index: 2, kind: input, shape index: {}]   ;;  %s1229_s3 = inlined_call_operand.vmem [shape: f32[3,128,128], index: 3, kind: input, shape index: {}]   ;;  %s1230_s4 = inlined_call_operand.vmem [shape: f32[1,128], index: 4, kind: input, shape index: {}]   ;;  %s1231_s5 = inlined_call_operand.hbm [shape: f32[2,1,1,64], index: 5, kind: output, shape index: {}]  }
   0x1   :  { %12 = vsyncpa [#allocation5 + $0x1], 0  ;;  %s838_s18 = smov 0   ;;  %s840_s19 = smov 0  }
   0x2   :  { %s842_s20 = smov 0   ;;  %s844_s21 = smov 0  }
   0x3 LB: > { %s859_s22 = sadd.s32 4294967295, %s804_s21   ;;  %s623_s23 = sadd.s32 4294967294, %s804_s21   ;;  %s804_s21 = sphi %s844_s21, %s1237_s21   ;;  %s800_s20 = sphi %s842_s20, %s1236_s20   ;;  %s796_s19 = sphi %s840_s19, %s1235_s19   ;;  %s792_s18 = sphi %s838_s18, %s1234_s18  }
   0x4   : > { %s863_s24 = sadd.s32 1, %s804_s21   ;;  %s135_s25 = sadd.s32 1, %s800_s20 }
   0x5   : > { %s132_s26 = ssub.s32 %s804_s21, %s863_s24  ;;  %p145_p0 = scmp.ne.s32.totalorder %s800_s20, %s796_s19 }
   0x6   : > { %p133_p1 = scmp.eq.s32.totalorder %s132_s26, 0  ;;  %p146_p2 = scmp.eq.s32.totalorder %s859_s22, 1 }
   0x7   : > { %p151_p3 = scmp.ne.s32.totalorder %s796_s19, %s792_s18  ;;  %p152_p4 = scmp.eq.s32.totalorder %s623_s23, 1 }
   0x8   : > { %s874_s27 = scalar_select %p133_p1, %s800_s20, %s135_s25  }
   0x9   : > { %p876_p5 = por %p146_p2, %p145_p0  ;;  %p880_p6 = por %p152_p4, %p151_p3 }
   0xa   : > { %p626_p7 = scmp.ge.s32.totalorder %s804_s21, 1  ;;  %p189_p8 = scmp.lt.s32.totalorder %s804_s21, 3 }
   0xc   : > { %p190_p9 = pnand %p626_p7, %p189_p8 }
   0xd   : > { %p215_p10 = scmp.lt.s32.totalorder (!%p190_p9), %s859_s22, 1  ;;  %s807_s14 = smov (!%p190_p9), 64  }
   0xe   : > { %193 = sbr.rel (%p190_p9) target bundleno = 474 (0x1da), region = 40  ;;  %s564_s23 = scalar_lea.hbm (!%p190_p9), %s1231_s5, %s859_s22 }
   0xf   : > { %s568_s7 = sshll.u32 (!%p190_p9), %s564_s23, 4  ;;  %s569_s7 = int_to_ptr.hbm [resolvable:$true] %s568_s7 }
  0x10   : > { %s756_s9 = sshra.s32 (!%p190_p9), %s569_s7, 4  ;;  %s757_s9 = int_to_ptr.hbm [resolvable:$true] %s756_s9 }
  0x11   : > { %s758_s10 = scalar_lea.hbm (!%p190_p9), %s757_s9, 1  ;;  %p763_p0 = scmp.lt.s32.totalorder (!%p190_p9), %s757_s9, %s1231_s5 }
  0x12   : > { %p759_p11 = scmp.ne.s32.totalorder (!%p190_p9), %s757_s9, %s758_s10 }
  0x13   : > { %v642_v0 = vld [vmem:[%s1227_s1 + $0xf0] sm:$0xff]  ;;  %v640_v1 = vld [vmem:[%s1227_s1 + $0xe0] sm:$0xff]  ;;  %vm219_vm0 = vcmask 523264   ;;  %v806_v3 = vmov 0.0   ;;  %s216_s15 = scalar_select %p215_p10, %s859_s22, 1  ;;  %vm222_vm1 = vcmask 517120  }
  0x14   : > { %272 = vmatpush.msra.mxu1 %v642_v0  ;;  %v241_v2 = vld [vmem:[%s1227_s1 + $0x70] sm:$0xff]  ;;  %220 = vst.msk [vmem:[#allocation2] sm:$0xff] %vm219_vm0, %v806_v3  ;;  %v239_v5 = vld [vmem:[%s1227_s1 + $0x60] sm:$0xff]  ;;  %v242_v8 = vld [vmem:[%s1227_s1 + $0x78] sm:$0xff]  ;;  %vm553_vm2 = vcmask 516096   ;;  %p760_p12 = pnand %p759_p11, %p876_p5  ;;  %s762_s22 = scalar_lea.hbm %s1231_s5, 2 }
  0x15   : > { %v638_v4 = vld [vmem:[%s1227_s1 + $0xd0] sm:$0xff]  ;;  %315 = vmatpush.msra.mxu2 %v241_v2  ;;  %221 = vst.msk [vmem:[#allocation2 + $0x8] sm:$0xff] %vm219_vm0, %v806_v3  ;;  %v636_v7 = vld [vmem:[%s1227_s1 + $0xc0] sm:$0xff]  ;;  %s627_s6 = sshll.u32 %s216_s15, 1  ;;  %335 = vmatpush.msra.mxu3 %v242_v8  ;;  %v240_v12 = vld [vmem:[%s1227_s1 + $0x68] sm:$0xff]  ;;  %s213_s15 = sand.u32 1, %s796_s19  }
  0x16   : > { %273 = vmatpush.msra.mxu1 %v640_v1  ;;  %v237_v6 = vld [vmem:[%s1227_s1 + $0x50] sm:$0xff]  ;;  %v235_v9 = vld [vmem:[%s1227_s1 + $0x40] sm:$0xff]  ;;  %419 = vst [vmem:[#allocation3] sm:$0xff] %v806_v3  ;;  %s218_s25 = scalar_lea.vmem %s1226_s0, %s627_s6  ;;  %v238_v15 = vld [vmem:[%s1227_s1 + $0x58] sm:$0xff]  ;;  %s214_s26 = scalar_lea.vmem [#allocation4], %s213_s15 }
  0x17   : > { %316 = vmatpush.msra.mxu2 %v239_v5  ;;  %v662_v10 = vld [vmem:[%s1227_s1 + $0x170] sm:$0xff]  ;;  %v660_v13 = vld [vmem:[%s1227_s1 + $0x160] sm:$0xff]  ;;  %420 = vst [vmem:[#allocation3 + $0x8] sm:$0xff] %v806_v3  ;;  %336 = vmatpush.msra.mxu3 %v240_v12  ;;  %v236_v18 = vld [vmem:[%s1227_s1 + $0x48] sm:$0xff]  ;;  %s566_s30 = sshll.u32 %s214_s26, 4  ;;  %s556_s8 = scalar_lea.sflag [#allocation5], %s213_s15  ;;  %s567_s30 = int_to_ptr.vmem [resolvable:$true] %s566_s30 }
  0x18   : > { %274 = vmatpush.msra.mxu1 %v638_v4  ;;  %v634_v11 = vld [vmem:[%s1227_s1 + $0xb0] sm:$0xff]  ;;  %376 = vmatpush.msra.mxu0 %v662_v10  ;;  %v632_v17 = vld [vmem:[%s1227_s1 + $0xa0] sm:$0xff]  ;;  %v234_v23 = vld [vmem:[%s1227_s1 + $0x38] sm:$0xff]  ;;  %p761_p13 = pneg %p760_p12  ;;  %p764_p1 = scmp.lt.s32.totalorder %s762_s22, %s758_s10 }
  0x19   : > { %317 = vmatpush.msra.mxu2 %v237_v6  ;;  %v233_v14 = vld [vmem:[%s1227_s1 + $0x30] sm:$0xff]  ;;  %v231_v19 = vld [vmem:[%s1227_s1 + $0x20] sm:$0xff]  ;;  %337 = vmatpush.msra.mxu3 %v238_v15  ;;  %v232_v27 = vld [vmem:[%s1227_s1 + $0x28] sm:$0xff] }
  0x1a   : > { %275 = vmatpush.msra.mxu1 %v636_v7  ;;  %v658_v16 = vld [vmem:[%s1227_s1 + $0x150] sm:$0xff]  ;;  %377 = vmatpush.msra.mxu0 %v660_v13  ;;  %v656_v20 = vld [vmem:[%s1227_s1 + $0x140] sm:$0xff]  ;;  %v643_v28 = vld [vmem:[%s1227_s1 + $0xf8] sm:$0xff]  ;;  %p765_p2 = por %p764_p1, %p763_p0 }
  0x1b   : > { %318 = vmatpush.msra.mxu2 %v235_v9  ;;  %v224_v21 = vld [vmem:[%s218_s25] sm:$0x3]  ;;  %v630_v22 = vld [vmem:[%s1227_s1 + $0x90] sm:$0xff]  ;;  %338 = vmatpush.msra.mxu3 %v236_v18  ;;  %v230_v31 = vld [vmem:[%s1227_s1 + $0x18] sm:$0xff] }
  0x1c   : > { %276 = vmatpush.msra.mxu1 %v634_v11  ;;  %378 = vmatpush.msra.mxu0 %v658_v16  ;;  %225 = vst.msk [vmem:[#allocation2 + $0x8] sm:$0x3] %vm222_vm1, %v224_v21  ;;  %v229_v24 = vld [vmem:[%s1227_s1 + $0x10] sm:$0xff]  ;;  %v628_v26 = vld [vmem:[%s1227_s1 + $0x80] sm:$0xff]  ;;  %v641_v32 = vld [vmem:[%s1227_s1 + $0xe8] sm:$0xff]  ;;  %p766_p3 = pnand %p765_p2, %p761_p13 }
  0x1d   : > { %319 = vmatpush.msra.mxu2 %v233_v14  ;;  %v654_v25 = vld [vmem:[%s1227_s1 + $0x130] sm:$0xff]  ;;  %v227_v29 = vld [vmem:[%s1227_s1] sm:$0xff]  ;;  %339 = vmatpush.msra.mxu3 %v234_v23  ;;  %v639_v33 = vld [vmem:[%s1227_s1 + $0xd8] sm:$0xff] }
  0x1e   : > { %277 = vmatpush.msra.mxu1 %v632_v17  ;;  %379 = vmatpush.msra.mxu0 %v656_v20  ;;  %v652_v30 = vld [vmem:[%s1227_s1 + $0x120] sm:$0xff]  ;;  %v650_v34 = vld [vmem:[%s1227_s1 + $0x110] sm:$0xff]  ;;  %v228_v37 = vld [vmem:[%s1227_s1 + $0x8] sm:$0xff] }
  0x1f   : > { %320 = vmatpush.msra.mxu2 %v231_v19  ;;  %340 = vmatpush.msra.mxu3 %v232_v27  ;;  %v648_v38 = vld [vmem:[%s1227_s1 + $0x100] sm:$0xff]  ;;  %v637_v39 = vld [vmem:[%s1227_s1 + $0xc8] sm:$0xff]  ;;  %v635_v41 = vld [vmem:[%s1227_s1 + $0xb8] sm:$0xff] }
  0x20   : > { %278 = vmatpush.msra.mxu1 %v630_v22  ;;  %380 = vmatpush.msra.mxu0 %v654_v25  ;;  %v633_v42 = vld [vmem:[%s1227_s1 + $0xa8] sm:$0xff]  ;;  %v631_v43 = vld [vmem:[%s1227_s1 + $0x98] sm:$0xff]  ;;  %v680_v56 = vld [vmem:[%s1229_s3 + $0xf0] sm:$0xff] }
  0x21   : > { %321 = vmatpush.msra.mxu2 %v229_v24  ;;  %341 = vmatpush.msra.mxu3 %v230_v31  ;;  %v629_v44 = vld [vmem:[%s1227_s1 + $0x88] sm:$0xff]  ;;  %v663_v45 = vld [vmem:[%s1227_s1 + $0x178] sm:$0xff]  ;;  %v438_v57 = vld [vmem:[%s1229_s3 + $0x70] sm:$0xff] }
  0x22   : > { %279 = vmatpush.msra.mxu1 %v628_v26  ;;  %381 = vmatpush.msra.mxu0 %v652_v30  ;;  %v661_v46 = vld [vmem:[%s1227_s1 + $0x168] sm:$0xff]  ;;  %v659_v47 = vld [vmem:[%s1227_s1 + $0x158] sm:$0xff]  ;;  %v696_v58 = vld [vmem:[%s1229_s3 + $0x170] sm:$0xff] }
  0x23   : > { %322 = vmatpush.msra.mxu2 %v227_v29  ;;  %v226_v35 = vld [vmem:[#allocation2 + $0x7] sm:$0x3]  ;;  %v347_v40 = vld [vmem:[#allocation2 + $0x9] sm:$0x3]  ;;  %342 = vmatpush.msra.mxu3 %v228_v37  ;;  %v655_v49 = vld [vmem:[%s1227_s1 + $0x138] sm:$0xff] }
  0x24   : > { %292 = vmatpush.msrb.mxu1 %v643_v28  ;;  %v243_v36 = vld [vmem:[#allocation2 + $0x8] sm:$0x3]  ;;  %646 = vmatmul.msk.f32.vlgmr.msra.gmra.mxu2 %vm219_vm0, %v226_v35  ;;  %v651_v51 = vld [vmem:[%s1227_s1 + $0x118] sm:$0xff]  ;;  %v678_v62 = vld [vmem:[%s1229_s3 + $0xe0] sm:$0xff] }
  0x25   : > { %382 = vmatpush.msra.mxu0 %v650_v34  ;;  %644 = vmatmul.msk.f32.vlgmr.msra.gmra.mxu1 %vm219_vm0, %v243_v36  ;;  %v657_v48 = vld [vmem:[%s1227_s1 + $0x148] sm:$0xff]  ;;  %v681_v53 = vld [vmem:[%s1229_s3 + $0xf8] sm:$0xff]  ;;  %v436_v63 = vld [vmem:[%s1229_s3 + $0x60] sm:$0xff] }
  0x26   : > { %293 = vmatpush.msrb.mxu1 %v641_v32  ;;  %647 = vmatmul.msk.f32.vlgmr.msra.gmra.mxu3 %vm219_vm0, %v226_v35  ;;  %v653_v50 = vld [vmem:[%s1227_s1 + $0x128] sm:$0xff]  ;;  %v439_v54 = vld [vmem:[%s1229_s3 + $0x78] sm:$0xff]  ;;  %v694_v0 = vld [vmem:[%s1229_s3 + $0x160] sm:$0xff] }
  0x27   : > { %383 = vmatpush.msra.mxu0 %v648_v38  ;;  %v649_v52 = vld [vmem:[%s1227_s1 + $0x108] sm:$0xff]  ;;  %v697_v55 = vld [vmem:[%s1229_s3 + $0x178] sm:$0xff]  ;;  %458 = vmatpush.msrb.mxu2 %v681_v53  ;;  %v676_v4 = vld [vmem:[%s1229_s3 + $0xd0] sm:$0xff] }
  0x28   : > { %294 = vmatpush.msrb.mxu1 %v639_v33  ;;  %664 = vmatmul.msk.f32.vlgmr.msra.gmra.mxu0 %vm219_vm0, %v347_v40  ;;  %v679_v59 = vld [vmem:[%s1229_s3 + $0xe8] sm:$0xff]  ;;  %v677_v1 = vld [vmem:[%s1229_s3 + $0xd8] sm:$0xff]  ;;  %v434_v5 = vld [vmem:[%s1229_s3 + $0x50] sm:$0xff] }
  0x29   : > { %478 = vmatpush.msrb.mxu3 %v439_v54  ;;  %516 = vmatpush.msrb.mxu0 %v697_v55  ;;  %v437_v60 = vld [vmem:[%s1229_s3 + $0x68] sm:$0xff]  ;;  %v435_v2 = vld [vmem:[%s1229_s3 + $0x58] sm:$0xff]  ;;  %v692_v6 = vld [vmem:[%s1229_s3 + $0x150] sm:$0xff] }
  0x2a   : > { %295 = vmatpush.msrb.mxu1 %v637_v39  ;;  %459 = vmatpush.msrb.mxu2 %v680_v56  ;;  %v695_v61 = vld [vmem:[%s1229_s3 + $0x168] sm:$0xff]  ;;  %v693_v3 = vld [vmem:[%s1229_s3 + $0x158] sm:$0xff]  ;;  %v674_v10 = vld [vmem:[%s1229_s3 + $0xc0] sm:$0xff] }
  0x2b   : > { %479 = vmatpush.msrb.mxu3 %v438_v57  ;;  %517 = vmatpush.msrb.mxu0 %v696_v58  ;;  %v675_v7 = vld [vmem:[%s1229_s3 + $0xc8] sm:$0xff]  ;;  %v432_v11 = vld [vmem:[%s1229_s3 + $0x40] sm:$0xff]  ;;  %v673_v13 = vld [vmem:[%s1229_s3 + $0xb8] sm:$0xff] }
  0x2c   : > { %296 = vmatpush.msrb.mxu1 %v635_v41  ;;  %460 = vmatpush.msrb.mxu2 %v679_v59  ;;  %v433_v8 = vld [vmem:[%s1229_s3 + $0x48] sm:$0xff]  ;;  %v690_v12 = vld [vmem:[%s1229_s3 + $0x140] sm:$0xff]  ;;  %v431_v14 = vld [vmem:[%s1229_s3 + $0x38] sm:$0xff] }
  0x2d   : > { %480 = vmatpush.msrb.mxu3 %v437_v60  ;;  %518 = vmatpush.msrb.mxu0 %v695_v61  ;;  %v691_v9 = vld [vmem:[%s1229_s3 + $0x148] sm:$0xff]  ;;  %v689_v15 = vld [vmem:[%s1229_s3 + $0x138] sm:$0xff]  ;;  %v672_v16 = vld [vmem:[%s1229_s3 + $0xb0] sm:$0xff] }
  0x2e   : > { %297 = vmatpush.msrb.mxu1 %v633_v42  ;;  %461 = vmatpush.msrb.mxu2 %v678_v62  ;;  %v430_v17 = vld [vmem:[%s1229_s3 + $0x30] sm:$0xff]  ;;  %v671_v19 = vld [vmem:[%s1229_s3 + $0xa8] sm:$0xff]  ;;  %v670_v22 = vld [vmem:[%s1229_s3 + $0xa0] sm:$0xff] }
  0x2f   : > { %481 = vmatpush.msrb.mxu3 %v436_v63  ;;  %519 = vmatpush.msrb.mxu0 %v694_v0  ;;  %v688_v18 = vld [vmem:[%s1229_s3 + $0x130] sm:$0xff]  ;;  %v429_v20 = vld [vmem:[%s1229_s3 + $0x28] sm:$0xff]  ;;  %v428_v23 = vld [vmem:[%s1229_s3 + $0x20] sm:$0xff] }
  0x30   : > { %298 = vmatpush.msrb.mxu1 %v631_v43  ;;  %462 = vmatpush.msrb.mxu2 %v677_v1  ;;  %v687_v21 = vld [vmem:[%s1229_s3 + $0x128] sm:$0xff]  ;;  %v686_v24 = vld [vmem:[%s1229_s3 + $0x120] sm:$0xff]  ;;  %v669_v26 = vld [vmem:[%s1229_s3 + $0x98] sm:$0xff] }
  0x31   : > { %482 = vmatpush.msrb.mxu3 %v435_v2  ;;  %520 = vmatpush.msrb.mxu0 %v693_v3  ;;  %v410_v25 = vld [vmem:[%s1228_s2] sm:$0x3]  ;;  %v427_v27 = vld [vmem:[%s1229_s3 + $0x18] sm:$0xff]  ;;  %v668_v30 = vld [vmem:[%s1229_s3 + $0x90] sm:$0xff] }
  0x32   : > { %299 = vmatpush.msrb.mxu1 %v629_v44  ;;  %463 = vmatpush.msrb.mxu2 %v676_v4  ;;  %v685_v28 = vld [vmem:[%s1229_s3 + $0x118] sm:$0xff]  ;;  %v426_v31 = vld [vmem:[%s1229_s3 + $0x10] sm:$0xff]  ;;  %v667_v33 = vld [vmem:[%s1229_s3 + $0x88] sm:$0xff]  ;;  %v412_v39 = vperm.slane %v410_v25, 0 }
  0x33   : > { %645 = vmatmul.msk.f32.vlgmr.msrb.gmra.mxu1 %vm219_vm0, %v243_v36  ;;  %483 = vmatpush.msrb.mxu3 %v434_v5  ;;  %v684_v32 = vld [vmem:[%s1229_s3 + $0x110] sm:$0xff]  ;;  %v425_v34 = vld [vmem:[%s1229_s3 + $0x8] sm:$0xff]  ;;  %v424_v41 = vld [vmem:[%s1229_s3] sm:$0xff] }
  0x34   : > { %396 = vmatpush.msra.mxu1 %v663_v45  ;;  %521 = vmatpush.msrb.mxu0 %v692_v6  ;;  %v683_v37 = vld [vmem:[%s1229_s3 + $0x108] sm:$0xff]  ;;  %v682_v42 = vld [vmem:[%s1229_s3 + $0x100] sm:$0xff] }
  0x35   : > { %464 = vmatpush.msrb.mxu2 %v675_v7  ;;  %484 = vmatpush.msrb.mxu3 %v433_v8  ;;  %v741_v59 = vld [vmem:[%s1230_s4] ss:$0 sm:$0xff] }
  0x36   : > { %397 = vmatpush.msra.mxu1 %v661_v46  ;;  %522 = vmatpush.msrb.mxu0 %v691_v9 }
  0x37   : > { %465 = vmatpush.msrb.mxu2 %v674_v10  ;;  %485 = vmatpush.msrb.mxu3 %v432_v11 }
  0x38   : > { %398 = vmatpush.msra.mxu1 %v659_v47  ;;  %523 = vmatpush.msrb.mxu0 %v690_v12 }
  0x39   : > { %466 = vmatpush.msrb.mxu2 %v673_v13  ;;  %486 = vmatpush.msrb.mxu3 %v431_v14 }
  0x3a   : > { %399 = vmatpush.msra.mxu1 %v657_v48  ;;  %524 = vmatpush.msrb.mxu0 %v689_v15  ;;  %v413_v48 = vperm.slane %v410_v25, 1 }
  0x3b   : > { %467 = vmatpush.msrb.mxu2 %v672_v16  ;;  %487 = vmatpush.msrb.mxu3 %v430_v17 }
  0x3c   : > { %400 = vmatpush.msra.mxu1 %v655_v49  ;;  %525 = vmatpush.msrb.mxu0 %v688_v18 }
  0x3d   : > { %468 = vmatpush.msrb.mxu2 %v671_v19  ;;  %488 = vmatpush.msrb.mxu3 %v429_v20 }
  0x3e   : > { %401 = vmatpush.msra.mxu1 %v653_v50  ;;  %526 = vmatpush.msrb.mxu0 %v687_v21 }
  0x3f   : > { %469 = vmatpush.msrb.mxu2 %v670_v22  ;;  %489 = vmatpush.msrb.mxu3 %v428_v23 }
  0x40   : > { %402 = vmatpush.msra.mxu1 %v651_v51  ;;  %527 = vmatpush.msrb.mxu0 %v686_v24 }
  0x41   : > { %470 = vmatpush.msrb.mxu2 %v669_v26  ;;  %490 = vmatpush.msrb.mxu3 %v427_v27 }
  0x42   : > { %403 = vmatpush.msra.mxu1 %v649_v52  ;;  %528 = vmatpush.msrb.mxu0 %v685_v28 }
  0x43   : > { %665 = vmatmul.msk.f32.vlgmr.msra.gmra.mxu1 %vm219_vm0, %v347_v40  ;;  %471 = vmatpush.msrb.mxu2 %v668_v30  ;;  %v666_v40 = vld [vmem:[%s1229_s3 + $0x80] sm:$0xff] }
  0x44   : > { %491 = vmatpush.msrb.mxu3 %v426_v31  ;;  %529 = vmatpush.msrb.mxu0 %v684_v32 }
  0x45   : > { %472 = vmatpush.msrb.mxu2 %v667_v33 }
  0x46   : > { %492 = vmatpush.msrb.mxu3 %v425_v34  ;;  %530 = vmatpush.msrb.mxu0 %v683_v37 }
  0x47   : > { %473 = vmatpush.msrb.mxu2 %v666_v40 }
  0x48   : > { %493 = vmatpush.msrb.mxu3 %v424_v41  ;;  %531 = vmatpush.msrb.mxu0 %v682_v42 }
  0xa2   : > { %v281_v29 = vpop.f32.mrf.mxu1 }
  0xa5   : > { %v385_v36 = vpop.f32.mrf.mxu0 }
  0xa7   : > { %v324_v35 = vpop.f32.mrf.mxu2 }
  0xa8   : > { %v325_v38 = vadd.f32 %v324_v35, %v281_v29 }
  0xa9   : > { %v344_v46 = vpop.f32.mrf.mxu3 }
  0xaa   : > { %v408_v43 = vadd.f32 %v385_v36, %v325_v38 }
  0xac   : > { %v416_v44 = vadd.f32 %v412_v39, %v408_v43 }
  0xb0   : > { %v301_v45 = vpop.f32.mrf.mxu1 }
  0xb1   : > { %v345_v47 = vadd.f32 %v344_v46, %v301_v45 }
  0xc0   : > { %v405_v49 = vpop.f32.mrf.mxu1 }
  0xc1   : > { %v409_v50 = vadd.f32 %v405_v49, %v345_v47 }
  0xc3   : > { %v417_v51 = vadd.f32 %v413_v48, %v409_v50 }
  0xc5   : > { %v418_v52 = vmax.f32 %v417_v51, 0.0 }
  0xc7   : > { %422 = vst [vmem:[#allocation3 + $0x8] sm:$0x3] %v418_v52 }
  0xce   : > { %v440_v53 = vld [vmem:[#allocation3 + $0x8] sm:$0x3] }
  0xcf   : > { %v423_v54 = vld [vmem:[#allocation3 + $0x7] sm:$0x3]  ;;  %v498_v55 = vld [vmem:[#allocation3 + $0x9] sm:$0x3]  ;;  %474 = vmatmul.f32.vlgmr.msrb.gmra.mxu2 %v440_v53 }
  0xd0   : > { %494 = vmatmul.f32.vlgmr.msrb.gmra.mxu3 %v423_v54  ;;  %532 = vmatmul.f32.vlgmr.msrb.gmra.mxu0 %v498_v55 }
 0x14d   : > { %v533_v60 = vpop.f32.mrf.mxu0 }
 0x152   : > { %v475_v56 = vpop.f32.mrf.mxu2 }
 0x153   : > { %v495_v57 = vpop.f32.mrf.mxu3 }
 0x154   : > { %v496_v58 = vadd.f32 %v495_v57, %v475_v56 }
 0x156   : > { %v536_v61 = vadd.f32 %v533_v60, %v496_v58 }
 0x158   : > { %v541_v62 = vadd.f32 %v741_v59, %v536_v61 }
 0x15a   : > { %v542_v63 = vmax.f32 %v541_v62, 0.0 }
 0x15c   : > { %v543_v0 = vadd.f32 %v542_v63, %v416_v44 }
 0x15e   : > { %v545_v1 = vrot.slane %v543_v0, 1 }
 0x160   : > { %v547_v2 = vmax.f32 %v543_v0, %v545_v1 }
 0x162   : > { %549 = vrot.lane.b32.xlu0 %v547_v2, %s807_s14 }
 0x1d4   : > { %v550_v3 = vpop.permute.xlu0 %549 }
 0x1d5   : > { %v552_v4 = vmax.f32 %v547_v2, %v550_v3 }
 0x1d7   : > { %554 = vst.msk [vmem:[%s214_s26] sm:$0x1] %vm553_vm2, %v552_v4 }
 0x1d8   : > { %769 = shalt.err (!%p766_p3)
}
 0x1d9   : > { %700 = dma.vmem_to_hbm [thread:$0]  (%p876_p5), %s567_s30, 16, %s569_s7, %s556_s8  }
 0x1da PF: > { %p706_p4 = scmp.ge.s32.totalorder %s804_s21, 2  ;;  %s580_s13 = sand.u32 1, %s792_s18  }
 0x1db   : > { %s581_s14 = scalar_lea.sflag [#allocation5], %s580_s13 }
 0x1dc   : > { %p703_p7 = pnand %p706_p4, %p880_p6 }
 0x1de   : > { %p704_p8 = pneg %p703_p7 }
 0x1e0   : > { %787 = dma.done.wait (%p704_p8), %s581_s14, 16  }
 0x1e1   : > { %789 = vsyncadd (%p704_p8), %s581_s14, 4294967280  ;;  %p15_p9 = scmp.ge.s32.totalorder %s863_s24, 4   ;;  %s1234_s18 = smov %s796_s19 }
 0x1e2   : > { %s1235_s19 = smov %s800_s20  ;;  %s1236_s20 = smov %s874_s27 }
 0x1e3   : > { %s1237_s21 = smov %s863_s24  ;;  %17 = sbr.rel (!%p15_p9) target bundleno = 3 (0x3), region = 79 }
 0x1e8   :  { %586 = vsyncpa [#allocation5], 1 }
 0x1e9   :  { %588 = vsyncpa [#allocation5 + $0x1], 1 }

</bundles_post_ra>
